<compile_context>
chip_gen: v5e
topology: v5e:2x2
jax: 0.10.0
libtpu: 0.0.40
codegen_flags: <defaults>
</compile_context>

<pallas_src>
import functools

import jax
import jax.numpy as jnp
from jax.experimental import pallas as pl
from jax.experimental.pallas import tpu as pltpu


def _round_up(x, m):
    return ((x + m - 1) // m) * m


# ----------------------------- Pallas kernels -------------------------------


def _matmul_bias_kernel(x_ref, w_ref, b_ref, o_ref, *, relu):
    """o = x @ w + b (optional ReLU). bf16 MXU operands, f32 accumulate/epilogue."""
    acc = jnp.dot(x_ref[...], w_ref[...], preferred_element_type=jnp.float32)
    acc = acc + b_ref[...]
    if relu:
        acc = jnp.maximum(acc, 0.0)
    o_ref[...] = acc.astype(o_ref.dtype)


def pallas_matmul_bias(x, w, b, *, relu, out_dtype=jnp.float32, tm=512):
    """Row-gridded fused linear. Weights/bias stay VMEM-resident across the grid."""
    M, K = x.shape
    N = w.shape[1]
    tm = min(tm, _round_up(M, 8))
    Mp = _round_up(M, tm)
    if Mp != M:
        x = jnp.pad(x, ((0, Mp - M), (0, 0)))
    out = pl.pallas_call(
        functools.partial(_matmul_bias_kernel, relu=relu),
        out_shape=jax.ShapeDtypeStruct((Mp, N), out_dtype),
        grid=(Mp // tm,),
        in_specs=[
            pl.BlockSpec((tm, K), lambda i: (i, 0)),
            pl.BlockSpec((K, N), lambda i: (0, 0)),
            pl.BlockSpec((1, N), lambda i: (0, 0)),
        ],
        out_specs=pl.BlockSpec((tm, N), lambda i: (i, 0)),
        compiler_params=pltpu.CompilerParams(
            dimension_semantics=("parallel",),
            vmem_limit_bytes=32 * 1024 * 1024,
        ),
    )(x, w, b)
    return out[:M]


def _fused_encoder_head_kernel(p2_ref, c2w_ref, c2b_ref, muw_ref, mub_ref,
                               w1_ref, b1_ref, w2_ref, b2_ref, w3_ref, b3_ref,
                               mask_ref, act_ref, out_ref, *, action_dim, n_pos):
    """conv2 (per spatial position) -> fc_mu -> fused actor/critic MLP -> head."""
    bf16 = jnp.bfloat16
    f32 = jnp.float32
    tb = p2_ref.shape[0]
    latent = mub_ref.shape[1]

    # conv2 + frozen fc_mu fused without any cross-lane reshape:
    #   mu[b] = sum_p relu(patch[b, p] @ Wc2 + bc2) @ Wmu[p]  + bmu
    mu = jnp.zeros((tb, latent), f32)
    for p in range(n_pos):
        hp = jnp.dot(p2_ref[:, p, :], c2w_ref[...], preferred_element_type=f32)
        hp = jnp.maximum(hp + c2b_ref[...], 0.0)
        mu = mu + jnp.dot(hp.astype(bf16), muw_ref[p], preferred_element_type=f32)
    mu = mu + mub_ref[...]

    # Layer 1: actor1 || critic1 concatenated along N (shared input mu).
    h1 = jnp.maximum(jnp.dot(mu.astype(bf16), w1_ref[...],
                             preferred_element_type=f32) + b1_ref[...], 0.0)
    # Layer 2: block-diagonal actor2 / critic2 -> still one matmul.
    h2 = jnp.maximum(jnp.dot(h1.astype(bf16), w2_ref[...],
                             preferred_element_type=f32) + b2_ref[...], 0.0)
    # Layer 3: cols [0, action_dim) = actor logits, col action_dim = critic value,
    # remaining cols zero padding so matmul / store stay lane-dense (128 wide).
    out3 = jnp.dot(h2.astype(bf16), w3_ref[...],
                   preferred_element_type=f32) + b3_ref[...]

    col = jax.lax.broadcasted_iota(jnp.int32, out3.shape, 1)
    value = jnp.sum(jnp.where(col == action_dim, out3, 0.0), axis=1, keepdims=True)

    # Torch semantics: logits[~mask] = -1e8; softmax; Categorical(probs) with
    # clamp_probs(eps); log_prob gather; entropy = -(probs * log(clamped)).sum().
    masked = jnp.where(mask_ref[...] > 0.5, out3, jnp.float32(-100000000.0))
    m = jnp.max(masked, axis=1, keepdims=True)
    e = jnp.exp(masked - m)
    s = jnp.sum(e, axis=1, keepdims=True)
    probs = e * pl.reciprocal(s, approx=True)
    eps = jnp.float32(1.1920929e-07)            # torch clamp_probs eps for float32
    logp = jnp.log(jnp.clip(probs, eps, 1.0 - eps))

    onehot = col == act_ref[...]                # [tb,1] int32 actions broadcast
    lp = jnp.sum(jnp.where(onehot, logp, 0.0), axis=1, keepdims=True)
    in_support = col < action_dim               # exclude critic col + lane padding
    ent = -jnp.sum(jnp.where(in_support, probs * logp, 0.0), axis=1, keepdims=True)

    # Lane-dense packed output: col0=log_prob, col1=value, col2=entropy, rest 0.
    out_ref[...] = (jnp.where(col == 0, lp, 0.0)
                    + jnp.where(col == 1, value, 0.0)
                    + jnp.where(col == 2, ent, 0.0))


def fused_encoder_head(q, patches2, maskf, actions2d, *, action_dim, npad, n_pos):
    B = patches2.shape[0]
    kkc = patches2.shape[2]
    tb = min(256, _round_up(B, 8))
    Bp = _round_up(B, tb)
    if Bp != B:
        patches2 = jnp.pad(patches2, ((0, Bp - B), (0, 0), (0, 0)))
        maskf = jnp.pad(maskf, ((0, Bp - B), (0, 0)))
        actions2d = jnp.pad(actions2d, ((0, Bp - B), (0, 0)))

    def full(arr):
        nd = arr.ndim
        return pl.BlockSpec(arr.shape, lambda i, _nd=nd: (0,) * _nd)

    out = pl.pallas_call(
        functools.partial(_fused_encoder_head_kernel,
                          action_dim=action_dim, n_pos=n_pos),
        out_shape=jax.ShapeDtypeStruct((Bp, npad), jnp.float32),
        grid=(Bp // tb,),
        in_specs=[
            pl.BlockSpec((tb, n_pos, kkc), lambda i: (i, 0, 0)),   # conv2 patches
            full(q["c2_w"]), full(q["c2_b"]),
            full(q["mu_w"]), full(q["mu_b"]),
            full(q["w1"]), full(q["b1"]),
            full(q["w2"]), full(q["b2"]),
            full(q["w3"]), full(q["b3"]),
            pl.BlockSpec((tb, npad), lambda i: (i, 0)),            # padded mask (f32)
            pl.BlockSpec((tb, 1), lambda i: (i, 0)),               # actions (int32)
        ],
        out_specs=pl.BlockSpec((tb, npad), lambda i: (i, 0)),
        compiler_params=pltpu.CompilerParams(
            dimension_semantics=("parallel",),
            vmem_limit_bytes=32 * 1024 * 1024,
        ),
    )(patches2, q["c2_w"], q["c2_b"], q["mu_w"], q["mu_b"],
      q["w1"], q["b1"], q["w2"], q["b2"], q["w3"], q["b3"], maskf, actions2d)
    return out[:B]


# ------------------------------ glue (plain JAX) ----------------------------


def _im2col_nhwc(x, k, stride, pad):
    """x: [B,H,W,C] -> patches [B*Ho*Wo, k*k*C], row order (kh, kw, c)."""
    B, H, W, C = x.shape
    xp = jnp.pad(x, ((0, 0), (pad, pad), (pad, pad), (0, 0)))
    Ho = (H + 2 * pad - k) // stride + 1
    Wo = (W + 2 * pad - k) // stride + 1
    cols = []
    for kh in range(k):
        for kw in range(k):
            cols.append(xp[:, kh:kh + stride * Ho:stride,
                           kw:kw + stride * Wo:stride, :])
    p = jnp.stack(cols, axis=3)                       # [B, Ho, Wo, k*k, C]
    return p.reshape(B * Ho * Wo, k * k * C), Ho, Wo


# ------------------------------ parameters ----------------------------------


def _init_linear(key, fan_in, fan_out):
    kw, kb = jax.random.split(key)
    bound = 1.0 / (fan_in ** 0.5)
    w = jax.random.uniform(kw, (fan_in, fan_out), jnp.float32, -bound, bound)
    b = jax.random.uniform(kb, (1, fan_out), jnp.float32, -bound, bound)
    return w, b


def _init_conv(key, cin, cout, k):
    kw, kb = jax.random.split(key)
    fan_in = cin * k * k
    bound = 1.0 / (fan_in ** 0.5)
    w = jax.random.uniform(kw, (cout, cin, k, k), jnp.float32, -bound, bound)
    b = jax.random.uniform(kb, (cout,), jnp.float32, -bound, bound)
    return w, b


def init_params(key, in_channels, height, width, latent_dim, action_dim):
    """Torch-layout parameters (as they would come out of the state_dict)."""
    keys = jax.random.split(key, 9)
    p = {}
    p["conv1_w"], p["conv1_b"] = _init_conv(keys[0], in_channels, 16, 3)
    p["conv2_w"], p["conv2_b"] = _init_conv(keys[1], 16, 32, 3)
    h2, w2 = height // 4, width // 4          # two stride-2 convs with pad=1
    flat = 32 * h2 * w2
    p["fc_mu_w"], p["fc_mu_b"] = _init_linear(keys[2], flat, latent_dim)
    p["actor1_w"], p["actor1_b"] = _init_linear(keys[3], latent_dim, 256)
    p["actor2_w"], p["actor2_b"] = _init_linear(keys[4], 256, 128)
    p["actor3_w"], p["actor3_b"] = _init_linear(keys[5], 128, action_dim)
    p["critic1_w"], p["critic1_b"] = _init_linear(keys[6], latent_dim, 256)
    p["critic2_w"], p["critic2_b"] = _init_linear(keys[7], 256, 128)
    p["critic3_w"], p["critic3_b"] = _init_linear(keys[8], 128, 1)
    return p


def prepare_params(p, *, action_dim, latent_dim, conv2_out_hw, npad):
    """One-time reshape / concat / cast of torch-layout params into kernel form."""
    bf16 = jnp.bfloat16

    def conv_w_to_mat(w):  # [Cout,Cin,kH,kW] -> [kH*kW*Cin, Cout] (im2col row order)
        cout = w.shape[0]
        return w.transpose(2, 3, 1, 0).reshape(-1, cout).astype(bf16)

    oh, ow = conv2_out_hw
    c2out = p["conv2_w"].shape[0]

    q = {}
    q["c1_w"] = conv_w_to_mat(p["conv1_w"])
    q["c1_b"] = p["conv1_b"].reshape(1, -1)
    q["c2_w"] = conv_w_to_mat(p["conv2_w"])
    q["c2_b"] = p["conv2_b"].reshape(1, -1)

    # fc_mu: fold PyTorch's NCHW .view(B,-1) flatten order AND split per spatial
    # position -> [P, c2out, latent] so conv2 + fc_mu fuse without any cross-lane
    # reshape inside the kernel.
    w_mu = p["fc_mu_w"].reshape(c2out, oh, ow, latent_dim)
    w_mu = w_mu.transpose(1, 2, 0, 3).reshape(oh * ow, c2out, latent_dim)
    q["mu_w"] = w_mu.astype(bf16)
    q["mu_b"] = p["fc_mu_b"]

    n1a, n1c = p["actor1_w"].shape[1], p["critic1_w"].shape[1]
    n2a, n2c = p["actor2_w"].shape[1], p["critic2_w"].shape[1]

    # Layer 1: actor/critic share input mu -> plain concat along N.
    q["w1"] = jnp.concatenate([p["actor1_w"], p["critic1_w"]], axis=1).astype(bf16)
    q["b1"] = jnp.concatenate([p["actor1_b"], p["critic1_b"]], axis=1)

    # Layer 2: block-diagonal so actor/critic stay a single fused matmul.
    w2 = jnp.zeros((n1a + n1c, n2a + n2c), jnp.float32)
    w2 = w2.at[:n1a, :n2a].set(p["actor2_w"])
    w2 = w2.at[n1a:, n2a:].set(p["critic2_w"])
    q["w2"] = w2.astype(bf16)
    q["b2"] = jnp.concatenate([p["actor2_b"], p["critic2_b"]], axis=1)

    # Layer 3: actor logits in cols [0, action_dim), critic value in col action_dim,
    # zero-padded to a lane-dense width of `npad`.
    w3 = jnp.zeros((n2a + n2c, npad), jnp.float32)
    w3 = w3.at[:n2a, :action_dim].set(p["actor3_w"])
    w3 = w3.at[n2a:, action_dim:action_dim + 1].set(p["critic3_w"])
    q["w3"] = w3.astype(bf16)
    b3 = jnp.zeros((1, npad), jnp.float32)
    b3 = b3.at[:, :action_dim].set(p["actor3_b"])
    b3 = b3.at[:, action_dim:action_dim + 1].set(p["critic3_b"])
    q["b3"] = b3
    return q


# ------------------------------ forward (evaluate) ---------------------------


def actor_critic_vae_evaluate(q, states, actions, action_masks, *, action_dim, npad):
    """Mirrors ActorCriticVAE.evaluate(states, actions, action_masks).

    states:       [B, C, H, W] float32 (NCHW, PyTorch Conv2d convention)
    actions:      [B] int32
    action_masks: [B, action_dim] bool
    returns (action_logprobs [B], state_values [B, 1], dist_entropy [B])
    """
    B = states.shape[0]
    # Single NCHW->NHWC transpose at entry; bf16 from here on (MXU operand dtype)
    x = jnp.transpose(states, (0, 2, 3, 1)).astype(jnp.bfloat16)

    # conv1: JAX-level im2col + fused Pallas matmul+bias+ReLU, bf16 activations out.
    p1, h1o, w1o = _im2col_nhwc(x, 3, 2, 1)
    c1 = pallas_matmul_bias(p1, q["c1_w"], q["c1_b"], relu=True,
                            out_dtype=jnp.bfloat16)
    c1 = c1.reshape(B, h1o, w1o, q["c1_w"].shape[1])

    # conv2 patches (glue); conv2 + fc_mu + actor/critic head run in ONE kernel.
    p2, h2o, w2o = _im2col_nhwc(c1, 3, 2, 1)
    n_pos = h2o * w2o
    p2 = p2.reshape(B, n_pos, -1)

    maskf = jnp.pad(action_masks.astype(jnp.float32),
                    ((0, 0), (0, npad - action_dim)))
    actions2d = actions.reshape(B, 1).astype(jnp.int32)

    out = fused_encoder_head(q, p2, maskf, actions2d,
                             action_dim=action_dim, npad=npad, n_pos=n_pos)
    return out[:, 0], out[:, 1:2], out[:, 2]


# ---------------------------------- main -------------------------------------


if __name__ == "__main__":
    B = 2
    H, W, C = 16, 16, 4       # obs_shape = (16, 16, 4) -> NCHW input [B, 4, 16, 16]
    action_dim = 8
    latent_dim = 32
    npad = _round_up(action_dim + 1, 128)   # lane-dense width for the fused head

    root = jax.random.PRNGKey(0)
    k_param, k_state, k_act, k_mask = jax.random.split(root, 4)

    params = init_params(k_param, C, H, W, latent_dim, action_dim)
    q = prepare_params(params, action_dim=action_dim, latent_dim=latent_dim,
                       conv2_out_hw=(H // 4, W // 4), npad=npad)

    states = jax.random.normal(k_state, (B, C, H, W), dtype=jnp.float32)
    actions = jax.random.randint(k_act, (B,), 0, action_dim, dtype=jnp.int32)
    masks = jax.random.uniform(k_mask, (B, action_dim)) > 0.3
    # ensure taken actions are always legal
    masks = masks.at[jnp.arange(B), actions].set(True)

    fwd = jax.jit(functools.partial(actor_critic_vae_evaluate,
                                    action_dim=action_dim, npad=npad))
    logprobs, values, entropy = fwd(q, states, actions, masks)
    jax.block_until_ready((logprobs, values, entropy))

    assert logprobs.shape == (B,)
    assert values.shape == (B, 1)
    assert entropy.shape == (B,)
    assert bool(jnp.all(jnp.isfinite(logprobs)))
    assert bool(jnp.all(jnp.isfinite(values)))
    assert bool(jnp.all(jnp.isfinite(entropy)))

    print("KERNEL_OK")
</pallas_src>

<mosaic_0001>
module attributes {stable_mosaic.version = 11 : i64} {
  func.func @_matmul_bias_kernel(%arg0: i32, %arg1: memref<128x36xbf16, #tpu.memory_space<vmem>>, %arg2: memref<36x16xbf16, #tpu.memory_space<vmem>>, %arg3: memref<1x16xf32, #tpu.memory_space<vmem>>, %arg4: memref<128x16xbf16, #tpu.memory_space<vmem>>) attributes {dimension_semantics = [#tpu.dimension_semantics<parallel>], iteration_bounds = array<i64: 1>, scalar_prefetch = 0 : i64, scratch_operands = 0 : i64, tpu.core_type = #tpu.core_type<tc>, window_params = [{transform_indices = @transform_0, window_bounds = array<i64: 128, 36>}, {pipeline_mode = #tpu.pipeline_mode<synchronous>, transform_indices = @transform_1, window_bounds = array<i64: 36, 16>}, {pipeline_mode = #tpu.pipeline_mode<synchronous>, transform_indices = @transform_2, window_bounds = array<i64: 1, 16>}, {transform_indices = @transform_3, window_bounds = array<i64: 128, 16>}]} {
    %c0 = arith.constant 0 : index
    %c0_0 = arith.constant 0 : index
    %0 = vector.load %arg1[%c0, %c0_0] : memref<128x36xbf16, #tpu.memory_space<vmem>>, vector<128x36xbf16>
    %c0_1 = arith.constant 0 : index
    %c0_2 = arith.constant 0 : index
    %1 = vector.load %arg2[%c0_1, %c0_2] : memref<36x16xbf16, #tpu.memory_space<vmem>>, vector<36x16xbf16>
    %cst = arith.constant dense<0.000000e+00> : vector<128x16xf32>
    %2 = tpu.matmul %0, %1, %cst {dimension_numbers = #tpu.dot_dimension_numbers<[1], [0], [0], [1], [0, 0, 1, 1], [], []>} : vector<128x36xbf16>, vector<36x16xbf16>, vector<128x16xf32> -> vector<128x16xf32>
    %c0_3 = arith.constant 0 : index
    %c0_4 = arith.constant 0 : index
    %3 = vector.load %arg3[%c0_3, %c0_4] : memref<1x16xf32, #tpu.memory_space<vmem>>, vector<1x16xf32>
    %4 = vector.broadcast %3 : vector<1x16xf32> to vector<128x16xf32>
    %5 = arith.addf %2, %4 : vector<128x16xf32>
    %cst_5 = arith.constant 0.000000e+00 : f32
    %6 = vector.broadcast %cst_5 : f32 to vector<128x16xf32>
    %7 = arith.maximumf %5, %6 : vector<128x16xf32>
    %8 = arith.truncf %7 : vector<128x16xf32> to vector<128x16xbf16>
    %c0_6 = arith.constant 0 : index
    %c0_7 = arith.constant 0 : index
    %9 = vector.load %arg4[%c0_6, %c0_7] : memref<128x16xbf16, #tpu.memory_space<vmem>>, vector<128x16xbf16>
    tpu.vector_store %arg4[%c0_6, %c0_7], %8 {strides = array<i32>} : memref<128x16xbf16, #tpu.memory_space<vmem>>, vector<128x16xbf16>,
    return
  }
  func.func @transform_0(%arg0: i32) -> (i32, i32) {
    %c0_i32 = arith.constant 0 : i32
    %c0_i32_0 = arith.constant 0 : i32
    return %arg0, %c0_i32 : i32, i32
  }
  func.func @transform_1(%arg0: i32) -> (i32, i32) {
    %c0_i32 = arith.constant 0 : i32
    %c0_i32_0 = arith.constant 0 : i32
    %c0_i32_1 = arith.constant 0 : i32
    return %c0_i32, %c0_i32_0 : i32, i32
  }
  func.func @transform_2(%arg0: i32) -> (i32, i32) {
    %c0_i32 = arith.constant 0 : i32
    %c0_i32_0 = arith.constant 0 : i32
    %c0_i32_1 = arith.constant 0 : i32
    return %c0_i32, %c0_i32_0 : i32, i32
  }
  func.func @transform_3(%arg0: i32) -> (i32, i32) {
    %c0_i32 = arith.constant 0 : i32
    %c0_i32_0 = arith.constant 0 : i32
    return %arg0, %c0_i32 : i32, i32
  }
}

module attributes {stable_mosaic.version = 11 : i64} {
  func.func @_fused_encoder_head_kernel(%arg0: i32, %arg1: memref<8x16x144xbf16, #tpu.memory_space<vmem>>, %arg2: memref<144x32xbf16, #tpu.memory_space<vmem>>, %arg3: memref<1x32xf32, #tpu.memory_space<vmem>>, %arg4: memref<16x32x32xbf16, #tpu.memory_space<vmem>>, %arg5: memref<1x32xf32, #tpu.memory_space<vmem>>, %arg6: memref<32x512xbf16, #tpu.memory_space<vmem>>, %arg7: memref<1x512xf32, #tpu.memory_space<vmem>>, %arg8: memref<512x256xbf16, #tpu.memory_space<vmem>>, %arg9: memref<1x256xf32, #tpu.memory_space<vmem>>, %arg10: memref<256x128xbf16, #tpu.memory_space<vmem>>, %arg11: memref<1x128xf32, #tpu.memory_space<vmem>>, %arg12: memref<8x128xf32, #tpu.memory_space<vmem>>, %arg13: memref<8x1xi32, #tpu.memory_space<vmem>>, %arg14: memref<8x128xf32, #tpu.memory_space<vmem>>) attributes {dimension_semantics = [#tpu.dimension_semantics<parallel>], iteration_bounds = array<i64: 1>, scalar_prefetch = 0 : i64, scratch_operands = 0 : i64, tpu.core_type = #tpu.core_type<tc>, window_params = [{transform_indices = @transform_0, window_bounds = array<i64: 8, 16, 144>}, {pipeline_mode = #tpu.pipeline_mode<synchronous>, transform_indices = @transform_1, window_bounds = array<i64: 144, 32>}, {pipeline_mode = #tpu.pipeline_mode<synchronous>, transform_indices = @transform_2, window_bounds = array<i64: 1, 32>}, {pipeline_mode = #tpu.pipeline_mode<synchronous>, transform_indices = @transform_3, window_bounds = array<i64: 16, 32, 32>}, {pipeline_mode = #tpu.pipeline_mode<synchronous>, transform_indices = @transform_4, window_bounds = array<i64: 1, 32>}, {pipeline_mode = #tpu.pipeline_mode<synchronous>, transform_indices = @transform_5, window_bounds = array<i64: 32, 512>}, {pipeline_mode = #tpu.pipeline_mode<synchronous>, transform_indices = @transform_6, window_bounds = array<i64: 1, 512>}, {pipeline_mode = #tpu.pipeline_mode<synchronous>, transform_indices = @transform_7, window_bounds = array<i64: 512, 256>}, {pipeline_mode = #tpu.pipeline_mode<synchronous>, transform_indices = @transform_8, window_bounds = array<i64: 1, 256>}, {pipeline_mode = #tpu.pipeline_mode<synchronous>, transform_indices = @transform_9, window_bounds = array<i64: 256, 128>}, {pipeline_mode = #tpu.pipeline_mode<synchronous>, transform_indices = @transform_10, window_bounds = array<i64: 1, 128>}, {transform_indices = @transform_11, window_bounds = array<i64: 8, 128>}, {transform_indices = @transform_12, window_bounds = array<i64: 8, 1>}, {transform_indices = @transform_13, window_bounds = array<i64: 8, 128>}]} {
    %cst = arith.constant 0.000000e+00 : f32
    %0 = vector.broadcast %cst : f32 to vector<8x32xf32>
    %c0 = arith.constant 0 : index
    %c0_0 = arith.constant 0 : index
    %c0_1 = arith.constant 0 : index
    %1 = vector.load %arg1[%c0, %c0_0, %c0_1] : memref<8x16x144xbf16, #tpu.memory_space<vmem>>, vector<8x1x144xbf16>
    %2 = vector.shape_cast %1 : vector<8x1x144xbf16> to vector<8x144xbf16>
    %c0_2 = arith.constant 0 : index
    %c0_3 = arith.constant 0 : index
    %3 = vector.load %arg2[%c0_2, %c0_3] : memref<144x32xbf16, #tpu.memory_space<vmem>>, vector<144x32xbf16>
    %cst_4 = arith.constant dense<0.000000e+00> : vector<8x32xf32>
    %4 = tpu.matmul %2, %3, %cst_4 {dimension_numbers = #tpu.dot_dimension_numbers<[1], [0], [0], [1], [0, 0, 1, 1], [], []>} : vector<8x144xbf16>, vector<144x32xbf16>, vector<8x32xf32> -> vector<8x32xf32>
    %c0_5 = arith.constant 0 : index
    %c0_6 = arith.constant 0 : index
    %5 = vector.load %arg3[%c0_5, %c0_6] : memref<1x32xf32, #tpu.memory_space<vmem>>, vector<1x32xf32>
    %6 = vector.broadcast %5 : vector<1x32xf32> to vector<8x32xf32>
    %7 = arith.addf %4, %6 : vector<8x32xf32>
    %cst_7 = arith.constant 0.000000e+00 : f32
    %8 = vector.broadcast %cst_7 : f32 to vector<8x32xf32>
    %9 = arith.maximumf %7, %8 : vector<8x32xf32>
    %10 = arith.truncf %9 : vector<8x32xf32> to vector<8x32xbf16>
    %c0_8 = arith.constant 0 : index
    %c0_9 = arith.constant 0 : index
    %c0_10 = arith.constant 0 : index
    %11 = vector.load %arg4[%c0_8, %c0_9, %c0_10] : memref<16x32x32xbf16, #tpu.memory_space<vmem>>, vector<1x32x32xbf16>
    %12 = vector.shape_cast %11 : vector<1x32x32xbf16> to vector<32x32xbf16>
    %cst_11 = arith.constant dense<0.000000e+00> : vector<8x32xf32>
    %13 = tpu.matmul %10, %12, %cst_11 {dimension_numbers = #tpu.dot_dimension_numbers<[1], [0], [0], [1], [0, 0, 1, 1], [], []>} : vector<8x32xbf16>, vector<32x32xbf16>, vector<8x32xf32> -> vector<8x32xf32>
    %14 = arith.addf %0, %13 : vector<8x32xf32>
    %c0_12 = arith.constant 0 : index
    %c1 = arith.constant 1 : index
    %c0_13 = arith.constant 0 : index
    %15 = vector.load %arg1[%c0_12, %c1, %c0_13] : memref<8x16x144xbf16, #tpu.memory_space<vmem>>, vector<8x1x144xbf16>
    %16 = vector.shape_cast %15 : vector<8x1x144xbf16> to vector<8x144xbf16>
    %c0_14 = arith.constant 0 : index
    %c0_15 = arith.constant 0 : index
    %17 = vector.load %arg2[%c0_14, %c0_15] : memref<144x32xbf16, #tpu.memory_space<vmem>>, vector<144x32xbf16>
    %cst_16 = arith.constant dense<0.000000e+00> : vector<8x32xf32>
    %18 = tpu.matmul %16, %17, %cst_16 {dimension_numbers = #tpu.dot_dimension_numbers<[1], [0], [0], [1], [0, 0, 1, 1], [], []>} : vector<8x144xbf16>, vector<144x32xbf16>, vector<8x32xf32> -> vector<8x32xf32>
    %c0_17 = arith.constant 0 : index
    %c0_18 = arith.constant 0 : index
    %19 = vector.load %arg3[%c0_17, %c0_18] : memref<1x32xf32, #tpu.memory_space<vmem>>, vector<1x32xf32>
    %20 = vector.broadcast %19 : vector<1x32xf32> to vector<8x32xf32>
    %21 = arith.addf %18, %20 : vector<8x32xf32>
    %cst_19 = arith.constant 0.000000e+00 : f32
    %22 = vector.broadcast %cst_19 : f32 to vector<8x32xf32>
    %23 = arith.maximumf %21, %22 : vector<8x32xf32>
    %24 = arith.truncf %23 : vector<8x32xf32> to vector<8x32xbf16>
    %c1_20 = arith.constant 1 : index
    %c0_21 = arith.constant 0 : index
    %c0_22 = arith.constant 0 : index
    %25 = vector.load %arg4[%c1_20, %c0_21, %c0_22] : memref<16x32x32xbf16, #tpu.memory_space<vmem>>, vector<1x32x32xbf16>
    %26 = vector.shape_cast %25 : vector<1x32x32xbf16> to vector<32x32xbf16>
    %cst_23 = arith.constant dense<0.000000e+00> : vector<8x32xf32>
    %27 = tpu.matmul %24, %26, %cst_23 {dimension_numbers = #tpu.dot_dimension_numbers<[1], [0], [0], [1], [0, 0, 1, 1], [], []>} : vector<8x32xbf16>, vector<32x32xbf16>, vector<8x32xf32> -> vector<8x32xf32>
    %28 = arith.addf %14, %27 : vector<8x32xf32>
    %c0_24 = arith.constant 0 : index
    %c2 = arith.constant 2 : index
    %c0_25 = arith.constant 0 : index
    %29 = vector.load %arg1[%c0_24, %c2, %c0_25] : memref<8x16x144xbf16, #tpu.memory_space<vmem>>, vector<8x1x144xbf16>
    %30 = vector.shape_cast %29 : vector<8x1x144xbf16> to vector<8x144xbf16>
    %c0_26 = arith.constant 0 : index
    %c0_27 = arith.constant 0 : index
    %31 = vector.load %arg2[%c0_26, %c0_27] : memref<144x32xbf16, #tpu.memory_space<vmem>>, vector<144x32xbf16>
    %cst_28 = arith.constant dense<0.000000e+00> : vector<8x32xf32>
    %32 = tpu.matmul %30, %31, %cst_28 {dimension_numbers = #tpu.dot_dimension_numbers<[1], [0], [0], [1], [0, 0, 1, 1], [], []>} : vector<8x144xbf16>, vector<144x32xbf16>, vector<8x32xf32> -> vector<8x32xf32>
    %c0_29 = arith.constant 0 : index
    %c0_30 = arith.constant 0 : index
    %33 = vector.load %arg3[%c0_29, %c0_30] : memref<1x32xf32, #tpu.memory_space<vmem>>, vector<1x32xf32>
    %34 = vector.broadcast %33 : vector<1x32xf32> to vector<8x32xf32>
    %35 = arith.addf %32, %34 : vector<8x32xf32>
    %cst_31 = arith.constant 0.000000e+00 : f32
    %36 = vector.broadcast %cst_31 : f32 to vector<8x32xf32>
    %37 = arith.maximumf %35, %36 : vector<8x32xf32>
    %38 = arith.truncf %37 : vector<8x32xf32> to vector<8x32xbf16>
    %c2_32 = arith.constant 2 : index
    %c0_33 = arith.constant 0 : index
    %c0_34 = arith.constant 0 : index
    %39 = vector.load %arg4[%c2_32, %c0_33, %c0_34] : memref<16x32x32xbf16, #tpu.memory_space<vmem>>, vector<1x32x32xbf16>
    %40 = vector.shape_cast %39 : vector<1x32x32xbf16> to vector<32x32xbf16>
    %cst_35 = arith.constant dense<0.000000e+00> : vector<8x32xf32>
    %41 = tpu.matmul %38, %40, %cst_35 {dimension_numbers = #tpu.dot_dimension_numbers<[1], [0], [0], [1], [0, 0, 1, 1], [], []>} : vector<8x32xbf16>, vector<32x32xbf16>, vector<8x32xf32> -> vector<8x32xf32>
    %42 = arith.addf %28, %41 : vector<8x32xf32>
    %c0_36 = arith.constant 0 : index
    %c3 = arith.constant 3 : index
    %c0_37 = arith.constant 0 : index
    %43 = vector.load %arg1[%c0_36, %c3, %c0_37] : memref<8x16x144xbf16, #tpu.memory_space<vmem>>, vector<8x1x144xbf16>
    %44 = vector.shape_cast %43 : vector<8x1x144xbf16> to vector<8x144xbf16>
    %c0_38 = arith.constant 0 : index
    %c0_39 = arith.constant 0 : index
    %45 = vector.load %arg2[%c0_38, %c0_39] : memref<144x32xbf16, #tpu.memory_space<vmem>>, vector<144x32xbf16>
    %cst_40 = arith.constant dense<0.000000e+00> : vector<8x32xf32>
    %46 = tpu.matmul %44, %45, %cst_40 {dimension_numbers = #tpu.dot_dimension_numbers<[1], [0], [0], [1], [0, 0, 1, 1], [], []>} : vector<8x144xbf16>, vector<144x32xbf16>, vector<8x32xf32> -> vector<8x32xf32>
    %c0_41 = arith.constant 0 : index
    %c0_42 = arith.constant 0 : index
    %47 = vector.load %arg3[%c0_41, %c0_42] : memref<1x32xf32, #tpu.memory_space<vmem>>, vector<1x32xf32>
    %48 = vector.broadcast %47 : vector<1x32xf32> to vector<8x32xf32>
    %49 = arith.addf %46, %48 : vector<8x32xf32>
    %cst_43 = arith.constant 0.000000e+00 : f32
    %50 = vector.broadcast %cst_43 : f32 to vector<8x32xf32>
    %51 = arith.maximumf %49, %50 : vector<8x32xf32>
    %52 = arith.truncf %51 : vector<8x32xf32> to vector<8x32xbf16>
    %c3_44 = arith.constant 3 : index
    %c0_45 = arith.constant 0 : index
    %c0_46 = arith.constant 0 : index
    %53 = vector.load %arg4[%c3_44, %c0_45, %c0_46] : memref<16x32x32xbf16, #tpu.memory_space<vmem>>, vector<1x32x32xbf16>
    %54 = vector.shape_cast %53 : vector<1x32x32xbf16> to vector<32x32xbf16>
    %cst_47 = arith.constant dense<0.000000e+00> : vector<8x32xf32>
    %55 = tpu.matmul %52, %54, %cst_47 {dimension_numbers = #tpu.dot_dimension_numbers<[1], [0], [0], [1], [0, 0, 1, 1], [], []>} : vector<8x32xbf16>, vector<32x32xbf16>, vector<8x32xf32> -> vector<8x32xf32>
    %56 = arith.addf %42, %55 : vector<8x32xf32>
    %c0_48 = arith.constant 0 : index
    %c4 = arith.constant 4 : index
    %c0_49 = arith.constant 0 : index
    %57 = vector.load %arg1[%c0_48, %c4, %c0_49] : memref<8x16x144xbf16, #tpu.memory_space<vmem>>, vector<8x1x144xbf16>
    %58 = vector.shape_cast %57 : vector<8x1x144xbf16> to vector<8x144xbf16>
    %c0_50 = arith.constant 0 : index
    %c0_51 = arith.constant 0 : index
    %59 = vector.load %arg2[%c0_50, %c0_51] : memref<144x32xbf16, #tpu.memory_space<vmem>>, vector<144x32xbf16>
    %cst_52 = arith.constant dense<0.000000e+00> : vector<8x32xf32>
    %60 = tpu.matmul %58, %59, %cst_52 {dimension_numbers = #tpu.dot_dimension_numbers<[1], [0], [0], [1], [0, 0, 1, 1], [], []>} : vector<8x144xbf16>, vector<144x32xbf16>, vector<8x32xf32> -> vector<8x32xf32>
    %c0_53 = arith.constant 0 : index
    %c0_54 = arith.constant 0 : index
    %61 = vector.load %arg3[%c0_53, %c0_54] : memref<1x32xf32, #tpu.memory_space<vmem>>, vector<1x32xf32>
    %62 = vector.broadcast %61 : vector<1x32xf32> to vector<8x32xf32>
    %63 = arith.addf %60, %62 : vector<8x32xf32>
    %cst_55 = arith.constant 0.000000e+00 : f32
    %64 = vector.broadcast %cst_55 : f32 to vector<8x32xf32>
    %65 = arith.maximumf %63, %64 : vector<8x32xf32>
    %66 = arith.truncf %65 : vector<8x32xf32> to vector<8x32xbf16>
    %c4_56 = arith.constant 4 : index
    %c0_57 = arith.constant 0 : index
    %c0_58 = arith.constant 0 : index
    %67 = vector.load %arg4[%c4_56, %c0_57, %c0_58] : memref<16x32x32xbf16, #tpu.memory_space<vmem>>, vector<1x32x32xbf16>
    %68 = vector.shape_cast %67 : vector<1x32x32xbf16> to vector<32x32xbf16>
    %cst_59 = arith.constant dense<0.000000e+00> : vector<8x32xf32>
    %69 = tpu.matmul %66, %68, %cst_59 {dimension_numbers = #tpu.dot_dimension_numbers<[1], [0], [0], [1], [0, 0, 1, 1], [], []>} : vector<8x32xbf16>, vector<32x32xbf16>, vector<8x32xf32> -> vector<8x32xf32>
    %70 = arith.addf %56, %69 : vector<8x32xf32>
    %c0_60 = arith.constant 0 : index
    %c5 = arith.constant 5 : index
    %c0_61 = arith.constant 0 : index
    %71 = vector.load %arg1[%c0_60, %c5, %c0_61] : memref<8x16x144xbf16, #tpu.memory_space<vmem>>, vector<8x1x144xbf16>
    %72 = vector.shape_cast %71 : vector<8x1x144xbf16> to vector<8x144xbf16>
    %c0_62 = arith.constant 0 : index
    %c0_63 = arith.constant 0 : index
    %73 = vector.load %arg2[%c0_62, %c0_63] : memref<144x32xbf16, #tpu.memory_space<vmem>>, vector<144x32xbf16>
    %cst_64 = arith.constant dense<0.000000e+00> : vector<8x32xf32>
    %74 = tpu.matmul %72, %73, %cst_64 {dimension_numbers = #tpu.dot_dimension_numbers<[1], [0], [0], [1], [0, 0, 1, 1], [], []>} : vector<8x144xbf16>, vector<144x32xbf16>, vector<8x32xf32> -> vector<8x32xf32>
    %c0_65 = arith.constant 0 : index
    %c0_66 = arith.constant 0 : index
    %75 = vector.load %arg3[%c0_65, %c0_66] : memref<1x32xf32, #tpu.memory_space<vmem>>, vector<1x32xf32>
    %76 = vector.broadcast %75 : vector<1x32xf32> to vector<8x32xf32>
    %77 = arith.addf %74, %76 : vector<8x32xf32>
    %cst_67 = arith.constant 0.000000e+00 : f32
    %78 = vector.broadcast %cst_67 : f32 to vector<8x32xf32>
    %79 = arith.maximumf %77, %78 : vector<8x32xf32>
    %80 = arith.truncf %79 : vector<8x32xf32> to vector<8x32xbf16>
    %c5_68 = arith.constant 5 : index
    %c0_69 = arith.constant 0 : index
    %c0_70 = arith.constant 0 : index
    %81 = vector.load %arg4[%c5_68, %c0_69, %c0_70] : memref<16x32x32xbf16, #tpu.memory_space<vmem>>, vector<1x32x32xbf16>
    %82 = vector.shape_cast %81 : vector<1x32x32xbf16> to vector<32x32xbf16>
    %cst_71 = arith.constant dense<0.000000e+00> : vector<8x32xf32>
    %83 = tpu.matmul %80, %82, %cst_71 {dimension_numbers = #tpu.dot_dimension_numbers<[1], [0], [0], [1], [0, 0, 1, 1], [], []>} : vector<8x32xbf16>, vector<32x32xbf16>, vector<8x32xf32> -> vector<8x32xf32>
    %84 = arith.addf %70, %83 : vector<8x32xf32>
    %c0_72 = arith.constant 0 : index
    %c6 = arith.constant 6 : index
    %c0_73 = arith.constant 0 : index
    %85 = vector.load %arg1[%c0_72, %c6, %c0_73] : memref<8x16x144xbf16, #tpu.memory_space<vmem>>, vector<8x1x144xbf16>
    %86 = vector.shape_cast %85 : vector<8x1x144xbf16> to vector<8x144xbf16>
    %c0_74 = arith.constant 0 : index
    %c0_75 = arith.constant 0 : index
    %87 = vector.load %arg2[%c0_74, %c0_75] : memref<144x32xbf16, #tpu.memory_space<vmem>>, vector<144x32xbf16>
    %cst_76 = arith.constant dense<0.000000e+00> : vector<8x32xf32>
    %88 = tpu.matmul %86, %87, %cst_76 {dimension_numbers = #tpu.dot_dimension_numbers<[1], [0], [0], [1], [0, 0, 1, 1], [], []>} : vector<8x144xbf16>, vector<144x32xbf16>, vector<8x32xf32> -> vector<8x32xf32>
    %c0_77 = arith.constant 0 : index
    %c0_78 = arith.constant 0 : index
    %89 = vector.load %arg3[%c0_77, %c0_78] : memref<1x32xf32, #tpu.memory_space<vmem>>, vector<1x32xf32>
    %90 = vector.broadcast %89 : vector<1x32xf32> to vector<8x32xf32>
    %91 = arith.addf %88, %90 : vector<8x32xf32>
    %cst_79 = arith.constant 0.000000e+00 : f32
    %92 = vector.broadcast %cst_79 : f32 to vector<8x32xf32>
    %93 = arith.maximumf %91, %92 : vector<8x32xf32>
    %94 = arith.truncf %93 : vector<8x32xf32> to vector<8x32xbf16>
    %c6_80 = arith.constant 6 : index
    %c0_81 = arith.constant 0 : index
    %c0_82 = arith.constant 0 : index
    %95 = vector.load %arg4[%c6_80, %c0_81, %c0_82] : memref<16x32x32xbf16, #tpu.memory_space<vmem>>, vector<1x32x32xbf16>
    %96 = vector.shape_cast %95 : vector<1x32x32xbf16> to vector<32x32xbf16>
    %cst_83 = arith.constant dense<0.000000e+00> : vector<8x32xf32>
    %97 = tpu.matmul %94, %96, %cst_83 {dimension_numbers = #tpu.dot_dimension_numbers<[1], [0], [0], [1], [0, 0, 1, 1], [], []>} : vector<8x32xbf16>, vector<32x32xbf16>, vector<8x32xf32> -> vector<8x32xf32>
    %98 = arith.addf %84, %97 : vector<8x32xf32>
    %c0_84 = arith.constant 0 : index
    %c7 = arith.constant 7 : index
    %c0_85 = arith.constant 0 : index
    %99 = vector.load %arg1[%c0_84, %c7, %c0_85] : memref<8x16x144xbf16, #tpu.memory_space<vmem>>, vector<8x1x144xbf16>
    %100 = vector.shape_cast %99 : vector<8x1x144xbf16> to vector<8x144xbf16>
    %c0_86 = arith.constant 0 : index
    %c0_87 = arith.constant 0 : index
    %101 = vector.load %arg2[%c0_86, %c0_87] : memref<144x32xbf16, #tpu.memory_space<vmem>>, vector<144x32xbf16>
    %cst_88 = arith.constant dense<0.000000e+00> : vector<8x32xf32>
    %102 = tpu.matmul %100, %101, %cst_88 {dimension_numbers = #tpu.dot_dimension_numbers<[1], [0], [0], [1], [0, 0, 1, 1], [], []>} : vector<8x144xbf16>, vector<144x32xbf16>, vector<8x32xf32> -> vector<8x32xf32>
    %c0_89 = arith.constant 0 : index
    %c0_90 = arith.constant 0 : index
    %103 = vector.load %arg3[%c0_89, %c0_90] : memref<1x32xf32, #tpu.memory_space<vmem>>, vector<1x32xf32>
    %104 = vector.broadcast %103 : vector<1x32xf32> to vector<8x32xf32>
    %105 = arith.addf %102, %104 : vector<8x32xf32>
    %cst_91 = arith.constant 0.000000e+00 : f32
    %106 = vector.broadcast %cst_91 : f32 to vector<8x32xf32>
    %107 = arith.maximumf %105, %106 : vector<8x32xf32>
    %108 = arith.truncf %107 : vector<8x32xf32> to vector<8x32xbf16>
    %c7_92 = arith.constant 7 : index
    %c0_93 = arith.constant 0 : index
    %c0_94 = arith.constant 0 : index
    %109 = vector.load %arg4[%c7_92, %c0_93, %c0_94] : memref<16x32x32xbf16, #tpu.memory_space<vmem>>, vector<1x32x32xbf16>
    %110 = vector.shape_cast %109 : vector<1x32x32xbf16> to vector<32x32xbf16>
    %cst_95 = arith.constant dense<0.000000e+00> : vector<8x32xf32>
    %111 = tpu.matmul %108, %110, %cst_95 {dimension_numbers = #tpu.dot_dimension_numbers<[1], [0], [0], [1], [0, 0, 1, 1], [], []>} : vector<8x32xbf16>, vector<32x32xbf16>, vector<8x32xf32> -> vector<8x32xf32>
    %112 = arith.addf %98, %111 : vector<8x32xf32>
    %c0_96 = arith.constant 0 : index
    %c8 = arith.constant 8 : index
    %c0_97 = arith.constant 0 : index
    %113 = vector.load %arg1[%c0_96, %c8, %c0_97] : memref<8x16x144xbf16, #tpu.memory_space<vmem>>, vector<8x1x144xbf16>
    %114 = vector.shape_cast %113 : vector<8x1x144xbf16> to vector<8x144xbf16>
    %c0_98 = arith.constant 0 : index
    %c0_99 = arith.constant 0 : index
    %115 = vector.load %arg2[%c0_98, %c0_99] : memref<144x32xbf16, #tpu.memory_space<vmem>>, vector<144x32xbf16>
    %cst_100 = arith.constant dense<0.000000e+00> : vector<8x32xf32>
    %116 = tpu.matmul %114, %115, %cst_100 {dimension_numbers = #tpu.dot_dimension_numbers<[1], [0], [0], [1], [0, 0, 1, 1], [], []>} : vector<8x144xbf16>, vector<144x32xbf16>, vector<8x32xf32> -> vector<8x32xf32>
    %c0_101 = arith.constant 0 : index
    %c0_102 = arith.constant 0 : index
    %117 = vector.load %arg3[%c0_101, %c0_102] : memref<1x32xf32, #tpu.memory_space<vmem>>, vector<1x32xf32>
    %118 = vector.broadcast %117 : vector<1x32xf32> to vector<8x32xf32>
    %119 = arith.addf %116, %118 : vector<8x32xf32>
    %cst_103 = arith.constant 0.000000e+00 : f32
    %120 = vector.broadcast %cst_103 : f32 to vector<8x32xf32>
    %121 = arith.maximumf %119, %120 : vector<8x32xf32>
    %122 = arith.truncf %121 : vector<8x32xf32> to vector<8x32xbf16>
    %c8_104 = arith.constant 8 : index
    %c0_105 = arith.constant 0 : index
    %c0_106 = arith.constant 0 : index
    %123 = vector.load %arg4[%c8_104, %c0_105, %c0_106] : memref<16x32x32xbf16, #tpu.memory_space<vmem>>, vector<1x32x32xbf16>
    %124 = vector.shape_cast %123 : vector<1x32x32xbf16> to vector<32x32xbf16>
    %cst_107 = arith.constant dense<0.000000e+00> : vector<8x32xf32>
    %125 = tpu.matmul %122, %124, %cst_107 {dimension_numbers = #tpu.dot_dimension_numbers<[1], [0], [0], [1], [0, 0, 1, 1], [], []>} : vector<8x32xbf16>, vector<32x32xbf16>, vector<8x32xf32> -> vector<8x32xf32>
    %126 = arith.addf %112, %125 : vector<8x32xf32>
    %c0_108 = arith.constant 0 : index
    %c9 = arith.constant 9 : index
    %c0_109 = arith.constant 0 : index
    %127 = vector.load %arg1[%c0_108, %c9, %c0_109] : memref<8x16x144xbf16, #tpu.memory_space<vmem>>, vector<8x1x144xbf16>
    %128 = vector.shape_cast %127 : vector<8x1x144xbf16> to vector<8x144xbf16>
    %c0_110 = arith.constant 0 : index
    %c0_111 = arith.constant 0 : index
    %129 = vector.load %arg2[%c0_110, %c0_111] : memref<144x32xbf16, #tpu.memory_space<vmem>>, vector<144x32xbf16>
    %cst_112 = arith.constant dense<0.000000e+00> : vector<8x32xf32>
    %130 = tpu.matmul %128, %129, %cst_112 {dimension_numbers = #tpu.dot_dimension_numbers<[1], [0], [0], [1], [0, 0, 1, 1], [], []>} : vector<8x144xbf16>, vector<144x32xbf16>, vector<8x32xf32> -> vector<8x32xf32>
    %c0_113 = arith.constant 0 : index
    %c0_114 = arith.constant 0 : index
    %131 = vector.load %arg3[%c0_113, %c0_114] : memref<1x32xf32, #tpu.memory_space<vmem>>, vector<1x32xf32>
    %132 = vector.broadcast %131 : vector<1x32xf32> to vector<8x32xf32>
    %133 = arith.addf %130, %132 : vector<8x32xf32>
    %cst_115 = arith.constant 0.000000e+00 : f32
    %134 = vector.broadcast %cst_115 : f32 to vector<8x32xf32>
    %135 = arith.maximumf %133, %134 : vector<8x32xf32>
    %136 = arith.truncf %135 : vector<8x32xf32> to vector<8x32xbf16>
    %c9_116 = arith.constant 9 : index
    %c0_117 = arith.constant 0 : index
    %c0_118 = arith.constant 0 : index
    %137 = vector.load %arg4[%c9_116, %c0_117, %c0_118] : memref<16x32x32xbf16, #tpu.memory_space<vmem>>, vector<1x32x32xbf16>
    %138 = vector.shape_cast %137 : vector<1x32x32xbf16> to vector<32x32xbf16>
    %cst_119 = arith.constant dense<0.000000e+00> : vector<8x32xf32>
    %139 = tpu.matmul %136, %138, %cst_119 {dimension_numbers = #tpu.dot_dimension_numbers<[1], [0], [0], [1], [0, 0, 1, 1], [], []>} : vector<8x32xbf16>, vector<32x32xbf16>, vector<8x32xf32> -> vector<8x32xf32>
    %140 = arith.addf %126, %139 : vector<8x32xf32>
    %c0_120 = arith.constant 0 : index
    %c10 = arith.constant 10 : index
    %c0_121 = arith.constant 0 : index
    %141 = vector.load %arg1[%c0_120, %c10, %c0_121] : memref<8x16x144xbf16, #tpu.memory_space<vmem>>, vector<8x1x144xbf16>
    %142 = vector.shape_cast %141 : vector<8x1x144xbf16> to vector<8x144xbf16>
    %c0_122 = arith.constant 0 : index
    %c0_123 = arith.constant 0 : index
    %143 = vector.load %arg2[%c0_122, %c0_123] : memref<144x32xbf16, #tpu.memory_space<vmem>>, vector<144x32xbf16>
    %cst_124 = arith.constant dense<0.000000e+00> : vector<8x32xf32>
    %144 = tpu.matmul %142, %143, %cst_124 {dimension_numbers = #tpu.dot_dimension_numbers<[1], [0], [0], [1], [0, 0, 1, 1], [], []>} : vector<8x144xbf16>, vector<144x32xbf16>, vector<8x32xf32> -> vector<8x32xf32>
    %c0_125 = arith.constant 0 : index
    %c0_126 = arith.constant 0 : index
    %145 = vector.load %arg3[%c0_125, %c0_126] : memref<1x32xf32, #tpu.memory_space<vmem>>, vector<1x32xf32>
    %146 = vector.broadcast %145 : vector<1x32xf32> to vector<8x32xf32>
    %147 = arith.addf %144, %146 : vector<8x32xf32>
    %cst_127 = arith.constant 0.000000e+00 : f32
    %148 = vector.broadcast %cst_127 : f32 to vector<8x32xf32>
    %149 = arith.maximumf %147, %148 : vector<8x32xf32>
    %150 = arith.truncf %149 : vector<8x32xf32> to vector<8x32xbf16>
    %c10_128 = arith.constant 10 : index
    %c0_129 = arith.constant 0 : index
    %c0_130 = arith.constant 0 : index
    %151 = vector.load %arg4[%c10_128, %c0_129, %c0_130] : memref<16x32x32xbf16, #tpu.memory_space<vmem>>, vector<1x32x32xbf16>
    %152 = vector.shape_cast %151 : vector<1x32x32xbf16> to vector<32x32xbf16>
    %cst_131 = arith.constant dense<0.000000e+00> : vector<8x32xf32>
    %153 = tpu.matmul %150, %152, %cst_131 {dimension_numbers = #tpu.dot_dimension_numbers<[1], [0], [0], [1], [0, 0, 1, 1], [], []>} : vector<8x32xbf16>, vector<32x32xbf16>, vector<8x32xf32> -> vector<8x32xf32>
    %154 = arith.addf %140, %153 : vector<8x32xf32>
    %c0_132 = arith.constant 0 : index
    %c11 = arith.constant 11 : index
    %c0_133 = arith.constant 0 : index
    %155 = vector.load %arg1[%c0_132, %c11, %c0_133] : memref<8x16x144xbf16, #tpu.memory_space<vmem>>, vector<8x1x144xbf16>
    %156 = vector.shape_cast %155 : vector<8x1x144xbf16> to vector<8x144xbf16>
    %c0_134 = arith.constant 0 : index
    %c0_135 = arith.constant 0 : index
    %157 = vector.load %arg2[%c0_134, %c0_135] : memref<144x32xbf16, #tpu.memory_space<vmem>>, vector<144x32xbf16>
    %cst_136 = arith.constant dense<0.000000e+00> : vector<8x32xf32>
    %158 = tpu.matmul %156, %157, %cst_136 {dimension_numbers = #tpu.dot_dimension_numbers<[1], [0], [0], [1], [0, 0, 1, 1], [], []>} : vector<8x144xbf16>, vector<144x32xbf16>, vector<8x32xf32> -> vector<8x32xf32>
    %c0_137 = arith.constant 0 : index
    %c0_138 = arith.constant 0 : index
    %159 = vector.load %arg3[%c0_137, %c0_138] : memref<1x32xf32, #tpu.memory_space<vmem>>, vector<1x32xf32>
    %160 = vector.broadcast %159 : vector<1x32xf32> to vector<8x32xf32>
    %161 = arith.addf %158, %160 : vector<8x32xf32>
    %cst_139 = arith.constant 0.000000e+00 : f32
    %162 = vector.broadcast %cst_139 : f32 to vector<8x32xf32>
    %163 = arith.maximumf %161, %162 : vector<8x32xf32>
    %164 = arith.truncf %163 : vector<8x32xf32> to vector<8x32xbf16>
    %c11_140 = arith.constant 11 : index
    %c0_141 = arith.constant 0 : index
    %c0_142 = arith.constant 0 : index
    %165 = vector.load %arg4[%c11_140, %c0_141, %c0_142] : memref<16x32x32xbf16, #tpu.memory_space<vmem>>, vector<1x32x32xbf16>
    %166 = vector.shape_cast %165 : vector<1x32x32xbf16> to vector<32x32xbf16>
    %cst_143 = arith.constant dense<0.000000e+00> : vector<8x32xf32>
    %167 = tpu.matmul %164, %166, %cst_143 {dimension_numbers = #tpu.dot_dimension_numbers<[1], [0], [0], [1], [0, 0, 1, 1], [], []>} : vector<8x32xbf16>, vector<32x32xbf16>, vector<8x32xf32> -> vector<8x32xf32>
    %168 = arith.addf %154, %167 : vector<8x32xf32>
    %c0_144 = arith.constant 0 : index
    %c12 = arith.constant 12 : index
    %c0_145 = arith.constant 0 : index
    %169 = vector.load %arg1[%c0_144, %c12, %c0_145] : memref<8x16x144xbf16, #tpu.memory_space<vmem>>, vector<8x1x144xbf16>
    %170 = vector.shape_cast %169 : vector<8x1x144xbf16> to vector<8x144xbf16>
    %c0_146 = arith.constant 0 : index
    %c0_147 = arith.constant 0 : index
    %171 = vector.load %arg2[%c0_146, %c0_147] : memref<144x32xbf16, #tpu.memory_space<vmem>>, vector<144x32xbf16>
    %cst_148 = arith.constant dense<0.000000e+00> : vector<8x32xf32>
    %172 = tpu.matmul %170, %171, %cst_148 {dimension_numbers = #tpu.dot_dimension_numbers<[1], [0], [0], [1], [0, 0, 1, 1], [], []>} : vector<8x144xbf16>, vector<144x32xbf16>, vector<8x32xf32> -> vector<8x32xf32>
    %c0_149 = arith.constant 0 : index
    %c0_150 = arith.constant 0 : index
    %173 = vector.load %arg3[%c0_149, %c0_150] : memref<1x32xf32, #tpu.memory_space<vmem>>, vector<1x32xf32>
    %174 = vector.broadcast %173 : vector<1x32xf32> to vector<8x32xf32>
    %175 = arith.addf %172, %174 : vector<8x32xf32>
    %cst_151 = arith.constant 0.000000e+00 : f32
    %176 = vector.broadcast %cst_151 : f32 to vector<8x32xf32>
    %177 = arith.maximumf %175, %176 : vector<8x32xf32>
    %178 = arith.truncf %177 : vector<8x32xf32> to vector<8x32xbf16>
    %c12_152 = arith.constant 12 : index
    %c0_153 = arith.constant 0 : index
    %c0_154 = arith.constant 0 : index
    %179 = vector.load %arg4[%c12_152, %c0_153, %c0_154] : memref<16x32x32xbf16, #tpu.memory_space<vmem>>, vector<1x32x32xbf16>
    %180 = vector.shape_cast %179 : vector<1x32x32xbf16> to vector<32x32xbf16>
    %cst_155 = arith.constant dense<0.000000e+00> : vector<8x32xf32>
    %181 = tpu.matmul %178, %180, %cst_155 {dimension_numbers = #tpu.dot_dimension_numbers<[1], [0], [0], [1], [0, 0, 1, 1], [], []>} : vector<8x32xbf16>, vector<32x32xbf16>, vector<8x32xf32> -> vector<8x32xf32>
    %182 = arith.addf %168, %181 : vector<8x32xf32>
    %c0_156 = arith.constant 0 : index
    %c13 = arith.constant 13 : index
    %c0_157 = arith.constant 0 : index
    %183 = vector.load %arg1[%c0_156, %c13, %c0_157] : memref<8x16x144xbf16, #tpu.memory_space<vmem>>, vector<8x1x144xbf16>
    %184 = vector.shape_cast %183 : vector<8x1x144xbf16> to vector<8x144xbf16>
    %c0_158 = arith.constant 0 : index
    %c0_159 = arith.constant 0 : index
    %185 = vector.load %arg2[%c0_158, %c0_159] : memref<144x32xbf16, #tpu.memory_space<vmem>>, vector<144x32xbf16>
    %cst_160 = arith.constant dense<0.000000e+00> : vector<8x32xf32>
    %186 = tpu.matmul %184, %185, %cst_160 {dimension_numbers = #tpu.dot_dimension_numbers<[1], [0], [0], [1], [0, 0, 1, 1], [], []>} : vector<8x144xbf16>, vector<144x32xbf16>, vector<8x32xf32> -> vector<8x32xf32>
    %c0_161 = arith.constant 0 : index
    %c0_162 = arith.constant 0 : index
    %187 = vector.load %arg3[%c0_161, %c0_162] : memref<1x32xf32, #tpu.memory_space<vmem>>, vector<1x32xf32>
    %188 = vector.broadcast %187 : vector<1x32xf32> to vector<8x32xf32>
    %189 = arith.addf %186, %188 : vector<8x32xf32>
    %cst_163 = arith.constant 0.000000e+00 : f32
    %190 = vector.broadcast %cst_163 : f32 to vector<8x32xf32>
    %191 = arith.maximumf %189, %190 : vector<8x32xf32>
    %192 = arith.truncf %191 : vector<8x32xf32> to vector<8x32xbf16>
    %c13_164 = arith.constant 13 : index
    %c0_165 = arith.constant 0 : index
    %c0_166 = arith.constant 0 : index
    %193 = vector.load %arg4[%c13_164, %c0_165, %c0_166] : memref<16x32x32xbf16, #tpu.memory_space<vmem>>, vector<1x32x32xbf16>
    %194 = vector.shape_cast %193 : vector<1x32x32xbf16> to vector<32x32xbf16>
    %cst_167 = arith.constant dense<0.000000e+00> : vector<8x32xf32>
    %195 = tpu.matmul %192, %194, %cst_167 {dimension_numbers = #tpu.dot_dimension_numbers<[1], [0], [0], [1], [0, 0, 1, 1], [], []>} : vector<8x32xbf16>, vector<32x32xbf16>, vector<8x32xf32> -> vector<8x32xf32>
    %196 = arith.addf %182, %195 : vector<8x32xf32>
    %c0_168 = arith.constant 0 : index
    %c14 = arith.constant 14 : index
    %c0_169 = arith.constant 0 : index
    %197 = vector.load %arg1[%c0_168, %c14, %c0_169] : memref<8x16x144xbf16, #tpu.memory_space<vmem>>, vector<8x1x144xbf16>
    %198 = vector.shape_cast %197 : vector<8x1x144xbf16> to vector<8x144xbf16>
    %c0_170 = arith.constant 0 : index
    %c0_171 = arith.constant 0 : index
    %199 = vector.load %arg2[%c0_170, %c0_171] : memref<144x32xbf16, #tpu.memory_space<vmem>>, vector<144x32xbf16>
    %cst_172 = arith.constant dense<0.000000e+00> : vector<8x32xf32>
    %200 = tpu.matmul %198, %199, %cst_172 {dimension_numbers = #tpu.dot_dimension_numbers<[1], [0], [0], [1], [0, 0, 1, 1], [], []>} : vector<8x144xbf16>, vector<144x32xbf16>, vector<8x32xf32> -> vector<8x32xf32>
    %c0_173 = arith.constant 0 : index
    %c0_174 = arith.constant 0 : index
    %201 = vector.load %arg3[%c0_173, %c0_174] : memref<1x32xf32, #tpu.memory_space<vmem>>, vector<1x32xf32>
    %202 = vector.broadcast %201 : vector<1x32xf32> to vector<8x32xf32>
    %203 = arith.addf %200, %202 : vector<8x32xf32>
    %cst_175 = arith.constant 0.000000e+00 : f32
    %204 = vector.broadcast %cst_175 : f32 to vector<8x32xf32>
    %205 = arith.maximumf %203, %204 : vector<8x32xf32>
    %206 = arith.truncf %205 : vector<8x32xf32> to vector<8x32xbf16>
    %c14_176 = arith.constant 14 : index
    %c0_177 = arith.constant 0 : index
    %c0_178 = arith.constant 0 : index
    %207 = vector.load %arg4[%c14_176, %c0_177, %c0_178] : memref<16x32x32xbf16, #tpu.memory_space<vmem>>, vector<1x32x32xbf16>
    %208 = vector.shape_cast %207 : vector<1x32x32xbf16> to vector<32x32xbf16>
    %cst_179 = arith.constant dense<0.000000e+00> : vector<8x32xf32>
    %209 = tpu.matmul %206, %208, %cst_179 {dimension_numbers = #tpu.dot_dimension_numbers<[1], [0], [0], [1], [0, 0, 1, 1], [], []>} : vector<8x32xbf16>, vector<32x32xbf16>, vector<8x32xf32> -> vector<8x32xf32>
    %210 = arith.addf %196, %209 : vector<8x32xf32>
    %c0_180 = arith.constant 0 : index
    %c15 = arith.constant 15 : index
    %c0_181 = arith.constant 0 : index
    %211 = vector.load %arg1[%c0_180, %c15, %c0_181] : memref<8x16x144xbf16, #tpu.memory_space<vmem>>, vector<8x1x144xbf16>
    %212 = vector.shape_cast %211 : vector<8x1x144xbf16> to vector<8x144xbf16>
    %c0_182 = arith.constant 0 : index
    %c0_183 = arith.constant 0 : index
    %213 = vector.load %arg2[%c0_182, %c0_183] : memref<144x32xbf16, #tpu.memory_space<vmem>>, vector<144x32xbf16>
    %cst_184 = arith.constant dense<0.000000e+00> : vector<8x32xf32>
    %214 = tpu.matmul %212, %213, %cst_184 {dimension_numbers = #tpu.dot_dimension_numbers<[1], [0], [0], [1], [0, 0, 1, 1], [], []>} : vector<8x144xbf16>, vector<144x32xbf16>, vector<8x32xf32> -> vector<8x32xf32>
    %c0_185 = arith.constant 0 : index
    %c0_186 = arith.constant 0 : index
    %215 = vector.load %arg3[%c0_185, %c0_186] : memref<1x32xf32, #tpu.memory_space<vmem>>, vector<1x32xf32>
    %216 = vector.broadcast %215 : vector<1x32xf32> to vector<8x32xf32>
    %217 = arith.addf %214, %216 : vector<8x32xf32>
    %cst_187 = arith.constant 0.000000e+00 : f32
    %218 = vector.broadcast %cst_187 : f32 to vector<8x32xf32>
    %219 = arith.maximumf %217, %218 : vector<8x32xf32>
    %220 = arith.truncf %219 : vector<8x32xf32> to vector<8x32xbf16>
    %c15_188 = arith.constant 15 : index
    %c0_189 = arith.constant 0 : index
    %c0_190 = arith.constant 0 : index
    %221 = vector.load %arg4[%c15_188, %c0_189, %c0_190] : memref<16x32x32xbf16, #tpu.memory_space<vmem>>, vector<1x32x32xbf16>
    %222 = vector.shape_cast %221 : vector<1x32x32xbf16> to vector<32x32xbf16>
    %cst_191 = arith.constant dense<0.000000e+00> : vector<8x32xf32>
    %223 = tpu.matmul %220, %222, %cst_191 {dimension_numbers = #tpu.dot_dimension_numbers<[1], [0], [0], [1], [0, 0, 1, 1], [], []>} : vector<8x32xbf16>, vector<32x32xbf16>, vector<8x32xf32> -> vector<8x32xf32>
    %224 = arith.addf %210, %223 : vector<8x32xf32>
    %c0_192 = arith.constant 0 : index
    %c0_193 = arith.constant 0 : index
    %225 = vector.load %arg5[%c0_192, %c0_193] : memref<1x32xf32, #tpu.memory_space<vmem>>, vector<1x32xf32>
    %226 = vector.broadcast %225 : vector<1x32xf32> to vector<8x32xf32>
    %227 = arith.addf %224, %226 : vector<8x32xf32>
    %228 = arith.truncf %227 : vector<8x32xf32> to vector<8x32xbf16>
    %c0_194 = arith.constant 0 : index
    %c0_195 = arith.constant 0 : index
    %229 = vector.load %arg6[%c0_194, %c0_195] : memref<32x512xbf16, #tpu.memory_space<vmem>>, vector<32x512xbf16>
    %cst_196 = arith.constant dense<0.000000e+00> : vector<8x512xf32>
    %230 = tpu.matmul %228, %229, %cst_196 {dimension_numbers = #tpu.dot_dimension_numbers<[1], [0], [0], [1], [0, 0, 1, 1], [], []>} : vector<8x32xbf16>, vector<32x512xbf16>, vector<8x512xf32> -> vector<8x512xf32>
    %c0_197 = arith.constant 0 : index
    %c0_198 = arith.constant 0 : index
    %231 = vector.load %arg7[%c0_197, %c0_198] : memref<1x512xf32, #tpu.memory_space<vmem>>, vector<1x512xf32>
    %232 = vector.broadcast %231 : vector<1x512xf32> to vector<8x512xf32>
    %233 = arith.addf %230, %232 : vector<8x512xf32>
    %cst_199 = arith.constant 0.000000e+00 : f32
    %234 = vector.broadcast %cst_199 : f32 to vector<8x512xf32>
    %235 = arith.maximumf %233, %234 : vector<8x512xf32>
    %236 = arith.truncf %235 : vector<8x512xf32> to vector<8x512xbf16>
    %c0_200 = arith.constant 0 : index
    %c0_201 = arith.constant 0 : index
    %237 = vector.load %arg8[%c0_200, %c0_201] : memref<512x256xbf16, #tpu.memory_space<vmem>>, vector<512x256xbf16>
    %cst_202 = arith.constant dense<0.000000e+00> : vector<8x256xf32>
    %238 = tpu.matmul %236, %237, %cst_202 {dimension_numbers = #tpu.dot_dimension_numbers<[1], [0], [0], [1], [0, 0, 1, 1], [], []>} : vector<8x512xbf16>, vector<512x256xbf16>, vector<8x256xf32> -> vector<8x256xf32>
    %c0_203 = arith.constant 0 : index
    %c0_204 = arith.constant 0 : index
    %239 = vector.load %arg9[%c0_203, %c0_204] : memref<1x256xf32, #tpu.memory_space<vmem>>, vector<1x256xf32>
    %240 = vector.broadcast %239 : vector<1x256xf32> to vector<8x256xf32>
    %241 = arith.addf %238, %240 : vector<8x256xf32>
    %cst_205 = arith.constant 0.000000e+00 : f32
    %242 = vector.broadcast %cst_205 : f32 to vector<8x256xf32>
    %243 = arith.maximumf %241, %242 : vector<8x256xf32>
    %244 = arith.truncf %243 : vector<8x256xf32> to vector<8x256xbf16>
    %c0_206 = arith.constant 0 : index
    %c0_207 = arith.constant 0 : index
    %245 = vector.load %arg10[%c0_206, %c0_207] : memref<256x128xbf16, #tpu.memory_space<vmem>>, vector<256x128xbf16>
    %cst_208 = arith.constant dense<0.000000e+00> : vector<8x128xf32>
    %246 = tpu.matmul %244, %245, %cst_208 {dimension_numbers = #tpu.dot_dimension_numbers<[1], [0], [0], [1], [0, 0, 1, 1], [], []>} : vector<8x256xbf16>, vector<256x128xbf16>, vector<8x128xf32> -> vector<8x128xf32>
    %c0_209 = arith.constant 0 : index
    %c0_210 = arith.constant 0 : index
    %247 = vector.load %arg11[%c0_209, %c0_210] : memref<1x128xf32, #tpu.memory_space<vmem>>, vector<1x128xf32>
    %248 = vector.broadcast %247 : vector<1x128xf32> to vector<8x128xf32>
    %249 = arith.addf %246, %248 : vector<8x128xf32>
    %250 = tpu.iota {dimensions = array<i32: 1>} : vector<8x128xi32>
    %c8_i32 = arith.constant 8 : i32
    %251 = vector.broadcast %c8_i32 : i32 to vector<8x128xi32>
    %252 = arith.cmpi eq, %250, %251 : vector<8x128xi32>
    %cst_211 = arith.constant 0.000000e+00 : f32
    %253 = vector.broadcast %cst_211 : f32 to vector<8x128xf32>
    %254 = arith.select %252, %249, %253 : vector<8x128xi1>, vector<8x128xf32>
    %cst_212 = arith.constant dense<0.000000e+00> : vector<8xf32>
    %255 = vector.multi_reduction <add>, %254, %cst_212 [1] : vector<8x128xf32> to vector<8xf32>
    %256 = vector.shape_cast %255 : vector<8xf32> to vector<8x1xf32>
    %c0_213 = arith.constant 0 : index
    %c0_214 = arith.constant 0 : index
    %257 = vector.load %arg12[%c0_213, %c0_214] : memref<8x128xf32, #tpu.memory_space<vmem>>, vector<8x128xf32>
    %cst_215 = arith.constant 5.000000e-01 : f32
    %258 = vector.broadcast %cst_215 : f32 to vector<8x128xf32>
    %259 = arith.cmpf ogt, %257, %258 : vector<8x128xf32>
    %cst_216 = arith.constant -1.000000e+08 : f32
    %260 = vector.broadcast %cst_216 : f32 to vector<8x128xf32>
    %261 = arith.select %259, %249, %260 : vector<8x128xi1>, vector<8x128xf32>
    %cst_217 = arith.constant dense<0xFF800000> : vector<8xf32>
    %262 = vector.multi_reduction <maximumf>, %261, %cst_217 [1] : vector<8x128xf32> to vector<8xf32>
    %263 = vector.shape_cast %262 : vector<8xf32> to vector<8x1xf32>
    %264 = vector.broadcast %263 : vector<8x1xf32> to vector<8x128xf32>
    %265 = arith.subf %261, %264 : vector<8x128xf32>
    %266 = math.exp %265 : vector<8x128xf32>
    %cst_218 = arith.constant dense<0.000000e+00> : vector<8xf32>
    %267 = vector.multi_reduction <add>, %266, %cst_218 [1] : vector<8x128xf32> to vector<8xf32>
    %268 = vector.shape_cast %267 : vector<8xf32> to vector<8x1xf32>
    %269 = tpu.reciprocal %268 {approx = true} : vector<8x1xf32> -> vector<8x1xf32>
    %270 = vector.broadcast %269 : vector<8x1xf32> to vector<8x128xf32>
    %271 = arith.mulf %266, %270 : vector<8x128xf32>
    %cst_219 = arith.constant 1.000000e+00 : f32
    %cst_220 = arith.constant 1.1920929E-7 : f32
    %272 = arith.subf %cst_219, %cst_220 : f32
    %cst_221 = arith.constant 1.1920929E-7 : f32
    %273 = vector.broadcast %cst_221 : f32 to vector<8x128xf32>
    %274 = arith.maximumf %273, %271 : vector<8x128xf32>
    %275 = vector.broadcast %272 : f32 to vector<8x128xf32>
    %276 = arith.minimumf %275, %274 : vector<8x128xf32>
    %277 = math.log %276 : vector<8x128xf32>
    %c0_222 = arith.constant 0 : index
    %c0_223 = arith.constant 0 : index
    %278 = vector.load %arg13[%c0_222, %c0_223] : memref<8x1xi32, #tpu.memory_space<vmem>>, vector<8x1xi32>
    %279 = vector.broadcast %278 : vector<8x1xi32> to vector<8x128xi32>
    %280 = arith.cmpi eq, %250, %279 : vector<8x128xi32>
    %cst_224 = arith.constant 0.000000e+00 : f32
    %281 = vector.broadcast %cst_224 : f32 to vector<8x128xf32>
    %282 = arith.select %280, %277, %281 : vector<8x128xi1>, vector<8x128xf32>
    %cst_225 = arith.constant dense<0.000000e+00> : vector<8xf32>
    %283 = vector.multi_reduction <add>, %282, %cst_225 [1] : vector<8x128xf32> to vector<8xf32>
    %284 = vector.shape_cast %283 : vector<8xf32> to vector<8x1xf32>
    %c8_i32_226 = arith.constant 8 : i32
    %285 = vector.broadcast %c8_i32_226 : i32 to vector<8x128xi32>
    %286 = arith.cmpi slt, %250, %285 : vector<8x128xi32>
    %287 = arith.mulf %271, %277 : vector<8x128xf32>
    %cst_227 = arith.constant 0.000000e+00 : f32
    %288 = vector.broadcast %cst_227 : f32 to vector<8x128xf32>
    %289 = arith.select %286, %287, %288 : vector<8x128xi1>, vector<8x128xf32>
    %cst_228 = arith.constant dense<0.000000e+00> : vector<8xf32>
    %290 = vector.multi_reduction <add>, %289, %cst_228 [1] : vector<8x128xf32> to vector<8xf32>
    %291 = vector.shape_cast %290 : vector<8xf32> to vector<8x1xf32>
    %cst_229 = arith.constant 0.000000e+00 : f32
    %292 = vector.broadcast %cst_229 : f32 to vector<8x1xf32>
    %293 = arith.subf %292, %291 : vector<8x1xf32>
    %c0_i32 = arith.constant 0 : i32
    %294 = vector.broadcast %c0_i32 : i32 to vector<8x128xi32>
    %295 = arith.cmpi eq, %250, %294 : vector<8x128xi32>
    %cst_230 = arith.constant 0.000000e+00 : f32
    %296 = vector.shape_cast %284 : vector<8x1xf32> to vector<8x1xf32>
    %297 = vector.broadcast %296 : vector<8x1xf32> to vector<8x128xf32>
    %298 = vector.broadcast %cst_230 : f32 to vector<8x128xf32>
    %299 = arith.select %295, %297, %298 : vector<8x128xi1>, vector<8x128xf32>
    %c1_i32 = arith.constant 1 : i32
    %300 = vector.broadcast %c1_i32 : i32 to vector<8x128xi32>
    %301 = arith.cmpi eq, %250, %300 : vector<8x128xi32>
    %cst_231 = arith.constant 0.000000e+00 : f32
    %302 = vector.shape_cast %256 : vector<8x1xf32> to vector<8x1xf32>
    %303 = vector.broadcast %302 : vector<8x1xf32> to vector<8x128xf32>
    %304 = vector.broadcast %cst_231 : f32 to vector<8x128xf32>
    %305 = arith.select %301, %303, %304 : vector<8x128xi1>, vector<8x128xf32>
    %306 = arith.addf %299, %305 : vector<8x128xf32>
    %c2_i32 = arith.constant 2 : i32
    %307 = vector.broadcast %c2_i32 : i32 to vector<8x128xi32>
    %308 = arith.cmpi eq, %250, %307 : vector<8x128xi32>
    %cst_232 = arith.constant 0.000000e+00 : f32
    %309 = vector.shape_cast %293 : vector<8x1xf32> to vector<8x1xf32>
    %310 = vector.broadcast %309 : vector<8x1xf32> to vector<8x128xf32>
    %311 = vector.broadcast %cst_232 : f32 to vector<8x128xf32>
    %312 = arith.select %308, %310, %311 : vector<8x128xi1>, vector<8x128xf32>
    %313 = arith.addf %306, %312 : vector<8x128xf32>
    %c0_233 = arith.constant 0 : index
    %c0_234 = arith.constant 0 : index
    %314 = vector.load %arg14[%c0_233, %c0_234] : memref<8x128xf32, #tpu.memory_space<vmem>>, vector<8x128xf32>
    tpu.vector_store %arg14[%c0_233, %c0_234], %313 {strides = array<i32>} : memref<8x128xf32, #tpu.memory_space<vmem>>, vector<8x128xf32>,
    return
  }
  func.func @transform_0(%arg0: i32) -> (i32, i32, i32) {
    %c0_i32 = arith.constant 0 : i32
    %c0_i32_0 = arith.constant 0 : i32
    %c0_i32_1 = arith.constant 0 : i32
    return %arg0, %c0_i32, %c0_i32_0 : i32, i32, i32
  }
  func.func @transform_1(%arg0: i32) -> (i32, i32) {
    %c0_i32 = arith.constant 0 : i32
    %c0_i32_0 = arith.constant 0 : i32
    %c0_i32_1 = arith.constant 0 : i32
    return %c0_i32, %c0_i32_0 : i32, i32
  }
  func.func @transform_2(%arg0: i32) -> (i32, i32) {
    %c0_i32 = arith.constant 0 : i32
    %c0_i32_0 = arith.constant 0 : i32
    %c0_i32_1 = arith.constant 0 : i32
    return %c0_i32, %c0_i32_0 : i32, i32
  }
  func.func @transform_3(%arg0: i32) -> (i32, i32, i32) {
    %c0_i32 = arith.constant 0 : i32
    %c0_i32_0 = arith.constant 0 : i32
    %c0_i32_1 = arith.constant 0 : i32
    %c0_i32_2 = arith.constant 0 : i32
    return %c0_i32, %c0_i32_0, %c0_i32_1 : i32, i32, i32
  }
  func.func @transform_4(%arg0: i32) -> (i32, i32) {
    %c0_i32 = arith.constant 0 : i32
    %c0_i32_0 = arith.constant 0 : i32
    %c0_i32_1 = arith.constant 0 : i32
    return %c0_i32, %c0_i32_0 : i32, i32
  }
  func.func @transform_5(%arg0: i32) -> (i32, i32) {
    %c0_i32 = arith.constant 0 : i32
    %c0_i32_0 = arith.constant 0 : i32
    %c0_i32_1 = arith.constant 0 : i32
    return %c0_i32, %c0_i32_0 : i32, i32
  }
  func.func @transform_6(%arg0: i32) -> (i32, i32) {
    %c0_i32 = arith.constant 0 : i32
    %c0_i32_0 = arith.constant 0 : i32
    %c0_i32_1 = arith.constant 0 : i32
    return %c0_i32, %c0_i32_0 : i32, i32
  }
  func.func @transform_7(%arg0: i32) -> (i32, i32) {
    %c0_i32 = arith.constant 0 : i32
    %c0_i32_0 = arith.constant 0 : i32
    %c0_i32_1 = arith.constant 0 : i32
    return %c0_i32, %c0_i32_0 : i32, i32
  }
  func.func @transform_8(%arg0: i32) -> (i32, i32) {
    %c0_i32 = arith.constant 0 : i32
    %c0_i32_0 = arith.constant 0 : i32
    %c0_i32_1 = arith.constant 0 : i32
    return %c0_i32, %c0_i32_0 : i32, i32
  }
  func.func @transform_9(%arg0: i32) -> (i32, i32) {
    %c0_i32 = arith.constant 0 : i32
    %c0_i32_0 = arith.constant 0 : i32
    %c0_i32_1 = arith.constant 0 : i32
    return %c0_i32, %c0_i32_0 : i32, i32
  }
  func.func @transform_10(%arg0: i32) -> (i32, i32) {
    %c0_i32 = arith.constant 0 : i32
    %c0_i32_0 = arith.constant 0 : i32
    %c0_i32_1 = arith.constant 0 : i32
    return %c0_i32, %c0_i32_0 : i32, i32
  }
  func.func @transform_11(%arg0: i32) -> (i32, i32) {
    %c0_i32 = arith.constant 0 : i32
    %c0_i32_0 = arith.constant 0 : i32
    return %arg0, %c0_i32 : i32, i32
  }
  func.func @transform_12(%arg0: i32) -> (i32, i32) {
    %c0_i32 = arith.constant 0 : i32
    %c0_i32_0 = arith.constant 0 : i32
    return %arg0, %c0_i32 : i32, i32
  }
  func.func @transform_13(%arg0: i32) -> (i32, i32) {
    %c0_i32 = arith.constant 0 : i32
    %c0_i32_0 = arith.constant 0 : i32
    return %arg0, %c0_i32 : i32, i32
  }
}

</mosaic_0001>

<bundles_post_ra>
// kernel: actor_critic_vae_evaluate.2
= control target key start
LH: loop header
LB: loop body
LE: loop exit
PB: predicated region body
PF: predicated region fallthrough
CT: control target
= control target key end

     0   :  { %vm120_vm0 = vcmask 1041408   ;;  %vm95_vm1 = vcmask 293888   ;;  %vm205_vm2 = vcmask 125952   ;;  %s440_s1 = inlined_call_operand.vmem [shape: bf16[36,16], index: 1, kind: input, shape index: {}]   ;;  %s441_s2 = inlined_call_operand.vmem [shape: f32[1,16], index: 2, kind: input, shape index: {}]   ;;  %s442_s0 = inlined_call_operand.vmem [shape: bf16[128,36], index: 0, kind: input, shape index: {}]   ;;  %s443_s3 = inlined_call_operand.vmem [shape: bf16[128,16], index: 3, kind: output, shape index: {}]  }
   0x1   :  { %v35_v0 = vld [vmem:[%s440_s1 + $0x10] sm:$0x3]  ;;  %v283_v4 = vld [vmem:[%s440_s1 + $0x8] sm:$0xff]  ;;  %v282_v5 = vld [vmem:[%s440_s1] sm:$0xff] }
   0x2   :  { %v89_v1 = vunpack.c.l.b16 %v35_v0  ;;  %v274_v6 = vld [vmem:[%s442_s0] sm:$0xff]  ;;  %v276_v7 = vld [vmem:[%s442_s0 + $0x10] sm:$0xff]  ;;  %v275_v10 = vld [vmem:[%s442_s0 + $0x8] sm:$0xff] }
   0x3   :  { %v278_v8 = vld [vmem:[%s442_s0 + $0x20] sm:$0xff]  ;;  %v280_v9 = vld [vmem:[%s442_s0 + $0x30] sm:$0xff]  ;;  %v277_v11 = vld [vmem:[%s442_s0 + $0x18] sm:$0xff] }
   0x4   :  { %v92_v2 = vpack.c.b16 %v89_v1, %v89_v1  ;;  %v279_v12 = vld [vmem:[%s442_s0 + $0x28] sm:$0xff]  ;;  %v281_v13 = vld [vmem:[%s442_s0 + $0x38] sm:$0xff]  ;;  %v358_v14 = vld [vmem:[%s441_s2] ss:$0 sm:$0xff] }
   0x6   :  { %v122_v3 = vsel %vm120_vm0, %v92_v2, 0 }
   0x7   :  { %129 = vmatpush.bf16.msra.mxu0 %v122_v3  ;;  %284 = vmatpush.bf16.msra.mxu1 %v122_v3 }
   0x8   :  { %285 = vmatpush.bf16.msra.mxu2 %v122_v3  ;;  %286 = vmatpush.bf16.msra.mxu3 %v122_v3 }
   0xb   :  { %130 = vmatpush.bf16.msra.mxu0 %v283_v4  ;;  %287 = vmatpush.bf16.msra.mxu1 %v283_v4 }
   0xc   :  { %288 = vmatpush.bf16.msra.mxu2 %v283_v4  ;;  %289 = vmatpush.bf16.msra.mxu3 %v283_v4 }
   0xf   :  { %131 = vmatpush.bf16.msra.mxu0 %v282_v5  ;;  %290 = vmatpush.bf16.msra.mxu1 %v282_v5 }
  0x10   :  { %291 = vmatpush.bf16.msra.mxu2 %v282_v5  ;;  %292 = vmatpush.bf16.msra.mxu3 %v282_v5 }
  0x12   :  { %266 = vmatmul.msk.bf16.vlgmr.msra.gmra.mxu0 %vm95_vm1, %v274_v6  ;;  %268 = vmatmul.msk.bf16.vlgmr.msra.gmra.mxu1 %vm95_vm1, %v276_v7 }
  0x13   :  { %270 = vmatmul.msk.bf16.vlgmr.msra.gmra.mxu2 %vm95_vm1, %v278_v8  ;;  %272 = vmatmul.msk.bf16.vlgmr.msra.gmra.mxu3 %vm95_vm1, %v280_v9 }
  0x22   :  { %267 = vmatmul.msk.bf16.gmra.mxu0 %vm95_vm1, %v275_v10  ;;  %269 = vmatmul.msk.bf16.gmra.mxu1 %vm95_vm1, %v277_v11 }
  0x23   :  { %271 = vmatmul.msk.bf16.gmra.mxu2 %vm95_vm1, %v279_v12  ;;  %273 = vmatmul.msk.bf16.gmra.mxu3 %vm95_vm1, %v281_v13 }
  0x8f   :  { %v133_v15 = vpop.f32.mrf.mxu0  ;;  %v143_v16 = vpop.f32.mrf.mxu1 }
  0x90   :  { %v134_v17 = vadd.f32 %v358_v14, %v133_v15  ;;  %v144_v18 = vadd.f32 %v358_v14, %v143_v16 }
  0x92   :  { %v173_v19 = vmax.f32 %v134_v17, 0.0  ;;  %v177_v20 = vmax.f32 %v144_v18, 0.0 }
  0x94   :  { %v189_v21 = vpack.c.bf16 %v173_v19, %v173_v19  ;;  %v193_v22 = vpack.c.bf16 %v177_v20, %v177_v20 }
  0x96   :  { %206 = vst.msk [vmem:[%s443_s3] sm:$0xf] %vm205_vm2, %v189_v21  ;;  %v153_v23 = vpop.f32.mrf.mxu2  ;;  %v163_v24 = vpop.f32.mrf.mxu3 }
  0x97   :  { %210 = vst.msk [vmem:[%s443_s3 + $0x10] sm:$0xf] %vm205_vm2, %v193_v22  ;;  %v154_v25 = vadd.f32 %v358_v14, %v153_v23  ;;  %v164_v26 = vadd.f32 %v358_v14, %v163_v24  ;;  %v135_v27 = vpop.f32.mrf.mxu0  ;;  %v145_v28 = vpop.f32.mrf.mxu1 }
  0x98   :  { %v136_v29 = vadd.f32 %v358_v14, %v135_v27  ;;  %v146_v30 = vadd.f32 %v358_v14, %v145_v28 }
  0x99   :  { %v181_v31 = vmax.f32 %v154_v25, 0.0  ;;  %v185_v32 = vmax.f32 %v164_v26, 0.0 }
  0x9a   :  { %v174_v33 = vmax.f32 %v136_v29, 0.0  ;;  %v178_v34 = vmax.f32 %v146_v30, 0.0 }
  0x9b   :  { %v197_v35 = vpack.c.bf16 %v181_v31, %v181_v31  ;;  %v201_v36 = vpack.c.bf16 %v185_v32, %v185_v32 }
  0x9c   :  { %v190_v37 = vpack.c.bf16 %v174_v33, %v174_v33  ;;  %v194_v38 = vpack.c.bf16 %v178_v34, %v178_v34 }
  0x9d   :  { %214 = vst.msk [vmem:[%s443_s3 + $0x20] sm:$0xf] %vm205_vm2, %v197_v35 }
  0x9e   :  { %218 = vst.msk [vmem:[%s443_s3 + $0x30] sm:$0xf] %vm205_vm2, %v201_v36  ;;  %v155_v39 = vpop.f32.mrf.mxu2  ;;  %v165_v40 = vpop.f32.mrf.mxu3 }
  0x9f   :  { %207 = vst.msk [vmem:[%s443_s3 + $0x4] sm:$0xf] %vm205_vm2, %v190_v37  ;;  %v156_v41 = vadd.f32 %v358_v14, %v155_v39  ;;  %v166_v42 = vadd.f32 %v358_v14, %v165_v40  ;;  %v138_v43 = vpop.f32.mrf.mxu0  ;;  %v148_v44 = vpop.f32.mrf.mxu1 }
  0xa0   :  { %211 = vst.msk [vmem:[%s443_s3 + $0x14] sm:$0xf] %vm205_vm2, %v194_v38  ;;  %v139_v45 = vadd.f32 %v358_v14, %v138_v43  ;;  %v149_v46 = vadd.f32 %v358_v14, %v148_v44 }
  0xa1   :  { %v182_v47 = vmax.f32 %v156_v41, 0.0  ;;  %v186_v48 = vmax.f32 %v166_v42, 0.0 }
  0xa2   :  { %v175_v49 = vmax.f32 %v139_v45, 0.0  ;;  %v179_v50 = vmax.f32 %v149_v46, 0.0 }
  0xa3   :  { %v198_v51 = vpack.c.bf16 %v182_v47, %v182_v47  ;;  %v202_v52 = vpack.c.bf16 %v186_v48, %v186_v48 }
  0xa4   :  { %v191_v53 = vpack.c.bf16 %v175_v49, %v175_v49  ;;  %v195_v54 = vpack.c.bf16 %v179_v50, %v179_v50 }
  0xa5   :  { %215 = vst.msk [vmem:[%s443_s3 + $0x24] sm:$0xf] %vm205_vm2, %v198_v51 }
  0xa6   :  { %219 = vst.msk [vmem:[%s443_s3 + $0x34] sm:$0xf] %vm205_vm2, %v202_v52  ;;  %v158_v55 = vpop.f32.mrf.mxu2  ;;  %v168_v56 = vpop.f32.mrf.mxu3 }
  0xa7   :  { %208 = vst.msk [vmem:[%s443_s3 + $0x8] sm:$0xf] %vm205_vm2, %v191_v53  ;;  %v159_v57 = vadd.f32 %v358_v14, %v158_v55  ;;  %v169_v58 = vadd.f32 %v358_v14, %v168_v56  ;;  %v140_v59 = vpop.f32.mrf.mxu0  ;;  %v150_v60 = vpop.f32.mrf.mxu1 }
  0xa8   :  { %212 = vst.msk [vmem:[%s443_s3 + $0x18] sm:$0xf] %vm205_vm2, %v195_v54  ;;  %v141_v61 = vadd.f32 %v358_v14, %v140_v59  ;;  %v151_v62 = vadd.f32 %v358_v14, %v150_v60 }
  0xa9   :  { %v183_v63 = vmax.f32 %v159_v57, 0.0  ;;  %v187_v0 = vmax.f32 %v169_v58, 0.0 }
  0xaa   :  { %v176_v1 = vmax.f32 %v141_v61, 0.0  ;;  %v180_v2 = vmax.f32 %v151_v62, 0.0 }
  0xab   :  { %v199_v3 = vpack.c.bf16 %v183_v63, %v183_v63  ;;  %v203_v4 = vpack.c.bf16 %v187_v0, %v187_v0 }
  0xac   :  { %v192_v5 = vpack.c.bf16 %v176_v1, %v176_v1  ;;  %v196_v6 = vpack.c.bf16 %v180_v2, %v180_v2 }
  0xad   :  { %216 = vst.msk [vmem:[%s443_s3 + $0x28] sm:$0xf] %vm205_vm2, %v199_v3 }
  0xae   :  { %220 = vst.msk [vmem:[%s443_s3 + $0x38] sm:$0xf] %vm205_vm2, %v203_v4  ;;  %v160_v7 = vpop.f32.mrf.mxu2  ;;  %v170_v8 = vpop.f32.mrf.mxu3 }
  0xaf   :  { %209 = vst.msk [vmem:[%s443_s3 + $0xc] sm:$0xf] %vm205_vm2, %v192_v5  ;;  %v161_v9 = vadd.f32 %v358_v14, %v160_v7  ;;  %v171_v10 = vadd.f32 %v358_v14, %v170_v8 }
  0xb0   :  { %213 = vst.msk [vmem:[%s443_s3 + $0x1c] sm:$0xf] %vm205_vm2, %v196_v6 }
  0xb1   :  { %v184_v11 = vmax.f32 %v161_v9, 0.0  ;;  %v188_v12 = vmax.f32 %v171_v10, 0.0 }
  0xb3   :  { %v200_v13 = vpack.c.bf16 %v184_v11, %v184_v11  ;;  %v204_v15 = vpack.c.bf16 %v188_v12, %v188_v12 }
  0xb5   :  { %217 = vst.msk [vmem:[%s443_s3 + $0x2c] sm:$0xf] %vm205_vm2, %v200_v13 }
  0xb6   :  { %221 = vst.msk [vmem:[%s443_s3 + $0x3c] sm:$0xf] %vm205_vm2, %v204_v15 }

// kernel: actor_critic_vae_evaluate.3
= control target key start
LH: loop header
LB: loop body
LE: loop exit
PB: predicated region body
PF: predicated region fallthrough
CT: control target
= control target key end

     0   :  { %vm132_vm0 = vcmask 1041409   ;;  %vm135_vm1 = vcmask 1042434   ;;  %vm138_vm2 = vcmask 1043459   ;;  %vm141_vm3 = vcmask 1044484   ;;  %s5777_s1 = inlined_call_operand.vmem [shape: bf16[144,32], index: 1, kind: input, shape index: {}]   ;;  %s5778_s0 = inlined_call_operand.vmem [shape: bf16[8,16,144], index: 0, kind: input, shape index: {}]   ;;  %s5779_s2 = inlined_call_operand.vmem [shape: f32[1,32], index: 2, kind: input, shape index: {}]   ;;  %s5780_s3 = inlined_call_operand.vmem [shape: bf16[16,32,32], index: 3, kind: input, shape index: {}]   ;;  %s5781_s4 = inlined_call_operand.vmem [shape: f32[1,32], index: 4, kind: input, shape index: {}]   ;;  %s5782_s5 = inlined_call_operand.vmem [shape: bf16[32,512], index: 5, kind: input, shape index: {}]   ;;  %s5783_s7 = inlined_call_operand.vmem [shape: bf16[512,256], index: 7, kind: input, shape index: {}]   ;;  %s5784_s6 = inlined_call_operand.vmem [shape: f32[1,512], index: 6, kind: input, shape index: {}]   ;;  %s5785_s9 = inlined_call_operand.vmem [shape: bf16[256,128], index: 9, kind: input, shape index: {}]   ;;  %s5786_s10 = inlined_call_operand.vmem [shape: f32[1,128], index: 10, kind: input, shape index: {}]   ;;  %s5787_s8 = inlined_call_operand.vmem [shape: f32[1,256], index: 8, kind: input, shape index: {}]   ;;  %s5788_s12 = inlined_call_operand.vmem [shape: s32[8,1], index: 12, kind: input, shape index: {}]   ;;  %s5789_s11 = inlined_call_operand.vmem [shape: f32[8,128], index: 11, kind: input, shape index: {}]   ;;  %s5790_s13 = inlined_call_operand.vmem [shape: f32[8,128], index: 13, kind: output, shape index: {}]  }
   0x1   :  { %v3972_v0 = vld [vmem:[%s5777_s1 + $0x38] sm:$0xff]  ;;  %v3979_v1 = vld [vmem:[%s5777_s1 + $0x30] sm:$0xff]  ;;  %v45_v2 = vld [vmem:[%s5778_s0] sm:$0x11]  ;;  %vm144_vm4 = vcmask 1045509   ;;  %vm147_vm5 = vcmask 1046534  }
   0x2   :  { %227 = vmatpush.bf16.msra.mxu0 %v3972_v0  ;;  %293 = vmatpush.bf16.msra.mxu2 %v3972_v0  ;;  %v46_v3 = vld [vmem:[%s5778_s0 + $0x10] sm:$0x11]  ;;  %v3990_v4 = vld [vmem:[%s5778_s0 + $0x20] sm:$0x11]  ;;  %v83_v10 = vunpack.c.l.b16 %v45_v2  ;;  %v4015_v13 = vld [vmem:[%s5777_s1 + $0x28] sm:$0xff]  ;;  %v84_v23 = vunpack.c.h.b16 %v45_v2  ;;  %vm150_vm6 = vcmask 1047559  }
   0x3   :  { %v3995_v5 = vld [vmem:[%s5778_s0 + $0x30] sm:$0x11]  ;;  %v4000_v6 = vld [vmem:[%s5778_s0 + $0x40] sm:$0x11]  ;;  %v85_v7 = vunpack.c.l.b16 %v46_v3  ;;  %v87_v8 = vunpack.c.l.b16 %v3990_v4  ;;  %v86_v27 = vunpack.c.h.b16 %v46_v3  ;;  %v88_v28 = vunpack.c.h.b16 %v3990_v4  ;;  %v4044_v35 = vld [vmem:[%s5777_s1 + $0x18] sm:$0xff] }
   0x4   :  { %v4006_v9 = vld [vmem:[%s5778_s0 + $0x50] sm:$0x11]  ;;  %v89_v11 = vunpack.c.l.b16 %v3995_v5  ;;  %v91_v12 = vunpack.c.l.b16 %v4000_v6  ;;  %v4020_v14 = vld [vmem:[%s5778_s0 + $0x60] sm:$0x11]  ;;  %v3007_v18 = vunpack.i.l.s16 %v83_v10  ;;  %v3008_v40 = vunpack.i.l.s16 %v84_v23  ;;  %v4069_v62 = vld [vmem:[%s5777_s1 + $0x8] sm:$0xff] }
   0x5   :  { %v93_v15 = vunpack.c.l.b16 %v4006_v9  ;;  %v3009_v16 = vunpack.i.l.s16 %v85_v7  ;;  %v3011_v17 = vunpack.i.l.s16 %v87_v8  ;;  %v4028_v21 = vld [vmem:[%s5777_s1 + $0x20] sm:$0xff]  ;;  %v4033_v22 = vld [vmem:[%s5778_s0 + $0x70] sm:$0x11]  ;;  %v95_v24 = vunpack.c.l.b16 %v4020_v14 }
   0x6   :  { %228 = vmatpush.bf16.msra.mxu0 %v3979_v1  ;;  %294 = vmatpush.bf16.msra.mxu2 %v3979_v1  ;;  %v3013_v19 = vunpack.i.l.s16 %v89_v11  ;;  %v3015_v20 = vunpack.i.l.s16 %v91_v12  ;;  %v97_v31 = vunpack.c.l.b16 %v4033_v22  ;;  %v259_v34 = vrot.slane %v3007_v18, 1  ;;  %v4057_v50 = vld [vmem:[%s5777_s1 + $0x10] sm:$0xff] }
   0x7   :  { %v131_v25 = vrot.slane %v3009_v16, 7  ;;  %v134_v26 = vrot.slane %v3011_v17, 6  ;;  %v3017_v29 = vunpack.i.l.s16 %v93_v15  ;;  %v261_v37 = vrot.slane %v3011_v17, 7  ;;  %v4081_v15 = vld [vmem:[%s5777_s1] sm:$0xff] }
   0x8   :  { %v137_v30 = vrot.slane %v3013_v19, 5  ;;  %v140_v33 = vrot.slane %v3015_v20, 4  ;;  %v263_v38 = vrot.slane %v3013_v19, 6  ;;  %v265_v39 = vrot.slane %v3015_v20, 5  ;;  %v4089_v20 = vld [vmem:[%s5777_s1 + $0x40] sm:$0xff] }
   0x9   :  { %v133_v32 = vsel %vm132_vm0, %v131_v25, %v3007_v18  ;;  %v3019_v41 = vunpack.i.l.s16 %v95_v24  ;;  %v260_v43 = vsel %vm132_vm0, %v3009_v16, %v259_v34  ;;  %v3010_v44 = vunpack.i.l.s16 %v86_v27 }
   0xa   :  { %229 = vmatpush.bf16.msra.mxu0 %v4015_v13  ;;  %295 = vmatpush.bf16.msra.mxu2 %v4015_v13  ;;  %v136_v36 = vsel %vm135_vm1, %v134_v26, %v133_v32  ;;  %v143_v45 = vrot.slane %v3017_v29, 3  ;;  %v262_v46 = vsel %vm135_vm1, %v261_v37, %v260_v43  ;;  %v267_v47 = vrot.slane %v3017_v29, 4 }
   0xb   :  { %v139_v42 = vsel %vm138_vm2, %v137_v30, %v136_v36  ;;  %v264_v49 = vsel %vm138_vm2, %v263_v38, %v262_v46  ;;  %v90_v51 = vunpack.c.h.b16 %v3995_v5  ;;  %v3021_v52 = vunpack.i.l.s16 %v97_v31 }
   0xc   :  { %v142_v48 = vsel %vm141_vm3, %v140_v33, %v139_v42  ;;  %v266_v53 = vsel %vm141_vm3, %v265_v39, %v264_v49  ;;  %v3012_v54 = vunpack.i.l.s16 %v88_v28  ;;  %v146_v55 = vrot.slane %v3019_v41, 2 }
   0xd   :  { %v269_v56 = vrot.slane %v3019_v41, 3  ;;  %v145_v57 = vsel %vm144_vm4, %v143_v45, %v142_v48  ;;  %v273_v58 = vrot.slane %v3008_v40, 1  ;;  %v268_v59 = vsel %vm144_vm4, %v267_v47, %v266_v53  ;;  %v3757_v53 = vld [vmem:[%s5780_s3 + $0x8] sm:$0xff] }
   0xe   :  { %230 = vmatpush.bf16.msra.mxu0 %v4028_v21  ;;  %296 = vmatpush.bf16.msra.mxu2 %v4028_v21  ;;  %v152_v60 = vrot.slane %v3010_v44, 7  ;;  %v92_v61 = vunpack.c.h.b16 %v4000_v6  ;;  %v3014_v63 = vunpack.i.l.s16 %v90_v51  ;;  %v149_v2 = vrot.slane %v3021_v52, 1  ;;  %v3759_v51 = vld [vmem:[%s5780_s3 + $0x18] sm:$0xff] }
   0xf   :  { %v271_v3 = vrot.slane %v3021_v52, 2  ;;  %v148_v4 = vsel %vm147_vm5, %v146_v55, %v145_v57  ;;  %v270_v5 = vsel %vm147_vm5, %v269_v56, %v268_v59  ;;  %v154_v7 = vrot.slane %v3012_v54, 6  ;;  %348 = vmatpush.bf16.msra.mxu1 %v3759_v51  ;;  %v3758_v52 = vld [vmem:[%s5780_s3 + $0x10] sm:$0xff]  ;;  %376 = vmatpush.bf16.msra.mxu3 %v3757_v53  ;;  %v383_v55 = vld [vmem:[%s5778_s0] sm:$0x22] }
  0x10   :  { %v275_v8 = vrot.slane %v3012_v54, 7  ;;  %v94_v6 = vunpack.c.h.b16 %v4006_v9  ;;  %v153_v10 = vsel %vm132_vm0, %v152_v60, %v3008_v40  ;;  %v274_v11 = vsel %vm132_vm0, %v3010_v44, %v273_v58  ;;  %v3756_v54 = vld [vmem:[%s5780_s3] sm:$0xff]  ;;  %v384_v56 = vld [vmem:[%s5778_s0 + $0x10] sm:$0x22] }
  0x11   :  { %v3016_v12 = vunpack.i.l.s16 %v92_v61  ;;  %v151_v16 = vsel %vm150_vm6, %v149_v2, %v148_v4  ;;  %v272_v17 = vsel %vm150_vm6, %v271_v3, %v270_v5  ;;  %v156_v18 = vrot.slane %v3014_v63, 5  ;;  %v385_v59 = vld [vmem:[%s5778_s0 + $0x20] sm:$0x22]  ;;  %v386_v60 = vld [vmem:[%s5778_s0 + $0x30] sm:$0x22] }
  0x12   :  { %231 = vmatpush.bf16.msra.mxu0 %v4044_v35  ;;  %297 = vmatpush.bf16.msra.mxu2 %v4044_v35  ;;  %v277_v9 = vrot.slane %v3014_v63, 6  ;;  %v96_v19 = vunpack.c.h.b16 %v4020_v14  ;;  %v155_v23 = vsel %vm135_vm1, %v154_v7, %v153_v10  ;;  %v276_v24 = vsel %vm135_vm1, %v275_v8, %v274_v11  ;;  %v387_v3 = vld [vmem:[%s5778_s0 + $0x40] sm:$0x22]  ;;  %v388_v4 = vld [vmem:[%s5778_s0 + $0x50] sm:$0x22] }
  0x13   :  { %v3018_v25 = vunpack.i.l.s16 %v94_v6  ;;  %v166_v26 = vpack.c.b16 %v151_v16, %v151_v16  ;;  %v287_v27 = vpack.c.b16 %v272_v17, %v272_v17  ;;  %v158_v28 = vrot.slane %v3016_v12, 4  ;;  %349 = vmatpush.bf16.msra.mxu1 %v3758_v52  ;;  %377 = vmatpush.bf16.msra.mxu3 %v3756_v54 }
  0x14   :  { %v279_v29 = vrot.slane %v3016_v12, 5  ;;  %v98_v14 = vunpack.c.h.b16 %v4033_v22  ;;  %v157_v30 = vsel %vm138_vm2, %v156_v18, %v155_v23  ;;  %v278_v31 = vsel %vm138_vm2, %v277_v9, %v276_v24  ;;  %v389_v9 = vld [vmem:[%s5778_s0 + $0x60] sm:$0x22] }
  0x15   :  { %v3020_v32 = vunpack.i.l.s16 %v96_v19  ;;  %v160_v33 = vrot.slane %v3018_v25, 3  ;;  %v281_v34 = vrot.slane %v3018_v25, 4  ;;  %v159_v36 = vsel %vm141_vm3, %v158_v28, %v157_v30 }
  0x16   :  { %232 = vmatpush.bf16.msra.mxu0 %v4057_v50  ;;  %298 = vmatpush.bf16.msra.mxu2 %v4057_v50  ;;  %v280_v37 = vsel %vm141_vm3, %v279_v29, %v278_v31  ;;  %v3022_v38 = vunpack.i.l.s16 %v98_v14  ;;  %vm223_vm7 = vcmask 130048   ;;  %v400_v57 = vunpack.c.h.b16 %v383_v55  ;;  %v390_v14 = vld [vmem:[%s5778_s0 + $0x70] sm:$0x22] }
  0x17   :  { %v162_v22 = vrot.slane %v3020_v32, 2  ;;  %v283_v39 = vrot.slane %v3020_v32, 3  ;;  %v161_v40 = vsel %vm144_vm4, %v160_v33, %v159_v36  ;;  %v282_v41 = vsel %vm144_vm4, %v281_v34, %v280_v37  ;;  %481 = vmatpush.bf16.msrb.mxu1 %v3972_v0  ;;  %501 = vmatpush.bf16.msrb.mxu3 %v4089_v20 }
  0x18   :  { %v164_v42 = vrot.slane %v3022_v38, 1  ;;  %v285_v43 = vrot.slane %v3022_v38, 2  ;;  %v402_v58 = vunpack.c.h.b16 %v384_v56  ;;  %v4157_v61 = vunpack.i.l.s16 %v400_v57 }
  0x19   :  { %v163_v44 = vsel %vm147_vm5, %v162_v22, %v161_v40  ;;  %v284_v45 = vsel %vm147_vm5, %v283_v39, %v282_v41  ;;  %v404_v5 = vunpack.c.h.b16 %v385_v59  ;;  %v406_v7 = vunpack.c.h.b16 %v386_v60  ;;  %v3879_v41 = vld [vmem:[%s5779_s2] ss:$0 sm:$0xff] }
  0x1a   :  { %233 = vmatpush.bf16.msra.mxu0 %v4069_v62  ;;  %299 = vmatpush.bf16.msra.mxu2 %v4069_v62  ;;  %v165_v46 = vsel %vm150_vm6, %v164_v42, %v163_v44  ;;  %v286_v47 = vsel %vm150_vm6, %v285_v43, %v284_v45  ;;  %v4159_v63 = vunpack.i.l.s16 %v402_v58  ;;  %v403_v8 = vunpack.c.l.b16 %v385_v59 }
  0x1b   :  { %v167_v48 = vpack.c.b16 %v165_v46, %v165_v46  ;;  %v288_v49 = vpack.c.b16 %v286_v47, %v286_v47  ;;  %482 = vmatpush.bf16.msrb.mxu1 %v3979_v1  ;;  %v408_v6 = vunpack.c.h.b16 %v387_v3  ;;  %v461_v10 = vrot.slane %v4157_v61, 2 }
  0x1c   :  { %v462_v11 = vrot.slane %v4159_v63, 1  ;;  %v399_v12 = vunpack.c.l.b16 %v383_v55  ;;  %v401_v16 = vunpack.c.l.b16 %v384_v56  ;;  %v410_v17 = vunpack.c.h.b16 %v388_v4 }
  0x1d   :  { %v4174_v19 = vunpack.i.l.s16 %v404_v5  ;;  %v4176_v23 = vunpack.i.l.s16 %v406_v7  ;;  %v407_v24 = vunpack.c.l.b16 %v387_v3  ;;  %v3087_v25 = vunpack.i.l.s16 %v403_v8 }
  0x1e   :  { %234 = vmatpush.bf16.msra.mxu0 %v4081_v15  ;;  %300 = vmatpush.bf16.msra.mxu2 %v4081_v15  ;;  %v409_v28 = vunpack.c.l.b16 %v388_v4  ;;  %v411_v30 = vunpack.c.l.b16 %v389_v9  ;;  %v3083_v31 = vunpack.i.l.s16 %v399_v12  ;;  %v3085_v32 = vunpack.i.l.s16 %v401_v16 }
  0x1f   :  { %483 = vmatpush.bf16.msrb.mxu1 %v4015_v13  ;;  %v412_v33 = vunpack.c.h.b16 %v389_v9  ;;  %v4184_v34 = vunpack.i.l.s16 %v410_v17  ;;  %v405_v36 = vunpack.c.l.b16 %v386_v60  ;;  %v413_v37 = vunpack.c.l.b16 %v390_v14 }
  0x20   :  { %v465_v22 = vrot.slane %v4176_v23, 7  ;;  %v4189_v39 = vunpack.i.l.s16 %v407_v24  ;;  %v546_v40 = vrot.slane %v3087_v25, 1  ;;  %v4195_v43 = vunpack.i.l.s16 %v409_v28 }
  0x21   :  { %235 = vmatmul.bf16.vlgmr.msra.gmra.mxu0 %v166_v26  ;;  %301 = vmatmul.bf16.vlgmr.msra.gmra.mxu2 %v287_v27  ;;  %v4178_v26 = vunpack.i.l.s16 %v408_v6  ;;  %v463_v27 = vsel %vm132_vm0, %v462_v11, %v461_v10  ;;  %v543_v44 = vrot.slane %v3083_v31, 3  ;;  %v544_v45 = vrot.slane %v3085_v32, 2 }
  0x22   :  { %313 = vmatpush.bf16.msrb.mxu2 %v4089_v20  ;;  %247 = vmatpush.bf16.msrb.mxu0 %v4089_v20  ;;  %v464_v38 = vsel %vm135_vm1, %v4174_v19, %v463_v27  ;;  %v4197_v46 = vunpack.i.l.s16 %v411_v30  ;;  %v447_v47 = vrot.slane %v3083_v31, 2  ;;  %v3089_v51 = vunpack.i.l.s16 %v405_v36 }
  0x23   :  { %484 = vmatpush.bf16.msrb.mxu1 %v4028_v21  ;;  %v467_v42 = vrot.slane %v4178_v26, 6  ;;  %v4200_v52 = vunpack.i.l.s16 %v413_v37  ;;  %v545_v53 = vsel %vm132_vm0, %v544_v45, %v543_v44  ;;  %v551_v54 = vrot.slane %v4195_v43, 6  ;;  %v641_v44 = vld [vmem:[%s5778_s0 + $0x20] sm:$0x44] }
  0x24   :  { %v414_v56 = vunpack.c.h.b16 %v390_v14  ;;  %v466_v57 = vsel %vm138_vm2, %v465_v22, %v464_v38  ;;  %v547_v58 = vsel %vm135_vm1, %v546_v40, %v545_v53  ;;  %v553_v59 = vrot.slane %v4197_v46, 5  ;;  %v639_v38 = vld [vmem:[%s5778_s0] sm:$0x44] }
  0x25   :  { %v4207_v3 = vunpack.i.l.s16 %v412_v33  ;;  %v548_v4 = vsel %vm138_vm2, %v3089_v51, %v547_v58  ;;  %v555_v5 = vrot.slane %v4200_v52, 4  ;;  %v469_v8 = vrot.slane %v4184_v34, 5 }
  0x26   :  { %577 = vmatpush.bf16.msra.mxu2 %v3972_v0  ;;  %v468_v12 = vsel %vm141_vm3, %v467_v42, %v466_v57  ;;  %v4216_v17 = vunpack.i.l.s16 %v414_v56  ;;  %vm338_vm8 = vcmask 261120   ;;  %v557_v30 = vrot.slane %v4157_v61, 3 }
  0x27   :  { %485 = vmatpush.bf16.msrb.mxu1 %v4044_v35  ;;  %v471_v27 = vrot.slane %v4207_v3, 4  ;;  %v470_v14 = vsel %vm144_vm4, %v469_v8, %v468_v12  ;;  %v558_v36 = vrot.slane %v4159_v63, 2  ;;  %v453_v37 = vrot.slane %v4189_v39, 6  ;;  %v4270_v8 = vld [vmem:[%s5778_s0 + $0x50] sm:$0x44] }
  0x28   :  { %v455_v42 = vrot.slane %v4195_v43, 5  ;;  %v655_v45 = vunpack.c.l.b16 %v639_v38  ;;  %v4253_v43 = vld [vmem:[%s5778_s0 + $0x30] sm:$0x44] }
  0x29   :  { %v472_v63 = vsel %vm147_vm5, %v471_v27, %v470_v14  ;;  %v567_v27 = vrot.slane %v4207_v3, 5  ;;  %v665_v14 = vunpack.c.l.b16 %v4270_v8 }
  0x2a   :  { %578 = vmatpush.bf16.msra.mxu2 %v3979_v1  ;;  %v3127_v58 = vunpack.i.l.s16 %v655_v45 }
  0x2b   :  { %486 = vmatpush.bf16.msrb.mxu1 %v4057_v50 }
  0x2e   :  { %579 = vmatpush.bf16.msra.mxu2 %v4015_v13 }
  0x2f   :  { %487 = vmatpush.bf16.msrb.mxu1 %v4069_v62 }
  0x31   :  { %3059 = vmatmul.msk.bf16.vlgmr.msrb.gmra.mxu0 %vm223_vm7, %v167_v48  ;;  %3060 = vmatmul.msk.bf16.vlgmr.msrb.gmra.mxu2 %vm223_vm7, %v288_v49  ;;  %v448_v48 = vrot.slane %v3085_v32, 1  ;;  %v549_v49 = vrot.slane %v4189_v39, 7 }
  0x32   :  { %580 = vmatpush.bf16.msra.mxu2 %v4028_v21 }
  0x33   :  { %488 = vmatpush.bf16.msrb.mxu1 %v4081_v15  ;;  %v449_v6 = vsel %vm132_vm0, %v448_v48, %v447_v47  ;;  %v550_v10 = vsel %vm141_vm3, %v549_v49, %v548_v4  ;;  %v563_v4 = vrot.slane %v4178_v26, 7  ;;  %v4279_v26 = vld [vmem:[%s5778_s0 + $0x60] sm:$0x44] }
  0x34   :  { %v552_v16 = vsel %vm144_vm4, %v551_v54, %v550_v10  ;;  %v450_v28 = vsel %vm135_vm1, %v3087_v25, %v449_v6  ;;  %v4232_v25 = vld [vmem:[%s5778_s0 + $0x10] sm:$0x44]  ;;  %v661_v6 = vunpack.c.l.b16 %v4253_v43 }
  0x35   :  { %v554_v9 = vsel %vm147_vm5, %v553_v59, %v552_v16  ;;  %v657_v47 = vunpack.c.l.b16 %v4232_v25  ;;  %v565_v16 = vrot.slane %v4184_v34, 6 }
  0x36   :  { %581 = vmatpush.bf16.msra.mxu2 %v4044_v35 }
  0x37   :  { %v3129_v59 = vunpack.i.l.s16 %v657_v47 }
  0x3a   :  { %582 = vmatpush.bf16.msra.mxu2 %v4057_v50 }
  0x3e   :  { %583 = vmatpush.bf16.msra.mxu2 %v4069_v62 }
  0x42   :  { %584 = vmatpush.bf16.msra.mxu2 %v4081_v15 }
  0x46   :  { %833 = vmatpush.bf16.msrb.mxu2 %v3972_v0 }
  0x4a   :  { %834 = vmatpush.bf16.msrb.mxu2 %v3979_v1 }
  0x4e   :  { %835 = vmatpush.bf16.msrb.mxu2 %v4015_v13 }
  0x52   :  { %836 = vmatpush.bf16.msrb.mxu2 %v4028_v21 }
  0x56   :  { %837 = vmatpush.bf16.msrb.mxu2 %v4044_v35 }
  0x5a   :  { %838 = vmatpush.bf16.msrb.mxu2 %v4057_v50 }
  0x5e   :  { %839 = vmatpush.bf16.msrb.mxu2 %v4069_v62 }
  0x62   :  { %840 = vmatpush.bf16.msrb.mxu2 %v4081_v15 }
  0x9e   :  { %v236_v2 = vpop.f32.mrf.mxu0 }
  0x9f   :  { %v237_v60 = vadd.f32 %v3879_v41, %v236_v2  ;;  %v451_v2 = vrot.slane %v3089_v51, 7  ;;  %v559_v51 = vsel %vm132_vm0, %v558_v36, %v557_v30 }
  0xa1   :  { %v452_v40 = vsel %vm138_vm2, %v451_v2, %v450_v28  ;;  %v4286_v2 = vld [vmem:[%s5778_s0 + $0x70] sm:$0x44]  ;;  %v660_v28 = vunpack.c.h.b16 %v641_v44 }
  0xa2   :  { %v454_v49 = vsel %vm141_vm3, %v453_v37, %v452_v40  ;;  %v669_v36 = vunpack.c.l.b16 %v4286_v2  ;;  %v800_v40 = vrot.slane %v3129_v59, 4 }
  0xa3   :  { %v456_v56 = vsel %vm144_vm4, %v455_v42, %v454_v49 }
  0xa4   :  { %v302_v18 = vpop.f32.mrf.mxu2  ;;  %v3141_v47 = vunpack.i.l.s16 %v669_v36 }
  0xa5   :  { %v303_v32 = vadd.f32 %v3879_v41, %v302_v18  ;;  %v473_v18 = vrot.slane %v4216_v17, 3  ;;  %v560_v41 = vrot.slane %v4174_v19, 1  ;;  %v457_v19 = vrot.slane %v4197_v46, 4 }
  0xa6   :  { %v238_v29 = vpop.f32.mrf.mxu0 }
  0xa7   :  { %v556_v29 = vsel %vm150_vm6, %v555_v5, %v554_v9  ;;  %v474_v54 = vsel %vm150_vm6, %v473_v18, %v472_v63  ;;  %v561_v57 = vsel %vm135_vm1, %v560_v41, %v559_v51  ;;  %v459_v5 = vrot.slane %v4200_v52, 3 }
  0xa8   :  { %v571_v31 = vpack.c.b16 %v556_v29, %v556_v29  ;;  %v476_v46 = vpack.c.b16 %v474_v54, %v474_v54  ;;  %v458_v10 = vsel %vm147_vm5, %v457_v19, %v456_v56  ;;  %v656_v52 = vunpack.c.h.b16 %v639_v38 }
  0xa9   :  { %v658_v9 = vunpack.c.h.b16 %v4232_v25  ;;  %v460_v34 = vsel %vm150_vm6, %v459_v5, %v458_v10  ;;  %v3137_v18 = vunpack.i.l.s16 %v665_v14  ;;  %v668_v14 = vunpack.c.h.b16 %v4279_v26 }
  0xaa   :  { %585 = vmatmul.bf16.vlgmr.msra.gmra.mxu2 %v571_v31  ;;  %v667_v31 = vunpack.c.l.b16 %v4279_v26  ;;  %v4298_v37 = vunpack.i.l.s16 %v656_v52 }
  0xab   :  { %1089 = vmatpush.bf16.msra.mxu2 %v3972_v0  ;;  %v4301_v38 = vunpack.i.l.s16 %v658_v9  ;;  %v666_v9 = vunpack.c.h.b16 %v4270_v8 }
  0xac   :  { %v304_v55 = vpop.f32.mrf.mxu2  ;;  %v3139_v41 = vunpack.i.l.s16 %v667_v31 }
  0xad   :  { %v659_v55 = vunpack.c.l.b16 %v641_v44  ;;  %v718_v54 = vrot.slane %v4301_v38, 3  ;;  %v4342_v8 = vunpack.i.l.s16 %v666_v9 }
  0xae   :  { %v249_v7 = vpop.f32.mrf.mxu0 }
  0xaf   :  { %v250_v11 = vadd.f32 %v249_v7, %v237_v60  ;;  %1090 = vmatpush.bf16.msra.mxu2 %v3979_v1  ;;  %v4265_v7 = vld [vmem:[%s5778_s0 + $0x40] sm:$0x44]  ;;  %v3131_v12 = vunpack.i.l.s16 %v659_v55  ;;  %v475_v55 = vpack.c.b16 %v460_v34, %v460_v34 }
  0xb0   :  { %v663_v29 = vunpack.c.l.b16 %v4265_v7 }
  0xb1   :  { %v253_v24 = vmax.f32 %v250_v11, 0.0  ;;  %v562_v11 = vsel %vm138_vm2, %v4176_v23, %v561_v57  ;;  %v704_v23 = vrot.slane %v3129_v59, 3  ;;  %v706_v3 = vrot.slane %v3131_v12, 2 }
  0xb2   :  { %v564_v30 = vsel %vm141_vm3, %v563_v4, %v562_v11  ;;  %v3135_v63 = vunpack.i.l.s16 %v663_v29  ;;  %v569_v4 = vrot.slane %v4216_v17, 4  ;;  %v711_v11 = vrot.slane %v3137_v18, 7 }
  0xb3   :  { %v254_v33 = vpack.c.bf16 %v253_v24, %v253_v24  ;;  %1091 = vmatpush.bf16.msra.mxu2 %v4015_v13  ;;  %v703_v24 = vrot.slane %v3127_v58, 4  ;;  %v566_v56 = vsel %vm144_vm4, %v565_v16, %v564_v30  ;;  %v664_v16 = vunpack.c.h.b16 %v4265_v7 }
  0xb4   :  { %v315_v22 = vpop.f32.mrf.mxu2  ;;  %v806_v51 = vrot.slane %v3135_v63, 1  ;;  %v568_v10 = vsel %vm147_vm5, %v567_v27, %v566_v56  ;;  %v715_v30 = vrot.slane %v3141_v47, 5 }
  0xb5   :  { %v316_v61 = vadd.f32 %v315_v22, %v303_v32  ;;  %3082 = vmatmul.msk.bf16.vlgmr.msra.gmra.mxu3 %vm338_vm8, %v254_v33  ;;  %v3133_v32 = vunpack.i.l.s16 %v661_v6  ;;  %v662_v33 = vunpack.c.h.b16 %v4253_v43  ;;  %v705_v25 = vsel %vm132_vm0, %v704_v23, %v703_v24 }
  0xb6   :  { %v251_v39 = vpop.f32.mrf.mxu0  ;;  %597 = vmatpush.bf16.msra.mxu3 %v4089_v20  ;;  %v799_v22 = vrot.slane %v3127_v58, 5  ;;  %v809_v43 = vrot.slane %v3139_v41, 7  ;;  %v811_v58 = vrot.slane %v3141_v47, 6  ;;  %v570_v29 = vsel %vm150_vm6, %v569_v4, %v568_v10  ;;  %v4416_v10 = vld [vmem:[%s5778_s0 + $0x60] sm:$0x88] }
  0xb7   :  { %v319_v48 = vmax.f32 %v316_v61, 0.0  ;;  %1092 = vmatpush.bf16.msra.mxu2 %v4028_v21  ;;  %v4304_v61 = vunpack.i.l.s16 %v660_v28  ;;  %v802_v39 = vrot.slane %v3131_v12, 3  ;;  %v708_v42 = vrot.slane %v3133_v32, 1 }
  0xb8   :  { %v801_v44 = vsel %vm132_vm0, %v800_v40, %v799_v22  ;;  %v804_v45 = vrot.slane %v3133_v32, 2  ;;  %v4319_v59 = vunpack.i.l.s16 %v662_v33  ;;  %v713_v28 = vrot.slane %v3139_v41, 6  ;;  %v4357_v22 = vld [vmem:[%s5778_s0] sm:$0x88] }
  0xb9   :  { %v320_v53 = vpack.c.bf16 %v319_v48, %v319_v48  ;;  %v707_v48 = vsel %vm135_vm1, %v706_v3, %v705_v25  ;;  %v803_v49 = vsel %vm135_vm1, %v802_v39, %v801_v44  ;;  %v720_v5 = vrot.slane %v4304_v61, 2  ;;  %v4372_v39 = vld [vmem:[%s5778_s0 + $0x20] sm:$0x88] }
  0xba   :  { %v805_v19 = vsel %vm138_vm2, %v804_v45, %v803_v49  ;;  %v722_v23 = vrot.slane %v4319_v59, 1  ;;  %v4340_v7 = vunpack.i.l.s16 %v664_v16  ;;  %v572_v32 = vpack.c.b16 %v570_v29, %v570_v29  ;;  %v4422_v16 = vld [vmem:[%s5778_s0 + $0x70] sm:$0x88] }
  0xbb   :  { %3073 = vmatmul.msk.bf16.vlgmr.msra.gmra.mxu1 %vm338_vm8, %v320_v53  ;;  %1093 = vmatpush.bf16.msra.mxu2 %v4044_v35  ;;  %v717_v53 = vrot.slane %v4298_v37, 4  ;;  %v807_v57 = vsel %vm141_vm3, %v806_v51, %v805_v19  ;;  %v670_v33 = vunpack.c.h.b16 %v4286_v2  ;;  %v4348_v3 = vunpack.i.l.s16 %v668_v14  ;;  %v4362_v2 = vld [vmem:[%s5778_s0 + $0x10] sm:$0x88]  ;;  %v4397_v19 = vld [vmem:[%s5778_s0 + $0x40] sm:$0x88] }
  0xbc   :  { %v317_v60 = vpop.f32.mrf.mxu2  ;;  %737 = vmatpush.bf16.msra.mxu1 %v3972_v0  ;;  %v725_v25 = vrot.slane %v4342_v8, 7  ;;  %v911_v41 = vunpack.c.l.b16 %v4357_v22  ;;  %v913_v44 = vunpack.c.l.b16 %v4362_v2  ;;  %v816_v49 = vrot.slane %v4304_v61, 3 }
  0xbd   :  { %v709_v60 = vsel %vm138_vm2, %v708_v42, %v707_v48  ;;  %v719_v52 = vsel %vm132_vm0, %v718_v54, %v717_v53  ;;  %v4376_v42 = vunpack.i.l.s16 %v670_v33  ;;  %v727_v45 = vrot.slane %v4348_v3, 6 }
  0xbe   :  { %v710_v17 = vsel %vm141_vm3, %v3135_v63, %v709_v60  ;;  %v721_v27 = vsel %vm135_vm1, %v720_v5, %v719_v52  ;;  %v813_v63 = vrot.slane %v4298_v37, 5  ;;  %v4384_v37 = vld [vmem:[%s5778_s0 + $0x30] sm:$0x88]  ;;  %v3171_v53 = vunpack.i.l.s16 %v911_v41 }
  0xbf   :  { %1094 = vmatpush.bf16.msra.mxu2 %v4057_v50  ;;  %v712_v34 = vsel %vm144_vm4, %v711_v11, %v710_v17  ;;  %v723_v31 = vsel %vm138_vm2, %v722_v23, %v721_v27  ;;  %v729_v54 = vrot.slane %v4376_v42, 5  ;;  %v818_v56 = vrot.slane %v4319_v59, 2  ;;  %v4407_v60 = vld [vmem:[%s5778_s0 + $0x50] sm:$0x88] }
  0xc0   :  { %738 = vmatpush.bf16.msra.mxu1 %v3979_v1  ;;  %v714_v36 = vsel %vm147_vm5, %v713_v28, %v712_v34  ;;  %v724_v26 = vsel %vm141_vm3, %v4340_v7, %v723_v31  ;;  %v959_v4 = vrot.slane %v3171_v53, 6  ;;  %v820_v59 = vrot.slane %v4340_v7, 1 }
  0xc1   :  { %v716_v40 = vsel %vm150_vm6, %v715_v30, %v714_v36  ;;  %v726_v48 = vsel %vm144_vm4, %v725_v25, %v724_v26  ;;  %v912_v9 = vunpack.c.h.b16 %v4357_v22  ;;  %v921_v17 = vunpack.c.l.b16 %v4407_v60 }
  0xc2   :  { %v731_v47 = vpack.c.b16 %v716_v40, %v716_v40  ;;  %v728_v61 = vsel %vm147_vm5, %v727_v45, %v726_v48  ;;  %v923_v28 = vunpack.c.l.b16 %v4416_v10  ;;  %v823_v14 = vrot.slane %v4348_v3, 7 }
  0xc3   :  { %1095 = vmatpush.bf16.msra.mxu2 %v4069_v62  ;;  %v916_v34 = vunpack.c.h.b16 %v4372_v39  ;;  %v925_v30 = vunpack.c.l.b16 %v4422_v16  ;;  %v4436_v36 = vunpack.i.l.s16 %v912_v9  ;;  %v3181_v25 = vunpack.i.l.s16 %v921_v17 }
  0xc4   :  { %739 = vmatpush.bf16.msra.mxu1 %v4015_v13  ;;  %v926_v17 = vunpack.c.h.b16 %v4422_v16  ;;  %v4500_v16 = vld [vmem:[%s5778_s0 + $0x28] sm:$0x11] }
  0xc5   :  { %3099 = vmatmul.msk.bf16.vlgmr.msrb.gmra.mxu3 %vm223_vm7, %v476_v46  ;;  %v808_v46 = vsel %vm144_vm4, %v3137_v18, %v807_v57  ;;  %v814_v18 = vrot.slane %v4301_v38, 4  ;;  %v915_v38 = vunpack.c.l.b16 %v4372_v39  ;;  %v4451_v48 = vunpack.i.l.s16 %v916_v34  ;;  %v4514_v34 = vld [vmem:[%s5778_s0 + $0x8] sm:$0x11] }
  0xc6   :  { %757 = vmatpush.bf16.msrb.mxu3 %v4089_v20  ;;  %v810_v6 = vsel %vm147_vm5, %v809_v43, %v808_v46  ;;  %v917_v43 = vunpack.c.l.b16 %v4384_v37  ;;  %v919_v46 = vunpack.c.l.b16 %v4397_v19 }
  0xc7   :  { %v812_v12 = vsel %vm150_vm6, %v811_v58, %v810_v6  ;;  %1096 = vmatpush.bf16.msra.mxu2 %v4081_v15  ;;  %v815_v51 = vsel %vm132_vm0, %v814_v18, %v813_v63  ;;  %v3175_v57 = vunpack.i.l.s16 %v915_v38  ;;  %v730_v6 = vsel %vm150_vm6, %v729_v54, %v728_v61 }
  0xc8   :  { %740 = vmatpush.bf16.msra.mxu1 %v4028_v21  ;;  %v827_v24 = vpack.c.b16 %v812_v12, %v812_v12  ;;  %v817_v58 = vsel %vm135_vm1, %v816_v49, %v815_v51  ;;  %v3177_v11 = vunpack.i.l.s16 %v917_v43  ;;  %v732_v23 = vpack.c.b16 %v730_v6, %v730_v6 }
  0xc9   :  { %v819_v52 = vsel %vm138_vm2, %v818_v56, %v817_v58  ;;  %v962_v12 = vrot.slane %v3175_v57, 4  ;;  %v3179_v27 = vunpack.i.l.s16 %v919_v46  ;;  %v1058_v22 = vrot.slane %v3175_v57, 5 }
  0xca   :  { %841 = vmatmul.bf16.vlgmr.msrb.gmra.mxu2 %v827_v24  ;;  %v821_v29 = vsel %vm141_vm3, %v820_v59, %v819_v52  ;;  %v964_v7 = vrot.slane %v3177_v11, 3  ;;  %v1060_v40 = vrot.slane %v3177_v11, 4  ;;  %v1064_v38 = vrot.slane %v3181_v25, 2 }
  0xcb   :  { %489 = vmatmul.bf16.vlgmr.msrb.gmra.mxu1 %v475_v55  ;;  %1345 = vmatpush.bf16.msrb.mxu2 %v3972_v0  ;;  %v3173_v55 = vunpack.i.l.s16 %v913_v44  ;;  %v822_v63 = vsel %vm144_vm4, %v4342_v8, %v821_v29  ;;  %v1062_v41 = vrot.slane %v3179_v27, 3  ;;  %v918_v44 = vunpack.c.h.b16 %v4384_v37 }
  0xcc   :  { %741 = vmatpush.bf16.msra.mxu1 %v4044_v35  ;;  %v3185_v49 = vunpack.i.l.s16 %v925_v30  ;;  %v920_v43 = vunpack.c.h.b16 %v4397_v19  ;;  %v825_v61 = vrot.slane %v4376_v42, 6  ;;  %v824_v58 = vsel %vm147_vm5, %v823_v14, %v822_v63  ;;  %v4554_v63 = vld [vmem:[%s5778_s0 + $0x58] sm:$0x11] }
  0xcd   :  { %v960_v5 = vrot.slane %v3173_v55, 5  ;;  %v1056_v33 = vrot.slane %v3173_v55, 6  ;;  %v4463_v56 = vunpack.i.l.s16 %v918_v44 }
  0xce   :  { %v4473_v42 = vunpack.i.l.s16 %v920_v43  ;;  %v971_v6 = vrot.slane %v3185_v49, 7  ;;  %v826_v59 = vsel %vm150_vm6, %v825_v61, %v824_v58  ;;  %v4581_v61 = vld [vmem:[%s5778_s0 + $0x78] sm:$0x11] }
  0xcf   :  { %1346 = vmatpush.bf16.msrb.mxu2 %v3979_v1  ;;  %v961_v24 = vsel %vm132_vm0, %v960_v5, %v959_v4  ;;  %v976_v4 = vrot.slane %v4451_v48, 4  ;;  %v978_v52 = vrot.slane %v4463_v56, 3 }
  0xd0   :  { %742 = vmatpush.bf16.msra.mxu1 %v4057_v50  ;;  %v963_v31 = vsel %vm135_vm1, %v962_v12, %v961_v24 }
  0xd1   :  { %v965_v18 = vsel %vm138_vm2, %v964_v7, %v963_v31  ;;  %v4519_v7 = vld [vmem:[%s5778_s0 + $0x38] sm:$0x11]  ;;  %v4522_v31 = vunpack.i.l.s16 %v926_v17 }
  0xd3   :  { %1347 = vmatpush.bf16.msrb.mxu2 %v4015_v13 }
  0xd4   :  { %743 = vmatpush.bf16.msra.mxu1 %v4069_v62 }
  0xd5   :  { %3113 = vmatmul.msk.bf16.vlgmr.msra.gmra.mxu3 %vm223_vm7, %v572_v32  ;;  %v1055_v32 = vrot.slane %v3171_v53, 7  ;;  %v973_v53 = vrot.slane %v4436_v36, 6 }
  0xd6   :  { %853 = vmatpush.bf16.msra.mxu3 %v4089_v20 }
  0xd7   :  { %1348 = vmatpush.bf16.msrb.mxu2 %v4028_v21  ;;  %v1057_v3 = vsel %vm132_vm0, %v1056_v33, %v1055_v32  ;;  %v1072_v32 = vrot.slane %v4451_v48, 5  ;;  %v4535_v33 = vld [vmem:[%s5778_s0 + $0x48] sm:$0x11] }
  0xd8   :  { %744 = vmatpush.bf16.msra.mxu1 %v4081_v15  ;;  %v1059_v39 = vsel %vm135_vm1, %v1058_v22, %v1057_v3  ;;  %v4547_v3 = vld [vmem:[%s5777_s1 + $0x28] sm:$0xff] }
  0xd9   :  { %v1061_v45 = vsel %vm138_vm2, %v1060_v40, %v1059_v39  ;;  %v1074_v40 = vrot.slane %v4463_v56, 4 }
  0xda   :  { %v1063_v51 = vsel %vm141_vm3, %v1062_v41, %v1061_v45  ;;  %v985_v41 = vrot.slane %v4522_v31, 7 }
  0xdb   :  { %745 = vmatmul.bf16.vlgmr.msra.gmra.mxu1 %v731_v47  ;;  %1349 = vmatpush.bf16.msrb.mxu2 %v4044_v35  ;;  %v1065_v37 = vsel %vm144_vm4, %v1064_v38, %v1063_v51  ;;  %v1177_v51 = vunpack.c.l.b16 %v4554_v63 }
  0xdc   :  { %993 = vmatpush.bf16.msrb.mxu1 %v3972_v0 }
  0xdf   :  { %1350 = vmatpush.bf16.msrb.mxu2 %v4057_v50 }
  0xe0   :  { %994 = vmatpush.bf16.msrb.mxu1 %v3979_v1  ;;  %v914_v1 = vunpack.c.h.b16 %v4362_v2  ;;  %v966_v2 = vrot.slane %v3179_v27, 2 }
  0xe2   :  { %v4438_v26 = vunpack.i.l.s16 %v914_v1  ;;  %v967_v8 = vsel %vm141_vm3, %v966_v2, %v965_v18  ;;  %v980_v1 = vrot.slane %v4473_v42, 2  ;;  %v1175_v18 = vunpack.c.l.b16 %v4535_v33 }
  0xe3   :  { %1351 = vmatpush.bf16.msrb.mxu2 %v4069_v62 }
  0xe4   :  { %995 = vmatpush.bf16.msrb.mxu1 %v4015_v13  ;;  %v3183_v13 = vunpack.i.l.s16 %v923_v28  ;;  %v974_v54 = vrot.slane %v4438_v26, 5  ;;  %v1069_v28 = vrot.slane %v4436_v36, 7  ;;  %v1070_v27 = vrot.slane %v4438_v26, 6 }
  0xe5   :  { %3143 = vmatmul.msk.bf16.vlgmr.msrb.gmra.mxu3 %vm223_vm7, %v732_v23  ;;  %v924_v23 = vunpack.c.h.b16 %v4416_v10  ;;  %v4505_v10 = vld [vmem:[%s5777_s1 + $0x30] sm:$0xff]  ;;  %v1171_v36 = vunpack.c.l.b16 %v4500_v16  ;;  %v1173_v26 = vunpack.c.l.b16 %v4519_v7 }
  0xe6   :  { %1013 = vmatpush.bf16.msrb.mxu3 %v4089_v20  ;;  %v1066_v47 = vrot.slane %v3183_v13, 1  ;;  %v975_v19 = vsel %vm132_vm0, %v974_v54, %v973_v53  ;;  %v1071_v22 = vsel %vm132_vm0, %v1070_v27, %v1069_v28  ;;  %v3223_v54 = vunpack.i.l.s16 %v1175_v18 }
  0xe7   :  { %v977_v12 = vsel %vm135_vm1, %v976_v4, %v975_v19  ;;  %1352 = vmatpush.bf16.msrb.mxu2 %v4081_v15  ;;  %v1073_v44 = vsel %vm135_vm1, %v1072_v32, %v1071_v22  ;;  %v3219_v45 = vunpack.i.l.s16 %v1171_v36  ;;  %v3221_v38 = vunpack.i.l.s16 %v1173_v26 }
  0xe8   :  { %996 = vmatpush.bf16.msrb.mxu1 %v4028_v21  ;;  %v968_v21 = vrot.slane %v3181_v25, 1  ;;  %v1067_v55 = vsel %vm147_vm5, %v1066_v47, %v1065_v37  ;;  %v979_v24 = vsel %vm138_vm2, %v978_v52, %v977_v12  ;;  %v4539_v25 = vunpack.i.l.s16 %v924_v23 }
  0xe9   :  { %v1068_v57 = vsel %vm150_vm6, %v3185_v49, %v1067_v55  ;;  %v981_v14 = vsel %vm141_vm3, %v980_v1, %v979_v24  ;;  %v1076_v49 = vrot.slane %v4473_v42, 3  ;;  %v1075_v53 = vsel %vm138_vm2, %v1074_v40, %v1073_v44  ;;  %v4592_v42 = vld [vmem:[%s5777_s1 + $0x18] sm:$0xff] }
  0xea   :  { %v969_v46 = vsel %vm144_vm4, %v968_v21, %v967_v8  ;;  %v1083_v5 = vpack.c.b16 %v1068_v57, %v1068_v57  ;;  %v4566_v21 = vld [vmem:[%s5778_s0 + $0x68] sm:$0x11]  ;;  %v4572_v8 = vld [vmem:[%s5777_s1 + $0x20] sm:$0xff]  ;;  %v1217_v43 = vrot.slane %v3219_v45, 6  ;;  %v1219_v56 = vrot.slane %v3221_v38, 5 }
  0xeb   :  { %v970_v11 = vsel %vm147_vm5, %v3183_v13, %v969_v46  ;;  %v1167_v13 = vunpack.c.l.b16 %v4514_v34  ;;  %v1179_v58 = vunpack.c.l.b16 %v4566_v21  ;;  %v1077_v4 = vsel %vm141_vm3, %v1076_v49, %v1075_v53 }
  0xec   :  { %997 = vmatpush.bf16.msrb.mxu1 %v4044_v35  ;;  %v922_v35 = vunpack.c.h.b16 %v4407_v60  ;;  %1097 = vmatmul.bf16.vlgmr.msra.gmra.mxu2 %v1083_v5  ;;  %v828_v60 = vpack.c.b16 %v826_v59, %v826_v59  ;;  %v1181_v59 = vunpack.c.l.b16 %v4581_v61  ;;  %v1080_v52 = vrot.slane %v4539_v25, 1 }
  0xed   :  { %1601 = vmatpush.bf16.msra.mxu2 %v3972_v0  ;;  %v4494_v0 = vld [vmem:[%s5778_s0 + $0x18] sm:$0x11]  ;;  %v3215_v48 = vunpack.i.l.s16 %v1167_v13  ;;  %v1172_v12 = vunpack.c.h.b16 %v4500_v16  ;;  %v1168_v1 = vunpack.c.h.b16 %v4514_v34  ;;  %v3227_v17 = vunpack.i.l.s16 %v1179_v58 }
  0xee   :  { %v4480_v9 = vunpack.i.l.s16 %v922_v35  ;;  %v1169_v30 = vunpack.c.l.b16 %v4494_v0  ;;  %v1170_v5 = vunpack.c.h.b16 %v4494_v0  ;;  %v3225_v35 = vunpack.i.l.s16 %v1177_v51 }
  0xef   :  { %v1313_v24 = vrot.slane %v3219_v45, 7  ;;  %v1315_v0 = vrot.slane %v3221_v38, 6  ;;  %v1317_v34 = vrot.slane %v3223_v54, 5  ;;  %v4617_v32 = vunpack.i.l.s16 %v1172_v12  ;;  %v4687_v12 = vld [vmem:[%s5778_s0 + $0x38] sm:$0x22] }
  0xf0   :  { %998 = vmatpush.bf16.msrb.mxu1 %v4057_v50  ;;  %v972_v50 = vsel %vm150_vm6, %v971_v6, %v970_v11  ;;  %v982_v29 = vrot.slane %v4480_v9, 1  ;;  %v3217_v39 = vunpack.i.l.s16 %v1169_v30  ;;  %v1078_v57 = vrot.slane %v4480_v9, 2 }
  0xf1   :  { %1602 = vmatpush.bf16.msra.mxu2 %v4505_v10  ;;  %v1221_v11 = vrot.slane %v3223_v54, 4  ;;  %v4602_v23 = vunpack.i.l.s16 %v1170_v5  ;;  %v1223_v28 = vrot.slane %v3225_v35, 3  ;;  %v1174_v30 = vunpack.c.h.b16 %v4519_v7  ;;  %v4629_v7 = vld [vmem:[%s5777_s1 + $0x8] sm:$0xff] }
  0xf2   :  { %v983_v2 = vsel %vm144_vm4, %v982_v29, %v981_v14  ;;  %v1215_v37 = vrot.slane %v3217_v39, 7  ;;  %v3229_v29 = vunpack.i.l.s16 %v1181_v59  ;;  %v1319_v26 = vrot.slane %v3225_v35, 4  ;;  %v4678_v59 = vld [vmem:[%s5778_s0 + $0x18] sm:$0x22] }
  0xf3   :  { %v984_v47 = vsel %vm147_vm5, %v4539_v25, %v983_v2  ;;  %v1225_v25 = vrot.slane %v3227_v17, 2  ;;  %v1321_v13 = vrot.slane %v3227_v17, 3  ;;  %v4621_v40 = vunpack.i.l.s16 %v1168_v1  ;;  %v4696_v1 = vld [vmem:[%s5777_s1 + $0x40] sm:$0xff]  ;;  %v4702_v17 = vld [vmem:[%s5778_s0 + $0x28] sm:$0x22] }
  0xf4   :  { %999 = vmatpush.bf16.msrb.mxu1 %v4069_v62  ;;  %v987_v62 = vpack.c.b16 %v972_v50, %v972_v50  ;;  %v986_v55 = vsel %vm150_vm6, %v985_v41, %v984_v47  ;;  %v1216_v46 = vsel %vm132_vm0, %v1215_v37, %v3215_v48  ;;  %v1079_v50 = vsel %vm144_vm4, %v1078_v57, %v1077_v4  ;;  %v4647_v37 = vld [vmem:[%s5777_s1] sm:$0xff] }
  0xf5   :  { %3157 = vmatmul.msk.bf16.vlgmr.msra.gmra.mxu3 %vm223_vm7, %v828_v60  ;;  %1603 = vmatpush.bf16.msra.mxu2 %v4547_v3  ;;  %v1218_v19 = vsel %vm135_vm1, %v1217_v43, %v1216_v46  ;;  %v988_v6 = vpack.c.b16 %v986_v55, %v986_v55  ;;  %v1311_v60 = vrot.slane %v3215_v48, 1  ;;  %v1323_v2 = vrot.slane %v3229_v29, 2 }
  0xf6   :  { %1109 = vmatpush.bf16.msra.mxu3 %v4089_v20  ;;  %v1220_v9 = vsel %vm138_vm2, %v1219_v56, %v1218_v19  ;;  %v1176_v41 = vunpack.c.h.b16 %v4535_v33  ;;  %v4635_v45 = vunpack.i.l.s16 %v1174_v30  ;;  %v1227_v38 = vrot.slane %v3229_v29, 1 }
  0xf7   :  { %v1312_v27 = vsel %vm132_vm0, %v3217_v39, %v1311_v60  ;;  %v1222_v16 = vsel %vm141_vm3, %v1221_v11, %v1220_v9  ;;  %v1229_v39 = vrot.slane %v4602_v23, 7  ;;  %v1081_v48 = vsel %vm147_vm5, %v1080_v52, %v1079_v50 }
  0xf8   :  { %1000 = vmatpush.bf16.msrb.mxu1 %v4081_v15  ;;  %v4527_v15 = vld [vmem:[%s5777_s1 + $0x38] sm:$0xff]  ;;  %v1314_v14 = vsel %vm135_vm1, %v1313_v24, %v1312_v27  ;;  %v1224_v18 = vsel %vm144_vm4, %v1223_v28, %v1222_v16  ;;  %v1231_v51 = vrot.slane %v4617_v32, 6  ;;  %v1178_v54 = vunpack.c.h.b16 %v4554_v63  ;;  %v4707_v24 = vld [vmem:[%s5778_s0 + $0x48] sm:$0x22] }
  0xf9   :  { %1604 = vmatpush.bf16.msra.mxu2 %v4572_v8  ;;  %v1316_v36 = vsel %vm138_vm2, %v1315_v0, %v1314_v14  ;;  %v1226_v49 = vsel %vm147_vm5, %v1225_v25, %v1224_v18  ;;  %v1230_v33 = vsel %vm132_vm0, %v1229_v39, %v4621_v40  ;;  %v4650_v43 = vunpack.i.l.s16 %v1176_v41  ;;  %v4716_v0 = vld [vmem:[%s5778_s0 + $0x58] sm:$0x22] }
  0xfa   :  { %v1318_v22 = vsel %vm141_vm3, %v1317_v34, %v1316_v36  ;;  %v1082_v55 = vsel %vm150_vm6, %v4522_v31, %v1081_v48  ;;  %v1228_v63 = vsel %vm150_vm6, %v1227_v38, %v1226_v49  ;;  %v1233_v56 = vrot.slane %v4635_v45, 5  ;;  %v4727_v36 = vld [vmem:[%s5778_s0 + $0x68] sm:$0x22]  ;;  %v4739_v39 = vld [vmem:[%s5778_s0 + $0x78] sm:$0x22] }
  0xfb   :  { %1001 = vmatmul.bf16.vlgmr.msrb.gmra.mxu1 %v987_v62  ;;  %v4608_v62 = vld [vmem:[%s5777_s1 + $0x10] sm:$0xff]  ;;  %v1180_v57 = vunpack.c.h.b16 %v4566_v21  ;;  %v1232_v58 = vsel %vm135_vm1, %v1231_v51, %v1230_v33  ;;  %v4660_v46 = vunpack.i.l.s16 %v1178_v54  ;;  %v1084_v4 = vpack.c.b16 %v1082_v55, %v1082_v55  ;;  %v4673_v21 = vld [vmem:[%s5778_s0 + $0x8] sm:$0x22] }
  0xfc   :  { %1249 = vmatpush.bf16.msra.mxu1 %v4527_v15  ;;  %v1243_v5 = vpack.c.b16 %v1228_v63, %v1228_v63  ;;  %v1235_v35 = vrot.slane %v4650_v43, 4  ;;  %v1182_v31 = vunpack.c.h.b16 %v4581_v61  ;;  %v1234_v19 = vsel %vm138_vm2, %v1233_v56, %v1232_v58  ;;  %v3761_v63 = vld [vmem:[%s5780_s3 + $0x28] sm:$0xff] }
  0xfd   :  { %1605 = vmatpush.bf16.msra.mxu2 %v4592_v42  ;;  %v1237_v61 = vrot.slane %v4660_v46, 3  ;;  %v1325_v52 = vrot.slane %v4621_v40, 1  ;;  %v1423_v9 = vunpack.c.l.b16 %v4673_v21  ;;  %v1425_v60 = vunpack.c.l.b16 %v4678_v59  ;;  %535 = vmatpush.bf16.msra.mxu0 %v3761_v63 }
  0xfe   :  { %v1236_v11 = vsel %vm141_vm3, %v1235_v35, %v1234_v19  ;;  %v4691_v50 = vunpack.i.l.s16 %v1182_v31  ;;  %v1429_v28 = vunpack.c.l.b16 %v4687_v12  ;;  %v1431_v29 = vunpack.c.l.b16 %v4707_v24 }
  0xff   :  { %v1238_v16 = vsel %vm144_vm4, %v1237_v61, %v1236_v11  ;;  %v1327_v14 = vrot.slane %v4617_v32, 7  ;;  %v1427_v34 = vunpack.c.l.b16 %v4702_v17  ;;  %v1326_v30 = vsel %vm132_vm0, %v4602_v23, %v1325_v52 }
 0x100   :  { %1250 = vmatpush.bf16.msra.mxu1 %v4505_v10  ;;  %v3259_v25 = vunpack.i.l.s16 %v1423_v9  ;;  %v1329_v23 = vrot.slane %v4635_v45, 6  ;;  %v3267_v40 = vunpack.i.l.s16 %v1431_v29  ;;  %v1331_v49 = vrot.slane %v4650_v43, 5 }
 0x101   :  { %1606 = vmatpush.bf16.msra.mxu2 %v4608_v62  ;;  %v1328_v18 = vsel %vm135_vm1, %v1327_v14, %v1326_v30  ;;  %v3263_v41 = vunpack.i.l.s16 %v1427_v34  ;;  %v1424_v54 = vunpack.c.h.b16 %v4673_v21  ;;  %v1437_v33 = vunpack.c.l.b16 %v4739_v39 }
 0x102   :  { %v1471_v38 = vrot.slane %v3259_v25, 2  ;;  %v1477_v45 = vrot.slane %v3267_v40, 6  ;;  %v1426_v43 = vunpack.c.h.b16 %v4678_v59  ;;  %v1567_v21 = vrot.slane %v3259_v25, 3 }
 0x103   :  { %v4761_v59 = vunpack.i.l.s16 %v1424_v54  ;;  %v3273_v11 = vunpack.i.l.s16 %v1437_v33  ;;  %v1570_v52 = vrot.slane %v3263_v41, 1  ;;  %v1573_v14 = vrot.slane %v3267_v40, 7 }
 0x104   :  { %1251 = vmatpush.bf16.msra.mxu1 %v4547_v3  ;;  %v4764_v9 = vunpack.i.l.s16 %v1426_v43  ;;  %v1428_v34 = vunpack.c.h.b16 %v4702_v17 }
 0x105   :  { %3187 = vmatmul.msk.bf16.vlgmr.msrb.gmra.mxu3 %vm223_vm7, %v988_v6  ;;  %1607 = vmatpush.bf16.msra.mxu2 %v4629_v7  ;;  %v4667_v6 = vunpack.i.l.s16 %v1180_v57  ;;  %v1483_v25 = vrot.slane %v3273_v11, 3 }
 0x106   :  { %1269 = vmatpush.bf16.msrb.mxu3 %v4089_v20  ;;  %v1320_v20 = vsel %vm144_vm4, %v1319_v26, %v1318_v22  ;;  %v1433_v26 = vunpack.c.l.b16 %v4716_v0  ;;  %v3261_v22 = vunpack.i.l.s16 %v1425_v60  ;;  %v1486_v40 = vrot.slane %v4764_v9, 1 }
 0x107   :  { %v1322_v44 = vsel %vm147_vm5, %v1321_v13, %v1320_v20  ;;  %v1239_v27 = vrot.slane %v4667_v6, 2  ;;  %v1241_v13 = vrot.slane %v4691_v50, 1  ;;  %v1435_v20 = vunpack.c.l.b16 %v4727_v36 }
 0x108   :  { %1252 = vmatpush.bf16.msra.mxu1 %v4572_v8  ;;  %v1324_v47 = vsel %vm150_vm6, %v1323_v2, %v1322_v44  ;;  %v3265_v2 = vunpack.i.l.s16 %v1429_v28  ;;  %v3269_v44 = vunpack.i.l.s16 %v1433_v26  ;;  %v1568_v61 = vrot.slane %v3261_v22, 2 }
 0x109   :  { %v1339_v53 = vpack.c.b16 %v1324_v47, %v1324_v47  ;;  %1608 = vmatpush.bf16.msra.mxu2 %v4647_v37  ;;  %v1240_v32 = vsel %vm147_vm5, %v1239_v27, %v1238_v16  ;;  %v1472_v47 = vrot.slane %v3261_v22, 1  ;;  %v3271_v56 = vunpack.i.l.s16 %v1435_v20 }
 0x10a   :  { %v1242_v48 = vsel %vm150_vm6, %v1241_v13, %v1240_v32  ;;  %v1475_v51 = vrot.slane %v3265_v2, 7  ;;  %v1479_v35 = vrot.slane %v3269_v44, 5  ;;  %v1569_v28 = vsel %vm132_vm0, %v1568_v61, %v1567_v21 }
 0x10b   :  { %1353 = vmatmul.bf16.vlgmr.msrb.gmra.mxu2 %v1339_v53  ;;  %v1330_v53 = vsel %vm138_vm2, %v1329_v23, %v1328_v18  ;;  %v1473_v55 = vsel %vm132_vm0, %v1472_v47, %v1471_v38  ;;  %v1244_v58 = vpack.c.b16 %v1242_v48, %v1242_v48  ;;  %v1481_v60 = vrot.slane %v3271_v56, 4 }
 0x10c   :  { %1253 = vmatpush.bf16.msra.mxu1 %v4592_v42  ;;  %v1474_v57 = vsel %vm135_vm1, %v3263_v41, %v1473_v55  ;;  %v1332_v31 = vsel %vm141_vm3, %v1331_v49, %v1330_v53  ;;  %v1571_v16 = vsel %vm135_vm1, %v1570_v52, %v1569_v28  ;;  %v1575_v26 = vrot.slane %v3269_v44, 6 }
 0x10d   :  { %1857 = vmatpush.bf16.msrb.mxu2 %v4527_v15  ;;  %v1572_v30 = vsel %vm138_vm2, %v3265_v2, %v1571_v16  ;;  %v1485_v22 = vrot.slane %v4761_v59, 2  ;;  %v1577_v32 = vrot.slane %v3271_v56, 5  ;;  %v1432_v2 = vunpack.c.h.b16 %v4707_v24 }
 0x10e   :  { %v1574_v13 = vsel %vm141_vm3, %v1573_v14, %v1572_v30  ;;  %v1337_v20 = vrot.slane %v4691_v50, 2  ;;  %v4791_v47 = vunpack.i.l.s16 %v1428_v34  ;;  %v1434_v24 = vunpack.c.h.b16 %v4716_v0  ;;  %v3760_v50 = vld [vmem:[%s5780_s3 + $0x20] sm:$0xff]  ;;  %v4868_v30 = vld [vmem:[%s5778_s0 + $0x48] sm:$0x44] }
 0x10f   :  { %v1576_v17 = vsel %vm144_vm4, %v1575_v26, %v1574_v13  ;;  %536 = vmatpush.bf16.msra.mxu0 %v3760_v50  ;;  %v1436_v0 = vunpack.c.h.b16 %v4727_v36  ;;  %v1581_v21 = vrot.slane %v4761_v59, 3  ;;  %v1582_v61 = vrot.slane %v4764_v9, 2  ;;  %v4873_v26 = vld [vmem:[%s5778_s0 + $0x68] sm:$0x44] }
 0x110   :  { %1254 = vmatpush.bf16.msra.mxu1 %v4608_v62  ;;  %v1578_v18 = vsel %vm147_vm5, %v1577_v32, %v1576_v17  ;;  %v4808_v63 = vunpack.i.l.s16 %v1434_v24  ;;  %v4882_v32 = vld [vmem:[%s5778_s0 + $0x78] sm:$0x44] }
 0x111   :  { %1858 = vmatpush.bf16.msrb.mxu2 %v4505_v10  ;;  %v4818_v36 = vunpack.i.l.s16 %v1436_v0  ;;  %v1583_v13 = vsel %vm132_vm0, %v1582_v61, %v1581_v21 }
 0x113   :  { %v1495_v59 = vrot.slane %v4818_v36, 4 }
 0x114   :  { %1255 = vmatpush.bf16.msra.mxu1 %v4629_v7 }
 0x115   :  { %3201 = vmatmul.msk.bf16.vlgmr.msra.gmra.mxu3 %vm223_vm7, %v1084_v4  ;;  %1859 = vmatpush.bf16.msrb.mxu2 %v4547_v3  ;;  %v1333_v4 = vrot.slane %v4660_v46, 4  ;;  %v1335_v46 = vrot.slane %v4667_v6, 3  ;;  %v1430_v6 = vunpack.c.h.b16 %v4687_v12  ;;  %v1579_v12 = vrot.slane %v3273_v11, 4  ;;  %v4844_v11 = vld [vmem:[%s5778_s0 + $0x38] sm:$0x44] }
 0x116   :  { %1365 = vmatpush.bf16.msra.mxu3 %v4696_v1 }
 0x117   :  { %v1334_v27 = vsel %vm144_vm4, %v1333_v4, %v1332_v31  ;;  %v4785_v41 = vunpack.i.l.s16 %v1430_v6  ;;  %v1580_v44 = vsel %vm150_vm6, %v1579_v12, %v1578_v18  ;;  %v4835_v31 = vld [vmem:[%s5778_s0 + $0x28] sm:$0x44]  ;;  %v1584_v6 = vrot.slane %v4791_v47, 1 }
 0x118   :  { %1256 = vmatpush.bf16.msra.mxu1 %v4647_v37  ;;  %v1336_v38 = vsel %vm147_vm5, %v1335_v46, %v1334_v27  ;;  %v1595_v49 = vpack.c.b16 %v1580_v44, %v1580_v44  ;;  %v1683_v28 = vunpack.c.l.b16 %v4835_v31  ;;  %v1685_v27 = vunpack.c.l.b16 %v4844_v11 }
 0x119   :  { %1860 = vmatpush.bf16.msrb.mxu2 %v4572_v8  ;;  %v1338_v53 = vsel %vm150_vm6, %v1337_v20, %v1336_v38  ;;  %v1489_v33 = vrot.slane %v4785_v41, 7  ;;  %v1687_v44 = vunpack.c.l.b16 %v4868_v30  ;;  %v1585_v38 = vsel %vm135_vm1, %v1584_v6, %v1583_v13 }
 0x11a   :  { %v1340_v43 = vpack.c.b16 %v1338_v53, %v1338_v53  ;;  %v4892_v18 = vunpack.i.l.s16 %v1685_v27 }
 0x11b   :  { %1257 = vmatmul.bf16.vlgmr.msra.gmra.mxu1 %v1243_v5  ;;  %v1476_v5 = vsel %vm138_vm2, %v1475_v51, %v1474_v57  ;;  %v1487_v51 = vsel %vm132_vm0, %v1486_v40, %v1485_v22  ;;  %1609 = vmatmul.bf16.vlgmr.msra.gmra.mxu2 %v1595_v49  ;;  %v3763_v57 = vld [vmem:[%s5780_s3 + $0x38] sm:$0xff]  ;;  %v1693_v49 = vunpack.c.l.b16 %v4882_v32 }
 0x11c   :  { %1505 = vmatpush.bf16.msrb.mxu1 %v4527_v15  ;;  %v1478_v19 = vsel %vm141_vm3, %v1477_v45, %v1476_v5  ;;  %v4799_v45 = vunpack.i.l.s16 %v1432_v2  ;;  %v1488_v55 = vsel %vm135_vm1, %v4791_v47, %v1487_v51  ;;  %631 = vmatpush.bf16.msrb.mxu0 %v3763_v57  ;;  %v4823_v5 = vld [vmem:[%s5778_s0 + $0x8] sm:$0x44]  ;;  %v4890_v2 = vunpack.i.l.s16 %v1683_v28  ;;  %v3762_v47 = vld [vmem:[%s5780_s3 + $0x30] sm:$0xff] }
 0x11d   :  { %1861 = vmatpush.bf16.msrb.mxu2 %v4592_v42  ;;  %v1480_v29 = vsel %vm144_vm4, %v1479_v35, %v1478_v19  ;;  %v1490_v4 = vsel %vm138_vm2, %v1489_v33, %v1488_v55  ;;  %v4828_v35 = vld [vmem:[%s5778_s0 + $0x18] sm:$0x44]  ;;  %v1679_v52 = vunpack.c.l.b16 %v4823_v5  ;;  %v1732_v55 = vrot.slane %v4892_v18, 1 }
 0x11e   :  { %v1482_v23 = vsel %vm147_vm5, %v1481_v60, %v1480_v29  ;;  %v1491_v56 = vrot.slane %v4799_v45, 6  ;;  %v1681_v60 = vunpack.c.l.b16 %v4828_v35  ;;  %v4860_v29 = vld [vmem:[%s5778_s0 + $0x58] sm:$0x44]  ;;  %v1682_v51 = vunpack.c.h.b16 %v4828_v35 }
 0x11f   :  { %v1484_v48 = vsel %vm150_vm6, %v1483_v25, %v1482_v23  ;;  %v1689_v25 = vunpack.c.l.b16 %v4860_v29  ;;  %v1691_v23 = vunpack.c.l.b16 %v4873_v26  ;;  %v4885_v40 = vunpack.i.l.s16 %v1679_v52 }
 0x120   :  { %1506 = vmatpush.bf16.msrb.mxu1 %v4505_v10  ;;  %v1499_v54 = vpack.c.b16 %v1484_v48, %v1484_v48  ;;  %v1492_v19 = vsel %vm141_vm3, %v1491_v56, %v1490_v4  ;;  %v4888_v12 = vunpack.i.l.s16 %v1681_v60  ;;  %v1680_v48 = vunpack.c.h.b16 %v4823_v5  ;;  %632 = vmatpush.bf16.msrb.mxu0 %v3762_v47 }
 0x121   :  { %1862 = vmatpush.bf16.msrb.mxu2 %v4608_v62  ;;  %v4904_v24 = vunpack.i.l.s16 %v1689_v25  ;;  %v4907_v50 = vunpack.i.l.s16 %v1691_v23  ;;  %v1727_v53 = vrot.slane %v4885_v40, 4  ;;  %v1730_v0 = vrot.slane %v4890_v2, 2 }
 0x122   :  { %v1728_v33 = vrot.slane %v4888_v12, 3  ;;  %v1587_v56 = vrot.slane %v4799_v45, 7  ;;  %v3311_v4 = vunpack.i.l.s16 %v1687_v44  ;;  %v1589_v60 = vrot.slane %v4808_v63, 6 }
 0x123   :  { %v1735_v61 = vrot.slane %v4904_v24, 7  ;;  %v1824_v23 = vrot.slane %v4888_v12, 4  ;;  %v1826_v44 = vrot.slane %v4890_v2, 3  ;;  %v1690_v47 = vunpack.c.h.b16 %v4860_v29  ;;  %v4965_v29 = vld [vmem:[%s5779_s2] ss:$0 sm:$0xff] }
 0x124   :  { %1507 = vmatpush.bf16.msrb.mxu1 %v4547_v3  ;;  %v1729_v21 = vsel %vm132_vm0, %v1728_v33, %v1727_v53 }
 0x125   :  { %3231 = vmatmul.msk.bf16.vlgmr.msrb.gmra.mxu3 %vm223_vm7, %v1244_v58  ;;  %1863 = vmatpush.bf16.msrb.mxu2 %v4629_v7  ;;  %v1438_v58 = vunpack.c.h.b16 %v4739_v39  ;;  %v1493_v39 = vrot.slane %v4808_v63, 5  ;;  %v1731_v45 = vsel %vm135_vm1, %v1730_v0, %v1729_v21 }
 0x126   :  { %1525 = vmatpush.bf16.msrb.mxu3 %v4696_v1  ;;  %v1733_v28 = vsel %vm138_vm2, %v1732_v55, %v1731_v45 }
 0x127   :  { %v4847_v46 = vunpack.i.l.s16 %v1438_v58  ;;  %v1494_v34 = vsel %vm144_vm4, %v1493_v39, %v1492_v19  ;;  %v1684_v58 = vunpack.c.h.b16 %v4835_v31  ;;  %v4920_v39 = vunpack.i.l.s16 %v1680_v48 }
 0x128   :  { %1508 = vmatpush.bf16.msrb.mxu1 %v4572_v8  ;;  %v1496_v20 = vsel %vm147_vm5, %v1495_v59, %v1494_v34  ;;  %v4922_v19 = vunpack.i.l.s16 %v1693_v49  ;;  %v1737_v31 = vrot.slane %v4907_v50, 6  ;;  %v1686_v59 = vunpack.c.h.b16 %v4844_v11 }
 0x129   :  { %1864 = vmatpush.bf16.msrb.mxu2 %v4647_v37  ;;  %v1497_v17 = vrot.slane %v4847_v46, 3  ;;  %v1741_v63 = vrot.slane %v4920_v39, 4  ;;  %v1823_v11 = vrot.slane %v4885_v40, 5  ;;  %v1830_v49 = vrot.slane %v3311_v4, 1 }
 0x12a   :  { %v1739_v6 = vrot.slane %v4922_v19, 5  ;;  %v4954_v48 = vunpack.i.l.s16 %v1686_v59  ;;  %v1835_v55 = vrot.slane %v4922_v19, 6 }
 0x12b   :  { %v1825_v40 = vsel %vm132_vm0, %v1824_v23, %v1823_v11  ;;  %v3764_v11 = vld [vmem:[%s5780_s3 + $0x40] sm:$0xff]  ;;  %v5012_v23 = vld [vmem:[%s5778_s0 + $0x8] sm:$0x88] }
 0x12c   :  { %1509 = vmatpush.bf16.msrb.mxu1 %v4592_v42  ;;  %v1827_v2 = vsel %vm135_vm1, %v1826_v44, %v1825_v40 }
 0x12d   :  { %2113 = vmatpush.bf16.msra.mxu2 %v4527_v15  ;;  %v4855_v9 = vpop.f32.mrf.mxu2 }
 0x130   :  { %1510 = vmatpush.bf16.msrb.mxu1 %v4608_v62 }
 0x131   :  { %2114 = vmatpush.bf16.msra.mxu2 %v4505_v10 }
 0x134   :  { %1511 = vmatpush.bf16.msrb.mxu1 %v4629_v7 }
 0x135   :  { %3245 = vmatmul.msk.bf16.vlgmr.msra.gmra.mxu3 %vm223_vm7, %v1340_v43  ;;  %2115 = vmatpush.bf16.msra.mxu2 %v4547_v3  ;;  %v1586_v43 = vsel %vm138_vm2, %v4785_v41, %v1585_v38  ;;  %v588_v57 = vpop.f32.mrf.mxu2  ;;  %v4926_v41 = vunpack.i.l.s16 %v1682_v51  ;;  %v1828_v38 = vrot.slane %v4892_v18, 2  ;;  %v1833_v18 = vrot.slane %v4907_v50, 7 }
 0x136   :  { %1621 = vmatpush.bf16.msra.mxu3 %v4696_v1  ;;  %v1588_v27 = vsel %vm141_vm3, %v1587_v56, %v1586_v43  ;;  %v1593_v56 = vrot.slane %v4847_v46, 4  ;;  %v1688_v57 = vunpack.c.h.b16 %v4868_v30  ;;  %v1692_v30 = vunpack.c.h.b16 %v4873_v26 }
 0x137   :  { %v1742_v13 = vrot.slane %v4926_v41, 3  ;;  %v1829_v0 = vsel %vm138_vm2, %v1828_v38, %v1827_v2 }
 0x138   :  { %1512 = vmatpush.bf16.msrb.mxu1 %v4647_v37  ;;  %v351_v16 = vpop.f32.mrf.mxu1  ;;  %v379_v14 = vpop.f32.mrf.mxu3  ;;  %v1831_v50 = vsel %vm141_vm3, %v1830_v49, %v1829_v0 }
 0x139   :  { %v4876_v22 = vadd.f32 %v379_v14, %v351_v16  ;;  %2116 = vmatpush.bf16.msra.mxu2 %v4572_v8  ;;  %v1734_v16 = vsel %vm141_vm3, %v3311_v4, %v1733_v28  ;;  %v4937_v14 = vunpack.i.l.s16 %v1684_v58  ;;  %v1743_v33 = vsel %vm132_vm0, %v1742_v13, %v1741_v63 }
 0x13a   :  { %v1736_v34 = vsel %vm144_vm4, %v1735_v61, %v1734_v16  ;;  %v4983_v61 = vunpack.i.l.s16 %v1690_v47  ;;  %v1694_v16 = vunpack.c.h.b16 %v4882_v32  ;;  %v1838_v13 = vrot.slane %v4926_v41, 4 }
 0x13b   :  { %1513 = vmatmul.bf16.vlgmr.msrb.gmra.mxu1 %v1499_v54  ;;  %v1498_v54 = vsel %vm150_vm6, %v1497_v17, %v1496_v20  ;;  %v1738_v25 = vsel %vm147_vm5, %v1737_v31, %v1736_v34  ;;  %v1590_v17 = vsel %vm144_vm4, %v1589_v60, %v1588_v27  ;;  %v1591_v20 = vrot.slane %v4818_v36, 5 }
 0x13c   :  { %1761 = vmatpush.bf16.msra.mxu1 %v4527_v15  ;;  %v1500_v52 = vpack.c.b16 %v1498_v54, %v1498_v54  ;;  %v1740_v36 = vsel %vm150_vm6, %v1739_v6, %v1738_v25  ;;  %v1744_v53 = vrot.slane %v4937_v14, 2  ;;  %v4991_v31 = vunpack.i.l.s16 %v1688_v57  ;;  %v5064_v57 = vld [vmem:[%s5778_s0 + $0x78] sm:$0x88] }
 0x13d   :  { %2117 = vmatpush.bf16.msra.mxu2 %v4592_v42  ;;  %v1592_v43 = vsel %vm147_vm5, %v1591_v20, %v1590_v17  ;;  %v1755_v4 = vpack.c.b16 %v1740_v36, %v1740_v36  ;;  %v4996_v34 = vunpack.i.l.s16 %v1692_v30  ;;  %v1749_v6 = vrot.slane %v4983_v61, 7  ;;  %v5026_v17 = vld [vmem:[%s5778_s0 + $0x28] sm:$0x88] }
 0x13e   :  { %v1745_v19 = vsel %vm135_vm1, %v1744_v53, %v1743_v33  ;;  %v1594_v45 = vsel %vm150_vm6, %v1593_v56, %v1592_v43  ;;  %v1837_v25 = vrot.slane %v4920_v39, 5  ;;  %v587_v39 = vadd.f32 %v4965_v29, %v4855_v9  ;;  %v5036_v9 = vld [vmem:[%s5778_s0 + $0x38] sm:$0x88] }
 0x13f   :  { %v5021_v41 = vunpack.i.l.s16 %v1694_v16  ;;  %v1840_v20 = vrot.slane %v4937_v14, 3  ;;  %v1751_v38 = vrot.slane %v4996_v34, 6  ;;  %v1935_v47 = vunpack.c.l.b16 %v5012_v23  ;;  %v5044_v14 = vld [vmem:[%s5778_s0 + $0x48] sm:$0x88] }
 0x140   :  { %1762 = vmatpush.bf16.msra.mxu1 %v4505_v10  ;;  %v353_v5 = vpop.f32.mrf.mxu1  ;;  %v381_v35 = vpop.f32.mrf.mxu3  ;;  %v1839_v40 = vsel %vm132_vm0, %v1838_v13, %v1837_v25  ;;  %v1943_v36 = vunpack.c.l.b16 %v5044_v14  ;;  %v1936_v16 = vunpack.c.h.b16 %v5012_v23 }
 0x141   :  { %2118 = vmatpush.bf16.msra.mxu2 %v4608_v62  ;;  %v1746_v5 = vrot.slane %v4954_v48, 1  ;;  %v1832_v35 = vsel %vm144_vm4, %v4904_v24, %v1831_v50  ;;  %v3765_v24 = vld [vmem:[%s5780_s3 + $0x48] sm:$0xff]  ;;  %v1841_v43 = vsel %vm135_vm1, %v1840_v20, %v1839_v40  ;;  %v3347_v50 = vunpack.i.l.s16 %v1935_v47 }
 0x142   :  { %v1834_v21 = vsel %vm147_vm5, %v1833_v18, %v1832_v35  ;;  %v1842_v18 = vrot.slane %v4954_v48, 2  ;;  %v5069_v48 = vld [vmem:[%s5778_s0 + $0x68] sm:$0x88]  ;;  %v5104_v40 = vunpack.i.l.s16 %v1936_v16 }
 0x143   :  { %v1747_v27 = vsel %vm138_vm2, %v1746_v5, %v1745_v19  ;;  %v5074_v19 = vunpack.i.l.s16 %v1943_v36  ;;  %v1942_v36 = vunpack.c.h.b16 %v5036_v9  ;;  %v3769_v16 = vld [vmem:[%s5780_s3 + $0x68] sm:$0xff] }
 0x144   :  { %1763 = vmatpush.bf16.msra.mxu1 %v4547_v3  ;;  %v1748_v32 = vsel %vm141_vm3, %v4991_v31, %v1747_v27 }
 0x145   :  { %3275 = vmatmul.msk.bf16.vlgmr.msrb.gmra.mxu3 %vm223_vm7, %v1500_v52  ;;  %2119 = vmatpush.bf16.msra.mxu2 %v4629_v7  ;;  %v1836_v52 = vsel %vm150_vm6, %v1835_v55, %v1834_v21  ;;  %v1750_v44 = vsel %vm144_vm4, %v1749_v6, %v1748_v32  ;;  %v1844_v21 = vrot.slane %v4991_v31, 1 }
 0x146   :  { %1781 = vmatpush.bf16.msrb.mxu3 %v4696_v1  ;;  %v1851_v60 = vpack.c.b16 %v1836_v52, %v1836_v52  ;;  %v1752_v55 = vsel %vm147_vm5, %v1751_v38, %v1750_v44  ;;  %v1940_v44 = vunpack.c.h.b16 %v5026_v17 }
 0x148   :  { %1764 = vmatpush.bf16.msra.mxu1 %v4572_v8  ;;  %v490_v12 = vpop.f32.mrf.mxu1  ;;  %v503_v51 = vpop.f32.mrf.mxu3  ;;  %1865 = vmatmul.bf16.vlgmr.msrb.gmra.mxu2 %v1851_v60  ;;  %v1983_v60 = vrot.slane %v3347_v50, 6 }
 0x149   :  { %v491_v54 = vadd.f32 %v4965_v29, %v490_v12  ;;  %2120 = vmatpush.bf16.msra.mxu2 %v4647_v37  ;;  %v1941_v12 = vunpack.c.l.b16 %v5036_v9 }
 0x14b   :  { %v504_v58 = vadd.f32 %v503_v51, %v491_v54  ;;  %v5052_v51 = vld [vmem:[%s5778_s0 + $0x58] sm:$0x88]  ;;  %v1753_v54 = vrot.slane %v5021_v41, 5  ;;  %v5072_v35 = vunpack.i.l.s16 %v1941_v12 }
 0x14c   :  { %1765 = vmatpush.bf16.msra.mxu1 %v4592_v42  ;;  %v1945_v33 = vunpack.c.l.b16 %v5052_v51 }
 0x14d   :  { %v507_v46 = vmax.f32 %v504_v58, 0.0  ;;  %v5000_v63 = vpop.f32.mrf.mxu2  ;;  %v1949_v58 = vunpack.c.l.b16 %v5064_v57 }
 0x14e   :  { %v5078_v30 = vunpack.i.l.s16 %v1945_v33 }
 0x14f   :  { %v508_v28 = vpack.c.bf16 %v507_v46, %v507_v46  ;;  %v1754_v46 = vsel %vm150_vm6, %v1753_v54, %v1752_v55  ;;  %v5086_v27 = vunpack.i.l.s16 %v1949_v58  ;;  %v2079_v54 = vrot.slane %v3347_v50, 7 }
 0x150   :  { %1766 = vmatpush.bf16.msra.mxu1 %v4608_v62  ;;  %v492_v26 = vpop.f32.mrf.mxu1  ;;  %v505_v59 = vpop.f32.mrf.mxu3  ;;  %v1992_v32 = vrot.slane %v5078_v30, 1 }
 0x151   :  { %3112 = vmatmul.msk.bf16.vlgmr.msra.gmra.mxu0 %vm338_vm8, %v508_v28  ;;  %v3767_v28 = vld [vmem:[%s5780_s3 + $0x58] sm:$0xff]  ;;  %v1988_v59 = vrot.slane %v5072_v35, 3  ;;  %v1995_v47 = vrot.slane %v5086_v27, 7 }
 0x152   :  { %791 = vmatpush.bf16.msra.mxu0 %v3765_v24  ;;  %v1947_v24 = vunpack.c.l.b16 %v5069_v48 }
 0x154   :  { %1767 = vmatpush.bf16.msra.mxu1 %v4629_v7  ;;  %v3359_v20 = vunpack.i.l.s16 %v1947_v24 }
 0x155   :  { %v844_v56 = vpop.f32.mrf.mxu2 }
 0x156   :  { %792 = vmatpush.bf16.msra.mxu0 %v3764_v11  ;;  %v1756_v11 = vpack.c.b16 %v1754_v46, %v1754_v46  ;;  %v1849_v46 = vrot.slane %v5021_v41, 6 }
 0x158   :  { %1768 = vmatpush.bf16.msra.mxu1 %v4647_v37  ;;  %v599_v53 = vpop.f32.mrf.mxu3  ;;  %v746_v2 = vpop.f32.mrf.mxu1 }
 0x159   :  { %v600_v0 = vadd.f32 %v599_v53, %v587_v39 }
 0x15b   :  { %1769 = vmatmul.bf16.vlgmr.msra.gmra.mxu1 %v1755_v4 }
 0x15c   :  { %2017 = vmatpush.bf16.msrb.mxu1 %v4527_v15  ;;  %v1596_v15 = vpack.c.b16 %v1594_v45, %v1594_v45  ;;  %v1843_v45 = vsel %vm138_vm2, %v1842_v18, %v1841_v43  ;;  %v2086_v43 = vrot.slane %v5074_v19, 3 }
 0x15d   :  { %v1845_v39 = vsel %vm141_vm3, %v1844_v21, %v1843_v45 }
 0x15e   :  { %3289 = vmatmul.msk.bf16.vlgmr.msra.gmra.mxu3 %vm223_vm7, %v1596_v15  ;;  %v1846_v12 = vsel %vm144_vm4, %v4983_v61, %v1845_v39 }
 0x15f   :  { %1877 = vmatpush.bf16.msra.mxu3 %v4696_v1 }
 0x160   :  { %2018 = vmatpush.bf16.msrb.mxu1 %v4505_v10  ;;  %v5017_v10 = vld [vmem:[%s5778_s0 + $0x18] sm:$0x88]  ;;  %v601_v6 = vpop.f32.mrf.mxu3  ;;  %v748_v25 = vpop.f32.mrf.mxu1 }
 0x161   :  { %v1937_v49 = vunpack.c.l.b16 %v5017_v10  ;;  %v1938_v15 = vunpack.c.h.b16 %v5017_v10  ;;  %v3766_v10 = vld [vmem:[%s5780_s3 + $0x50] sm:$0xff] }
 0x163   :  { %v3349_v4 = vunpack.i.l.s16 %v1937_v49  ;;  %v5106_v49 = vunpack.i.l.s16 %v1938_v15 }
 0x164   :  { %2019 = vmatpush.bf16.msrb.mxu1 %v4547_v3  ;;  %v1939_v3 = vunpack.c.l.b16 %v5026_v17  ;;  %v747_v17 = vadd.f32 %v4965_v29, %v746_v2  ;;  %v1997_v2 = vrot.slane %v5104_v40, 6 }
 0x165   :  { %v1984_v26 = vrot.slane %v3349_v4, 5  ;;  %v2080_v33 = vrot.slane %v3349_v4, 6  ;;  %v1998_v55 = vrot.slane %v5106_v49, 5  ;;  %v2088_v4 = vrot.slane %v5078_v30, 2 }
 0x166   :  { %v3351_v5 = vunpack.i.l.s16 %v1939_v3  ;;  %v1847_v3 = vrot.slane %v4996_v34, 7  ;;  %v5119_v34 = vunpack.i.l.s16 %v1940_v44  ;;  %v843_v44 = vadd.f32 %v4965_v29, %v5000_v63 }
 0x167   :  { %v1985_v13 = vsel %vm132_vm0, %v1984_v26, %v1983_v60 }
 0x168   :  { %2020 = vmatpush.bf16.msrb.mxu1 %v4572_v8  ;;  %v603_v8 = vmax.f32 %v600_v0, 0.0  ;;  %v1986_v31 = vrot.slane %v3351_v5, 4  ;;  %v2082_v9 = vrot.slane %v3351_v5, 5  ;;  %v2084_v0 = vrot.slane %v5072_v35, 4  ;;  %v759_v56 = vpop.f32.mrf.mxu3 }
 0x169   :  { %v760_v21 = vadd.f32 %v759_v56, %v747_v17  ;;  %v1944_v5 = vunpack.c.h.b16 %v5044_v14  ;;  %v1848_v24 = vsel %vm147_vm5, %v1847_v3, %v1846_v12  ;;  %v2000_v60 = vrot.slane %v5119_v34, 4  ;;  %v3770_v56 = vld [vmem:[%s5780_s3 + $0x70] sm:$0xff] }
 0x16a   :  { %v604_v52 = vpack.c.bf16 %v603_v8, %v603_v8  ;;  %v1987_v23 = vsel %vm135_vm1, %v1986_v31, %v1985_v13  ;;  %v2090_v8 = vrot.slane %v3359_v20, 1  ;;  %v2093_v12 = vrot.slane %v5104_v40, 7 }
 0x16b   :  { %v1989_v38 = vsel %vm138_vm2, %v1988_v59, %v1987_v23  ;;  %v763_v45 = vmax.f32 %v760_v21, 0.0  ;;  %v3356_v41 = vunpack.i.l.s16 %v1944_v5  ;;  %v1850_v59 = vsel %vm150_vm6, %v1849_v46, %v1848_v24  ;;  %v3773_v24 = vld [vmem:[%s5780_s3 + $0x88] sm:$0xff] }
 0x16c   :  { %2021 = vmatpush.bf16.msrb.mxu1 %v4592_v42  ;;  %v1990_v42 = vrot.slane %v5074_v19, 2  ;;  %3126 = vmatmul.msk.bf16.vlgmr.msrb.gmra.mxu0 %vm338_vm8, %v604_v52  ;;  %v5133_v52 = vunpack.i.l.s16 %v1942_v36  ;;  %v1948_v23 = vunpack.c.h.b16 %v5069_v48  ;;  %v2094_v36 = vrot.slane %v5106_v49, 6  ;;  %v3771_v49 = vld [vmem:[%s5780_s3 + $0x78] sm:$0xff] }
 0x16d   :  { %887 = vmatpush.bf16.msrb.mxu0 %v3767_v28  ;;  %v1946_v28 = vunpack.c.h.b16 %v5052_v51  ;;  %v764_v26 = vpack.c.bf16 %v763_v45, %v763_v45 }
 0x16e   :  { %3319 = vmatmul.msk.bf16.vlgmr.msrb.gmra.mxu3 %vm223_vm7, %v1756_v11  ;;  %v2002_v15 = vrot.slane %v5133_v52, 3  ;;  %v1950_v11 = vunpack.c.h.b16 %v5064_v57  ;;  %v3360_v57 = vunpack.i.l.s16 %v1948_v23 }
 0x16f   :  { %2037 = vmatpush.bf16.msrb.mxu3 %v4696_v1  ;;  %v3358_v25 = vunpack.i.l.s16 %v1946_v28  ;;  %v5150_v13 = vpop.f32.mrf.mxu2 }
 0x170   :  { %2022 = vmatpush.bf16.msrb.mxu1 %v4608_v62  ;;  %v1991_v62 = vsel %vm141_vm3, %v1990_v42, %v1989_v38  ;;  %v761_v6 = vpop.f32.mrf.mxu3 }
 0x171   :  { %v1993_v53 = vsel %vm144_vm4, %v1992_v32, %v1991_v62  ;;  %888 = vmatpush.bf16.msrb.mxu0 %v3766_v10  ;;  %v1852_v32 = vpack.c.b16 %v1850_v59, %v1850_v59  ;;  %v2006_v10 = vrot.slane %v3358_v25, 1  ;;  %v3362_v62 = vunpack.i.l.s16 %v1950_v11 }
 0x172   :  { %v1994_v18 = vsel %vm147_vm5, %v3359_v20, %v1993_v53  ;;  %v3768_v20 = vld [vmem:[%s5780_s3 + $0x60] sm:$0xff] }
 0x173   :  { %v1996_v61 = vsel %vm150_vm6, %v1995_v47, %v1994_v18  ;;  %v2009_v63 = vrot.slane %v3362_v62, 7 }
 0x174   :  { %2023 = vmatpush.bf16.msrb.mxu1 %v4629_v7  ;;  %v2081_v7 = vsel %vm132_vm0, %v2080_v33, %v2079_v54  ;;  %v2011_v50 = vpack.c.b16 %v1996_v61, %v1996_v61  ;;  %v2096_v54 = vrot.slane %v5119_v34, 5  ;;  %v2095_v61 = vsel %vm132_vm0, %v2094_v36, %v2093_v12 }
 0x175   :  { %v2083_v58 = vsel %vm135_vm1, %v2082_v9, %v2081_v7  ;;  %v2100_v34 = vrot.slane %v3356_v41, 3 }
 0x176   :  { %v2085_v35 = vsel %vm138_vm2, %v2084_v0, %v2083_v58  ;;  %v2098_v0 = vrot.slane %v5133_v52, 4 }
 0x177   :  { %v2087_v19 = vsel %vm141_vm3, %v2086_v43, %v2085_v35  ;;  %v1100_v53 = vpop.f32.mrf.mxu2 }
 0x178   :  { %2024 = vmatpush.bf16.msrb.mxu1 %v4647_v37  ;;  %v2089_v30 = vsel %vm144_vm4, %v2088_v4, %v2087_v19  ;;  %v1999_v37 = vsel %vm132_vm0, %v1998_v55, %v1997_v2  ;;  %v1002_v38 = vpop.f32.mrf.mxu1  ;;  %v855_v3 = vpop.f32.mrf.mxu3  ;;  %v2097_v2 = vsel %vm135_vm1, %v2096_v54, %v2095_v61  ;;  %v3779_v53 = vld [vmem:[%s5780_s3 + $0xb8] sm:$0xff] }
 0x179   :  { %v2091_v14 = vsel %vm147_vm5, %v2090_v8, %v2089_v30  ;;  %v2001_v51 = vsel %vm135_vm1, %v2000_v60, %v1999_v37  ;;  %v856_v17 = vadd.f32 %v855_v3, %v843_v44  ;;  %v2099_v43 = vsel %vm138_vm2, %v2098_v0, %v2097_v2 }
 0x17a   :  { %v2092_v31 = vsel %vm150_vm6, %v5086_v27, %v2091_v14  ;;  %v2004_v27 = vrot.slane %v3356_v41, 2  ;;  %v2003_v39 = vsel %vm138_vm2, %v2002_v15, %v2001_v51  ;;  %v1003_v58 = vadd.f32 %v4965_v29, %v1002_v38  ;;  %v3772_v14 = vld [vmem:[%s5780_s3 + $0x80] sm:$0xff]  ;;  %v3775_v51 = vld [vmem:[%s5780_s3 + $0x98] sm:$0xff] }
 0x17b   :  { %2025 = vmatmul.bf16.vlgmr.msrb.gmra.mxu1 %v2011_v50  ;;  %v2107_v42 = vpack.c.b16 %v2092_v31, %v2092_v31  ;;  %v859_v18 = vmax.f32 %v856_v17, 0.0  ;;  %v2102_v50 = vrot.slane %v3358_v25, 2  ;;  %v2101_v4 = vsel %vm141_vm3, %v2100_v34, %v2099_v43  ;;  %v3774_v25 = vld [vmem:[%s5780_s3 + $0x90] sm:$0xff]  ;;  %v3776_v38 = vld [vmem:[%s5780_s3 + $0xa0] sm:$0xff] }
 0x17c   :  { %3156 = vmatmul.msk.bf16.vlgmr.msra.gmra.mxu0 %vm338_vm8, %v764_v26  ;;  %v2005_v47 = vsel %vm141_vm3, %v2004_v27, %v2003_v39  ;;  %v2104_v8 = vrot.slane %v3360_v57, 1  ;;  %v1099_v26 = vadd.f32 %v4965_v29, %v5150_v13 }
 0x17d   :  { %2121 = vmatmul.bf16.vlgmr.msra.gmra.mxu2 %v2107_v42  ;;  %1047 = vmatpush.bf16.msra.mxu0 %v3769_v16  ;;  %v2007_v48 = vsel %vm144_vm4, %v2006_v10, %v2005_v47  ;;  %v2103_v5 = vsel %vm144_vm4, %v2102_v50, %v2101_v4 }
 0x17e   :  { %3333 = vmatmul.msk.bf16.vlgmr.msra.gmra.mxu3 %vm223_vm7, %v1852_v32  ;;  %v2008_v33 = vsel %vm147_vm5, %v3360_v57, %v2007_v48  ;;  %v2105_v52 = vsel %vm147_vm5, %v2104_v8, %v2103_v5  ;;  %v3783_v5 = vld [vmem:[%s5780_s3 + $0xd8] sm:$0xff] }
 0x17f   :  { %2133 = vmatpush.bf16.msra.mxu3 %v4696_v1  ;;  %v860_v1 = vpack.c.bf16 %v859_v18, %v859_v18  ;;  %v2010_v40 = vsel %vm150_vm6, %v2009_v63, %v2008_v33  ;;  %v2106_v45 = vsel %vm150_vm6, %v3362_v62, %v2105_v52  ;;  %v3778_v63 = vld [vmem:[%s5780_s3 + $0xb0] sm:$0xff] }
 0x180   :  { %v1004_v9 = vpop.f32.mrf.mxu1  ;;  %v857_v55 = vpop.f32.mrf.mxu3  ;;  %v2012_v7 = vpack.c.b16 %v2010_v40, %v2010_v40  ;;  %v2108_v28 = vpack.c.b16 %v2106_v45, %v2106_v45  ;;  %v3781_v40 = vld [vmem:[%s5780_s3 + $0xc8] sm:$0xff]  ;;  %v3782_v52 = vld [vmem:[%s5780_s3 + $0xd0] sm:$0xff] }
 0x181   :  { %1048 = vmatpush.bf16.msra.mxu0 %v3768_v20  ;;  %v3777_v20 = vld [vmem:[%s5780_s3 + $0xa8] sm:$0xff]  ;;  %v3780_v55 = vld [vmem:[%s5780_s3 + $0xc0] sm:$0xff] }
 0x188   :  { %v1015_v21 = vpop.f32.mrf.mxu3 }
 0x189   :  { %v1016_v35 = vadd.f32 %v1015_v21, %v1003_v58 }
 0x18b   :  { %v1019_v46 = vmax.f32 %v1016_v35, 0.0 }
 0x18c   :  { %3170 = vmatmul.msk.bf16.vlgmr.msrb.gmra.mxu0 %vm338_vm8, %v860_v1 }
 0x18d   :  { %1143 = vmatpush.bf16.msrb.mxu0 %v3771_v49  ;;  %v1020_v19 = vpack.c.bf16 %v1019_v46, %v1019_v46 }
 0x18e   :  { %3363 = vmatmul.msk.bf16.vlgmr.msrb.gmra.mxu3 %vm223_vm7, %v2012_v7  ;;  %v1354_v30 = vpop.f32.mrf.mxu2 }
 0x18f   :  { %v1355_v47 = vadd.f32 %v4965_v29, %v1354_v30 }
 0x190   :  { %v1017_v60 = vpop.f32.mrf.mxu3 }
 0x191   :  { %1144 = vmatpush.bf16.msrb.mxu0 %v3770_v56 }
 0x196   :  { %v1356_v31 = vpop.f32.mrf.mxu2 }
 0x198   :  { %v1258_v37 = vpop.f32.mrf.mxu1  ;;  %v1111_v41 = vpop.f32.mrf.mxu3 }
 0x199   :  { %v1112_v59 = vadd.f32 %v1111_v41, %v1099_v26  ;;  %v1259_v13 = vadd.f32 %v4965_v29, %v1258_v37  ;;  %v3785_v26 = vld [vmem:[%s5780_s3 + $0xe8] sm:$0xff] }
 0x19b   :  { %v1115_v15 = vmax.f32 %v1112_v59, 0.0 }
 0x19c   :  { %3200 = vmatmul.msk.bf16.vlgmr.msra.gmra.mxu0 %vm338_vm8, %v1020_v19 }
 0x19d   :  { %1303 = vmatpush.bf16.msra.mxu0 %v3773_v24  ;;  %v1116_v42 = vpack.c.bf16 %v1115_v15, %v1115_v15 }
 0x19e   :  { %3377 = vmatmul.msk.bf16.vlgmr.msra.gmra.mxu3 %vm223_vm7, %v2108_v28  ;;  %v1610_v44 = vpop.f32.mrf.mxu2 }
 0x19f   :  { %v1611_v43 = vadd.f32 %v4965_v29, %v1610_v44 }
 0x1a0   :  { %v1260_v16 = vpop.f32.mrf.mxu1  ;;  %v1113_v6 = vpop.f32.mrf.mxu3 }
 0x1a1   :  { %1304 = vmatpush.bf16.msra.mxu0 %v3772_v14  ;;  %v3784_v16 = vld [vmem:[%s5780_s3 + $0xe0] sm:$0xff] }
 0x1a6   :  { %v1612_v3 = vpop.f32.mrf.mxu2 }
 0x1a8   :  { %v1271_v32 = vpop.f32.mrf.mxu3 }
 0x1a9   :  { %v1272_v27 = vadd.f32 %v1271_v32, %v1259_v13 }
 0x1ab   :  { %v1275_v11 = vmax.f32 %v1272_v27, 0.0 }
 0x1ac   :  { %3214 = vmatmul.msk.bf16.vlgmr.msrb.gmra.mxu0 %vm338_vm8, %v1116_v42 }
 0x1ad   :  { %1399 = vmatpush.bf16.msrb.mxu0 %v3775_v51  ;;  %v1276_v39 = vpack.c.bf16 %v1275_v11, %v1275_v11 }
 0x1b0   :  { %v1273_v10 = vpop.f32.mrf.mxu3 }
 0x1b1   :  { %1400 = vmatpush.bf16.msrb.mxu0 %v3774_v25  ;;  %v3786_v10 = vld [vmem:[%s5780_s3 + $0xf0] sm:$0xff] }
 0x1b8   :  { %v1514_v23 = vpop.f32.mrf.mxu1  ;;  %v1367_v57 = vpop.f32.mrf.mxu3 }
 0x1b9   :  { %v1368_v12 = vadd.f32 %v1367_v57, %v1355_v47  ;;  %v1515_v18 = vadd.f32 %v4965_v29, %v1514_v23 }
 0x1bb   :  { %v1371_v36 = vmax.f32 %v1368_v12, 0.0 }
 0x1bc   :  { %3244 = vmatmul.msk.bf16.vlgmr.msra.gmra.mxu0 %vm338_vm8, %v1276_v39  ;;  %v3787_v39 = vld [vmem:[%s5780_s3 + $0xf8] sm:$0xff] }
 0x1bd   :  { %1559 = vmatpush.bf16.msra.mxu0 %v3777_v20  ;;  %v1372_v48 = vpack.c.bf16 %v1371_v36, %v1371_v36 }
 0x1c0   :  { %v1516_v62 = vpop.f32.mrf.mxu1  ;;  %v1369_v17 = vpop.f32.mrf.mxu3 }
 0x1c1   :  { %1560 = vmatpush.bf16.msra.mxu0 %v3776_v38 }
 0x1c8   :  { %v1527_v54 = vpop.f32.mrf.mxu3 }
 0x1c9   :  { %v1528_v33 = vadd.f32 %v1527_v54, %v1515_v18 }
 0x1cb   :  { %v1531_v61 = vmax.f32 %v1528_v33, 0.0  ;;  %v1866_v34 = vpop.f32.mrf.mxu2 }
 0x1cc   :  { %3258 = vmatmul.msk.bf16.vlgmr.msrb.gmra.mxu0 %vm338_vm8, %v1372_v48  ;;  %v1867_v42 = vadd.f32 %v4965_v29, %v1866_v34 }
 0x1cd   :  { %1655 = vmatpush.bf16.msrb.mxu0 %v3779_v53  ;;  %v1532_v9 = vpack.c.bf16 %v1531_v61, %v1531_v61 }
 0x1ce   :  { %v538_v0 = vpop.f32.mrf.mxu0 }
 0x1cf   :  { %v542_v49 = vadd.f32 %v538_v0, %v4876_v22 }
 0x1d0   :  { %v1529_v2 = vpop.f32.mrf.mxu3 }
 0x1d1   :  { %1656 = vmatpush.bf16.msrb.mxu0 %v3778_v63 }
 0x1d3   :  { %v1868_v8 = vpop.f32.mrf.mxu2 }
 0x1d4   :  { %v3792_v8 = vld [vmem:[%s5782_s5 + $0x24] sm:$0xf] }
 0x1d6   :  { %v540_v56 = vpop.f32.mrf.mxu0 }
 0x1d8   :  { %v1770_v1 = vpop.f32.mrf.mxu1 }
 0x1d9   :  { %v1771_v19 = vadd.f32 %v4965_v29, %v1770_v1 }
 0x1dc   :  { %3288 = vmatmul.msk.bf16.vlgmr.msra.gmra.mxu0 %vm338_vm8, %v1532_v9 }
 0x1dd   :  { %1815 = vmatpush.bf16.msra.mxu0 %v3781_v40 }
 0x1e0   :  { %v1772_v7 = vpop.f32.mrf.mxu1 }
 0x1e1   :  { %1816 = vmatpush.bf16.msra.mxu0 %v3780_v55  ;;  %v1623_v50 = vpop.f32.mrf.mxu3 }
 0x1e2   :  { %v1624_v58 = vadd.f32 %v1623_v50, %v1611_v43 }
 0x1e4   :  { %v1627_v4 = vmax.f32 %v1624_v58, 0.0 }
 0x1e6   :  { %v1628_v21 = vpack.c.bf16 %v1627_v4, %v1627_v4 }
 0x1e9   :  { %v634_v22 = vpop.f32.mrf.mxu0  ;;  %v1625_v46 = vpop.f32.mrf.mxu3 }
 0x1ea   :  { %v638_v35 = vadd.f32 %v634_v22, %v542_v49  ;;  %v3419_v46 = vld [vmem:[%s5782_s5 + $0x38] sm:$0xf0] }
 0x1ec   :  { %3302 = vmatmul.msk.bf16.vlgmr.msrb.gmra.mxu0 %vm338_vm8, %v1628_v21  ;;  %v3411_v21 = vld [vmem:[%s5782_s5 + $0x30] sm:$0xf0] }
 0x1ed   :  { %1911 = vmatpush.bf16.msrb.mxu0 %v3783_v5  ;;  %v3414_v22 = vor.u32 %v3792_v8, %v3411_v21  ;;  %v3823_v8 = vld [vmem:[%s5783_s7 + $0xd4] sm:$0xf0]  ;;  %v3661_v21 = vld [vmem:[%s5783_s7 + $0x1d0] sm:$0xf] }
 0x1ef   :  { %2261 = vmatpush.bf16.msrb.mxu3 %v3414_v22  ;;  %v3589_v22 = vld [vmem:[%s5783_s7 + $0x140] sm:$0xf] }
 0x1f1   :  { %v636_v45 = vpop.f32.mrf.mxu0  ;;  %1912 = vmatpush.bf16.msrb.mxu0 %v3782_v52  ;;  %v1783_v24 = vpop.f32.mrf.mxu3  ;;  %v3788_v52 = vld [vmem:[%s5782_s5 + $0x4] sm:$0xf] }
 0x1f2   :  { %v1784_v60 = vadd.f32 %v1783_v24, %v1771_v19  ;;  %v3395_v45 = vld [vmem:[%s5782_s5 + $0x10] sm:$0xf0] }
 0x1f3   :  { %v3398_v24 = vor.u32 %v3788_v52, %v3395_v45 }
 0x1f4   :  { %v1787_v28 = vmax.f32 %v1784_v60, 0.0  ;;  %v3409_v60 = vld [vmem:[%s5782_s5 + $0x20] sm:$0xf] }
 0x1f5   :  { %2262 = vmatpush.bf16.msrb.mxu3 %v3398_v24  ;;  %v3821_v24 = vld [vmem:[%s5783_s7 + $0xc4] sm:$0xf0] }
 0x1f6   :  { %v1788_v37 = vpack.c.bf16 %v1787_v28, %v1787_v28  ;;  %v3417_v28 = vld [vmem:[%s5782_s5 + $0x28] sm:$0xf] }
 0x1f8   :  { %v2026_v30 = vpop.f32.mrf.mxu1 }
 0x1f9   :  { %v794_v14 = vpop.f32.mrf.mxu0  ;;  %v1785_v31 = vpop.f32.mrf.mxu3  ;;  %v2027_v44 = vadd.f32 %v4965_v29, %v2026_v30  ;;  %v3794_v30 = vld [vmem:[%s5782_s5 + $0x2c] sm:$0xf0] }
 0x1fa   :  { %v798_v41 = vadd.f32 %v794_v14, %v638_v35  ;;  %v3793_v35 = vld [vmem:[%s5782_s5 + $0x2c] sm:$0xf]  ;;  %v3795_v14 = vld [vmem:[%s5782_s5 + $0x34] sm:$0xf0] }
 0x1fb   :  { %v3422_v19 = vor.u32 %v3793_v35, %v3419_v46  ;;  %v3789_v31 = vld [vmem:[%s5782_s5 + $0xc] sm:$0xf]  ;;  %v3855_v35 = vld [vmem:[%s5783_s7 + $0x1d4] sm:$0xf0] }
 0x1fc   :  { %3332 = vmatmul.msk.bf16.vlgmr.msra.gmra.mxu0 %vm338_vm8, %v1788_v37  ;;  %v3410_v37 = vor.u32 %v3794_v30, %v3409_v60  ;;  %v3662_v52 = vor.u32 %v3855_v35, %v3661_v21  ;;  %v3653_v60 = vld [vmem:[%s5783_s7 + $0x1c0] sm:$0xf]  ;;  %v3853_v30 = vld [vmem:[%s5783_s7 + $0x1c4] sm:$0xf0] }
 0x1fd   :  { %2071 = vmatpush.bf16.msra.mxu0 %v3785_v26  ;;  %2287 = vmatpush.bf16.msrb.mxu2 %v3422_v19  ;;  %v3418_v26 = vor.u32 %v3795_v14, %v3417_v28  ;;  %v3525_v19 = vld [vmem:[%s5783_s7 + $0xc0] sm:$0xf]  ;;  %v3803_v14 = vld [vmem:[%s5783_s7 + $0x34] sm:$0xf0] }
 0x1fe   :  { %2248 = vmatpush.bf16.msra.mxu1 %v3410_v37  ;;  %v3453_v37 = vld [vmem:[%s5783_s7 + $0x30] sm:$0xf]  ;;  %v3493_v35 = vld [vmem:[%s5783_s7 + $0x80] sm:$0xf] }
 0x200   :  { %v2028_v59 = vpop.f32.mrf.mxu1  ;;  %v2122_v15 = vpop.f32.mrf.mxu2 }
 0x201   :  { %v796_v51 = vpop.f32.mrf.mxu0  ;;  %2072 = vmatpush.bf16.msra.mxu0 %v3784_v16  ;;  %v1879_v6 = vpop.f32.mrf.mxu3  ;;  %v2123_v53 = vadd.f32 %v4965_v29, %v2122_v15  ;;  %v3403_v59 = vld [vmem:[%s5782_s5 + $0x18] sm:$0xf0]  ;;  %v3393_v15 = vld [vmem:[%s5782_s5] sm:$0xf] }
 0x202   :  { %v1880_v25 = vadd.f32 %v1879_v6, %v1867_v42  ;;  %v3406_v16 = vor.u32 %v3789_v31, %v3403_v59  ;;  %v3790_v42 = vld [vmem:[%s5782_s5 + $0xc] sm:$0xf0]  ;;  %v3401_v51 = vld [vmem:[%s5782_s5 + $0x8] sm:$0xf]  ;;  %v3835_v31 = vld [vmem:[%s5783_s7 + $0x134] sm:$0xf0]  ;;  %v3526_v59 = vor.u32 %v3821_v24, %v3525_v19 }
 0x203   :  { %v3394_v6 = vor.u32 %v3790_v42, %v3393_v15  ;;  %v3517_v15 = vld [vmem:[%s5783_s7 + $0xb0] sm:$0xf]  ;;  %v3454_v42 = vor.u32 %v3803_v14, %v3453_v37  ;;  %v3845_v19 = vld [vmem:[%s5783_s7 + $0x184] sm:$0xf0]  ;;  %v3858_v37 = vld [vmem:[%s5783_s7 + $0x1f4] sm:$0xf] }
 0x204   :  { %v1883_v13 = vmax.f32 %v1880_v25, 0.0  ;;  %v3791_v25 = vld [vmem:[%s5782_s5 + $0x14] sm:$0xf0]  ;;  %2288 = vmatpush.bf16.msrb.mxu2 %v3406_v16  ;;  %v3654_v16 = vor.u32 %v3853_v30, %v3653_v60  ;;  %v3679_v14 = vld [vmem:[%s5783_s7 + $0x1f8] sm:$0xf0] }
 0x205   :  { %2249 = vmatpush.bf16.msra.mxu1 %v3394_v6  ;;  %v3645_v6 = vld [vmem:[%s5783_s7 + $0x1b0] sm:$0xf] }
 0x206   :  { %v1884_v27 = vpack.c.bf16 %v1883_v13, %v1883_v13  ;;  %v3402_v13 = vor.u32 %v3791_v25, %v3401_v51  ;;  %v3819_v51 = vld [vmem:[%s5783_s7 + $0xb4] sm:$0xf0] }
 0x207   :  { %v3851_v25 = vld [vmem:[%s5783_s7 + $0x1b4] sm:$0xf0] }
 0x208   :  { %v2124_v32 = vpop.f32.mrf.mxu2 }
 0x209   :  { %v890_v11 = vpop.f32.mrf.mxu0  ;;  %v1881_v23 = vpop.f32.mrf.mxu3 }
 0x20a   :  { %v894_v20 = vadd.f32 %v890_v11, %v798_v41  ;;  %v3811_v11 = vld [vmem:[%s5783_s7 + $0x74] sm:$0xf0] }
 0x20b   :  { %v3843_v23 = vld [vmem:[%s5783_s7 + $0x174] sm:$0xf0] }
 0x20c   :  { %3346 = vmatmul.msk.bf16.vlgmr.msrb.gmra.mxu0 %vm338_vm8, %v1884_v27  ;;  %v3485_v27 = vld [vmem:[%s5783_s7 + $0x70] sm:$0xf] }
 0x20d   :  { %2167 = vmatpush.bf16.msrb.mxu0 %v3787_v39  ;;  %v3613_v39 = vld [vmem:[%s5783_s7 + $0x170] sm:$0xf] }
 0x211   :  { %v892_v38 = vpop.f32.mrf.mxu0  ;;  %2168 = vmatpush.bf16.msrb.mxu0 %v3786_v10  ;;  %v2039_v47 = vpop.f32.mrf.mxu3  ;;  %v3477_v10 = vld [vmem:[%s5783_s7 + $0x60] sm:$0xf] }
 0x212   :  { %v2040_v62 = vadd.f32 %v2039_v47, %v2027_v44  ;;  %v3809_v44 = vld [vmem:[%s5783_s7 + $0x64] sm:$0xf0]  ;;  %v3614_v38 = vor.u32 %v3843_v23, %v3613_v39  ;;  %v3605_v47 = vld [vmem:[%s5783_s7 + $0x160] sm:$0xf] }
 0x213   :  { %v3833_v23 = vld [vmem:[%s5783_s7 + $0x124] sm:$0xf0] }
 0x214   :  { %v2043_v57 = vmax.f32 %v2040_v62, 0.0  ;;  %v3841_v62 = vld [vmem:[%s5783_s7 + $0x164] sm:$0xf0] }
 0x216   :  { %v2044_v3 = vpack.c.bf16 %v2043_v57, %v2043_v57  ;;  %v3549_v57 = vld [vmem:[%s5783_s7 + $0xf0] sm:$0xf] }
 0x219   :  { %v1050_v12 = vpop.f32.mrf.mxu0  ;;  %v2041_v48 = vpop.f32.mrf.mxu3 }
 0x21a   :  { %v1054_v36 = vadd.f32 %v1050_v12, %v894_v20  ;;  %v3486_v20 = vor.u32 %v3811_v11, %v3485_v27  ;;  %v3827_v12 = vld [vmem:[%s5783_s7 + $0xf4] sm:$0xf0]  ;;  %v3445_v27 = vld [vmem:[%s5783_s7 + $0x20] sm:$0xf]  ;;  %v3801_v11 = vld [vmem:[%s5783_s7 + $0x24] sm:$0xf0] }
 0x21b   :  { %v3859_v48 = vld [vmem:[%s5783_s7 + $0x1f4] sm:$0xf0] }
 0x21c   :  { %3376 = vmatmul.msk.bf16.vlgmr.msra.gmra.mxu0 %vm338_vm8, %v2044_v3  ;;  %2692 = vmatpush.bf16.msrb.mxu1 %v3486_v20  ;;  %v3478_v3 = vor.u32 %v3809_v44, %v3477_v10  ;;  %v3573_v20 = vld [vmem:[%s5783_s7 + $0x120] sm:$0xf]  ;;  %v3518_v10 = vor.u32 %v3819_v51, %v3517_v15  ;;  %v3646_v44 = vor.u32 %v3851_v25, %v3645_v6  ;;  %v3840_v15 = vld [vmem:[%s5783_s7 + $0x164] sm:$0xf] }
 0x21d   :  { %2274 = vmatpush.bf16.msra.mxu0 %v3418_v26  ;;  %v3581_v26 = vld [vmem:[%s5783_s7 + $0x130] sm:$0xf] }
 0x220   :  { %2693 = vmatpush.bf16.msrb.mxu1 %v3478_v3  ;;  %v3574_v3 = vor.u32 %v3833_v23, %v3573_v20  ;;  %v3471_v20 = vld [vmem:[%s5783_s7 + $0x58] sm:$0xf0]  ;;  %v3838_v23 = vld [vmem:[%s5783_s7 + $0x154] sm:$0xf] }
 0x221   :  { %v1052_v17 = vpop.f32.mrf.mxu0  ;;  %v2135_v63 = vpop.f32.mrf.mxu3  ;;  %2275 = vmatpush.bf16.msra.mxu0 %v3402_v13 }
 0x222   :  { %v2136_v18 = vadd.f32 %v2135_v63, %v2123_v53  ;;  %v3606_v53 = vor.u32 %v3841_v62, %v3605_v47  ;;  %v3550_v17 = vor.u32 %v3827_v12, %v3549_v57  ;;  %v3637_v62 = vld [vmem:[%s5783_s7 + $0x1a0] sm:$0xf]  ;;  %v3849_v57 = vld [vmem:[%s5783_s7 + $0x1a4] sm:$0xf0]  ;;  %v3799_v12 = vld [vmem:[%s5783_s7 + $0x14] sm:$0xf0] }
 0x224   :  { %v2139_v54 = vmax.f32 %v2136_v18, 0.0  ;;  %v3469_v18 = vld [vmem:[%s5783_s7 + $0x50] sm:$0xf]  ;;  %2705 = vmatpush.bf16.msra.mxu3 %v3550_v17  ;;  %v3880_v17 = vld [vmem:[%s5781_s4] ss:$0 sm:$0xff] }
 0x226   :  { %v2140_v33 = vpack.c.bf16 %v2139_v54, %v2139_v54  ;;  %v3807_v54 = vld [vmem:[%s5783_s7 + $0x54] sm:$0xf0] }
 0x229   :  { %v1146_v61 = vpop.f32.mrf.mxu0  ;;  %v2137_v9 = vpop.f32.mrf.mxu3 }
 0x22a   :  { %v1150_v1 = vadd.f32 %v1146_v61, %v1054_v36  ;;  %v3677_v36 = vld [vmem:[%s5783_s7 + $0x1f0] sm:$0xf]  ;;  %v3839_v61 = vld [vmem:[%s5783_s7 + $0x154] sm:$0xf0]  ;;  %v3825_v9 = vld [vmem:[%s5783_s7 + $0xe4] sm:$0xf0] }
 0x22b   :  { %v3678_v63 = vor.u32 %v3859_v48, %v3677_v36  ;;  %v3565_v48 = vld [vmem:[%s5783_s7 + $0x110] sm:$0xf] }
 0x22c   :  { %3390 = vmatmul.msk.bf16.vlgmr.msrb.gmra.mxu0 %vm338_vm8, %v2140_v33  ;;  %v3597_v33 = vld [vmem:[%s5783_s7 + $0x150] sm:$0xf] }
 0x22d   :  { %2718 = vmatpush.bf16.msrb.mxu0 %v3614_v38  ;;  %2731 = vmatpush.bf16.msra.mxu2 %v3678_v63  ;;  %v3509_v38 = vld [vmem:[%s5783_s7 + $0xa0] sm:$0xf] }
 0x231   :  { %v1148_v0 = vpop.f32.mrf.mxu0  ;;  %2719 = vmatpush.bf16.msrb.mxu0 %v3606_v53  ;;  %v3831_v53 = vld [vmem:[%s5783_s7 + $0x114] sm:$0xf0] }
 0x239   :  { %v1306_v40 = vpop.f32.mrf.mxu0 }
 0x23a   :  { %v1310_v49 = vadd.f32 %v1306_v40, %v1150_v1  ;;  %v3541_v1 = vld [vmem:[%s5783_s7 + $0xe0] sm:$0xf] }
 0x23b   :  { %v3542_v0 = vor.u32 %v3825_v9, %v3541_v1  ;;  %v3669_v40 = vld [vmem:[%s5783_s7 + $0x1e0] sm:$0xf]  ;;  %v3629_v1 = vld [vmem:[%s5783_s7 + $0x190] sm:$0xf]  ;;  %v3847_v9 = vld [vmem:[%s5783_s7 + $0x194] sm:$0xf0] }
 0x23c   :  { %v3630_v21 = vor.u32 %v3847_v9, %v3629_v1  ;;  %v3802_v1 = vld [vmem:[%s5783_s7 + $0x34] sm:$0xf]  ;;  %v3455_v9 = vld [vmem:[%s5783_s7 + $0x38] sm:$0xf0] }
 0x23d   :  { %2706 = vmatpush.bf16.msra.mxu3 %v3542_v0 }
 0x241   :  { %v1308_v2 = vpop.f32.mrf.mxu0 }
 0x242   :  { %v3470_v2 = vor.u32 %v3807_v54, %v3469_v18  ;;  %v3638_v18 = vor.u32 %v3849_v57, %v3637_v62  ;;  %v3856_v62 = vld [vmem:[%s5783_s7 + $0x1e4] sm:$0xf]  ;;  %v3671_v57 = vld [vmem:[%s5783_s7 + $0x1e8] sm:$0xf0] }
 0x244   :  { %2694 = vmatpush.bf16.msrb.mxu1 %v3470_v2 }
 0x249   :  { %v1402_v55 = vpop.f32.mrf.mxu0 }
 0x24a   :  { %v1406_v34 = vadd.f32 %v1402_v55, %v1310_v49  ;;  %v3857_v49 = vld [vmem:[%s5783_s7 + $0x1e4] sm:$0xf0] }
 0x24b   :  { %v3670_v55 = vor.u32 %v3857_v49, %v3669_v40  ;;  %v3566_v40 = vor.u32 %v3831_v53, %v3565_v48  ;;  %v3429_v49 = vld [vmem:[%s5783_s7] sm:$0xf]  ;;  %v3591_v53 = vld [vmem:[%s5783_s7 + $0x148] sm:$0xf0] }
 0x24d   :  { %2732 = vmatpush.bf16.msra.mxu2 %v3670_v55  ;;  %v3797_v55 = vld [vmem:[%s5783_s7 + $0x4] sm:$0xf0] }
 0x24e   :  { %v3430_v60 = vor.u32 %v3797_v55, %v3429_v49  ;;  %v3583_v49 = vld [vmem:[%s5783_s7 + $0x138] sm:$0xf0]  ;;  %v3820_v55 = vld [vmem:[%s5783_s7 + $0xc4] sm:$0xf] }
 0x251   :  { %v1404_v7 = vpop.f32.mrf.mxu0  ;;  %2733 = vmatpush.bf16.msra.mxu2 %v3662_v52  ;;  %v3621_v52 = vld [vmem:[%s5783_s7 + $0x180] sm:$0xf] }
 0x252   :  { %v3805_v7 = vld [vmem:[%s5783_s7 + $0x44] sm:$0xf0]  ;;  %v3622_v6 = vor.u32 %v3845_v19, %v3621_v52  ;;  %v3818_v52 = vld [vmem:[%s5783_s7 + $0xb4] sm:$0xf]  ;;  %v3519_v19 = vld [vmem:[%s5783_s7 + $0xb8] sm:$0xf0] }
 0x255   :  { %2734 = vmatpush.bf16.msra.mxu2 %v3654_v16  ;;  %v3479_v16 = vld [vmem:[%s5783_s7 + $0x68] sm:$0xf0] }
 0x259   :  { %v1562_v43 = vpop.f32.mrf.mxu0  ;;  %2735 = vmatpush.bf16.msra.mxu2 %v3646_v44  ;;  %v3599_v44 = vld [vmem:[%s5783_s7 + $0x158] sm:$0xf0] }
 0x25a   :  { %v5257_v56 = vadd.f32 %v1562_v43, %v1406_v34  ;;  %v3461_v34 = vld [vmem:[%s5783_s7 + $0x40] sm:$0xf] }
 0x25b   :  { %v3462_v45 = vor.u32 %v3805_v7, %v3461_v34  ;;  %v3557_v34 = vld [vmem:[%s5783_s7 + $0x100] sm:$0xf]  ;;  %v3829_v7 = vld [vmem:[%s5783_s7 + $0x104] sm:$0xf0] }
 0x25c   :  { %v3558_v30 = vor.u32 %v3829_v7, %v3557_v34  ;;  %v3527_v34 = vld [vmem:[%s5783_s7 + $0xc8] sm:$0xf0]  ;;  %v3852_v7 = vld [vmem:[%s5783_s7 + $0x1c4] sm:$0xf] }
 0x25d   :  { %2695 = vmatpush.bf16.msrb.mxu1 %v3462_v45  ;;  %2736 = vmatpush.bf16.msra.mxu2 %v3638_v18  ;;  %v3826_v45 = vld [vmem:[%s5783_s7 + $0xf4] sm:$0xf]  ;;  %v3535_v18 = vld [vmem:[%s5783_s7 + $0xd8] sm:$0xf0] }
 0x261   :  { %v1564_v29 = vpop.f32.mrf.mxu0  ;;  %2696 = vmatpush.bf16.msrb.mxu1 %v3454_v42  ;;  %2737 = vmatpush.bf16.msra.mxu2 %v3630_v21  ;;  %v3607_v42 = vld [vmem:[%s5783_s7 + $0x168] sm:$0xf0] }
 0x262   :  { %v3598_v29 = vor.u32 %v3839_v61, %v3597_v33  ;;  %v3815_v61 = vld [vmem:[%s5783_s7 + $0x94] sm:$0xf0]  ;;  %v3447_v21 = vld [vmem:[%s5783_s7 + $0x28] sm:$0xf0] }
 0x264   :  { %2720 = vmatpush.bf16.msrb.mxu0 %v3598_v29  ;;  %v3487_v29 = vld [vmem:[%s5783_s7 + $0x78] sm:$0xf0] }
 0x265   :  { %2738 = vmatpush.bf16.msra.mxu2 %v3622_v6  ;;  %v3639_v6 = vld [vmem:[%s5783_s7 + $0x1a8] sm:$0xf0] }
 0x269   :  { %v5259_v50 = vpop.f32.mrf.mxu0 }
 0x26a   :  { %v1662_v39 = vadd.f32 %v5259_v50, %v5257_v56  ;;  %v3446_v56 = vor.u32 %v3801_v11, %v3445_v27  ;;  %v3817_v50 = vld [vmem:[%s5783_s7 + $0xa4] sm:$0xf0]  ;;  %v3610_v11 = vor.u32 %v3840_v15, %v3607_v42 }
 0x26b   :  { %v3510_v63 = vor.u32 %v3817_v50, %v3509_v38  ;;  %v3602_v38 = vor.u32 %v3838_v23, %v3599_v44  ;;  %v3814_v23 = vld [vmem:[%s5783_s7 + $0x94] sm:$0xf] }
 0x26c   :  { %2697 = vmatpush.bf16.msrb.mxu1 %v3446_v56  ;;  %v3543_v56 = vld [vmem:[%s5783_s7 + $0xe8] sm:$0xf0]  ;;  %v3846_v44 = vld [vmem:[%s5783_s7 + $0x194] sm:$0xf] }
 0x271   :  { %v1660_v58 = vpop.f32.mrf.mxu0 }
 0x272   :  { %v3533_v58 = vld [vmem:[%s5783_s7 + $0xd0] sm:$0xf] }
 0x273   :  { %v3534_v46 = vor.u32 %v3823_v8, %v3533_v58  ;;  %v3842_v58 = vld [vmem:[%s5783_s7 + $0x174] sm:$0xf] }
 0x275   :  { %2707 = vmatpush.bf16.msra.mxu3 %v3534_v46  ;;  %v3813_v46 = vld [vmem:[%s5783_s7 + $0x84] sm:$0xf0] }
 0x276   :  { %v3494_v51 = vor.u32 %v3813_v46, %v3493_v35  ;;  %v3575_v35 = vld [vmem:[%s5783_s7 + $0x128] sm:$0xf0] }
 0x279   :  { %v5261_v4 = vpop.f32.mrf.mxu0  ;;  %2708 = vmatpush.bf16.msra.mxu3 %v3526_v59  ;;  %v3808_v59 = vld [vmem:[%s5783_s7 + $0x64] sm:$0xf] }
 0x27a   :  { %v1822_v47 = vadd.f32 %v5261_v4, %v1662_v39  ;;  %v3437_v4 = vld [vmem:[%s5783_s7 + $0x10] sm:$0xf]  ;;  %v3482_v27 = vor.u32 %v3808_v59, %v3479_v16  ;;  %v3806_v39 = vld [vmem:[%s5783_s7 + $0x54] sm:$0xf]  ;;  %v3816_v59 = vld [vmem:[%s5783_s7 + $0xa4] sm:$0xf] }
 0x27b   :  { %v3438_v33 = vor.u32 %v3799_v12, %v3437_v4  ;;  %v3804_v4 = vld [vmem:[%s5783_s7 + $0x44] sm:$0xf]  ;;  %v3463_v12 = vld [vmem:[%s5783_s7 + $0x48] sm:$0xf0] }
 0x27c   :  { %v3466_v48 = vor.u32 %v3804_v4, %v3463_v12  ;;  %v3511_v16 = vld [vmem:[%s5783_s7 + $0xa8] sm:$0xf0]  ;;  %v2189_v12 = vld [vmem:[%s5784_s6] sm:$0xf] }
 0x27d   :  { %2709 = vmatpush.bf16.msra.mxu3 %v3518_v10  ;;  %2698 = vmatpush.bf16.msrb.mxu1 %v3438_v33  ;;  %v3474_v10 = vor.u32 %v3806_v39, %v3471_v20  ;;  %v3663_v33 = vld [vmem:[%s5783_s7 + $0x1d8] sm:$0xf0]  ;;  %v3514_v42 = vor.u32 %v3816_v59, %v3511_v16  ;;  %v3623_v4 = vld [vmem:[%s5783_s7 + $0x188] sm:$0xf0] }
 0x27e   :  { %v3869_v59 = vld [vmem:[%s5785_s9 + $0x48] sm:$0xff] }
 0x281   :  { %v1820_v5 = vpop.f32.mrf.mxu0  ;;  %2710 = vmatpush.bf16.msra.mxu3 %v3510_v63  ;;  %2699 = vmatpush.bf16.msrb.mxu1 %v3430_v60  ;;  %v3822_v63 = vld [vmem:[%s5783_s7 + $0xd4] sm:$0xf]  ;;  %v3647_v60 = vld [vmem:[%s5783_s7 + $0x1b8] sm:$0xf0] }
 0x282   :  { %v3837_v5 = vld [vmem:[%s5783_s7 + $0x144] sm:$0xf0] }
 0x283   :  { %v3590_v28 = vor.u32 %v3837_v5, %v3589_v22  ;;  %v3615_v5 = vld [vmem:[%s5783_s7 + $0x178] sm:$0xf0] }
 0x285   :  { %2721 = vmatpush.bf16.msrb.mxu0 %v3590_v28  ;;  %v3551_v28 = vld [vmem:[%s5783_s7 + $0xf8] sm:$0xf0] }
 0x289   :  { %v5293_v41 = vpop.f32.mrf.mxu0 }
 0x28a   :  { %v1918_v36 = vadd.f32 %v5293_v41, %v1822_v47  ;;  %v3501_v41 = vld [vmem:[%s5783_s7 + $0x90] sm:$0xf]  ;;  %v3824_v47 = vld [vmem:[%s5783_s7 + $0xe4] sm:$0xf] }
 0x28b   :  { %v3502_v8 = vor.u32 %v3815_v61, %v3501_v41  ;;  %v3546_v50 = vor.u32 %v3824_v47, %v3543_v56  ;;  %v3854_v41 = vld [vmem:[%s5783_s7 + $0x1d4] sm:$0xf]  ;;  %v3631_v47 = vld [vmem:[%s5783_s7 + $0x198] sm:$0xf0] }
 0x28c   :  { %v3666_v61 = vor.u32 %v3854_v41, %v3663_v33  ;;  %v3634_v56 = vor.u32 %v3846_v44, %v3631_v47  ;;  %v2192_v33 = vperm.slane %v2189_v12, 1 }
 0x28d   :  { %2711 = vmatpush.bf16.msra.mxu3 %v3502_v8  ;;  %v3800_v8 = vld [vmem:[%s5783_s7 + $0x24] sm:$0xf] }
 0x291   :  { %v1916_v32 = vpop.f32.mrf.mxu0  ;;  %2712 = vmatpush.bf16.msra.mxu3 %v3494_v51  ;;  %v3848_v51 = vld [vmem:[%s5783_s7 + $0x1a4] sm:$0xf] }
 0x292   :  { %v3582_v32 = vor.u32 %v3835_v31, %v3581_v26  ;;  %v3618_v31 = vor.u32 %v3842_v58, %v3615_v5  ;;  %v3450_v5 = vor.u32 %v3800_v8, %v3447_v21 }
 0x294   :  { %2722 = vmatpush.bf16.msrb.mxu0 %v3582_v32  ;;  %v3682_v32 = vor.u32 %v3858_v37, %v3679_v14  ;;  %v3439_v37 = vld [vmem:[%s5783_s7 + $0x18] sm:$0xf0]  ;;  %v3830_v14 = vld [vmem:[%s5783_s7 + $0x114] sm:$0xf] }
 0x298   :  { %2723 = vmatpush.bf16.msrb.mxu0 %v3574_v3  ;;  %v3674_v3 = vor.u32 %v3856_v62, %v3671_v57  ;;  %v3495_v62 = vld [vmem:[%s5783_s7 + $0x88] sm:$0xf0]  ;;  %v3844_v57 = vld [vmem:[%s5783_s7 + $0x184] sm:$0xf] }
 0x299   :  { %v5379_v43 = vpop.f32.mrf.mxu0 }
 0x29a   :  { %v2078_v54 = vadd.f32 %v5379_v43, %v1918_v36  ;;  %v3810_v43 = vld [vmem:[%s5783_s7 + $0x74] sm:$0xf]  ;;  %v3836_v36 = vld [vmem:[%s5783_s7 + $0x144] sm:$0xf] }
 0x29b   :  { %v3490_v26 = vor.u32 %v3810_v43, %v3487_v29  ;;  %v3530_v43 = vor.u32 %v3820_v55, %v3527_v34  ;;  %v3655_v29 = vld [vmem:[%s5783_s7 + $0x1c8] sm:$0xf0] }
 0x29c   :  { %2724 = vmatpush.bf16.msrb.mxu0 %v3566_v40  ;;  %v3834_v40 = vld [vmem:[%s5783_s7 + $0x134] sm:$0xf]  ;;  %v3658_v58 = vor.u32 %v3852_v7, %v3655_v29 }
 0x2a0   :  { %2725 = vmatpush.bf16.msrb.mxu0 %v3558_v30 }
 0x2a1   :  { %v2076_v13 = vpop.f32.mrf.mxu0 }
 0x2a2   :  { %v3554_v13 = vor.u32 %v3826_v45, %v3551_v28  ;;  %v3850_v45 = vld [vmem:[%s5783_s7 + $0x1b4] sm:$0xf] }
 0x2a3   :  { %v3650_v30 = vor.u32 %v3850_v45, %v3647_v60  ;;  %v3798_v28 = vld [vmem:[%s5783_s7 + $0x14] sm:$0xf]  ;;  %v3875_v45 = vld [vmem:[%s5785_s9 + $0x78] sm:$0xff] }
 0x2a4   :  { %v3874_v60 = vld [vmem:[%s5785_s9 + $0x70] sm:$0xff] }
 0x2a9   :  { %v2170_v0 = vpop.f32.mrf.mxu0 }
 0x2aa   :  { %v2174_v2 = vadd.f32 %v2170_v0, %v2078_v54  ;;  %v3538_v54 = vor.u32 %v3822_v63, %v3535_v18  ;;  %v3458_v0 = vor.u32 %v3802_v1, %v3455_v9  ;;  %v2194_v1 = vperm.slane %v2189_v12, 3  ;;  %v3867_v9 = vld [vmem:[%s5785_s9 + $0x38] sm:$0xff] }
 0x2ac   :  { %v2179_v22 = vadd.f32 %v3880_v17, %v2174_v2  ;;  %v3594_v17 = vor.u32 %v3836_v36, %v3591_v53  ;;  %v3586_v2 = vor.u32 %v3834_v40, %v3583_v49  ;;  %v3626_v36 = vor.u32 %v3844_v57, %v3623_v4 }
 0x2ad   :  { %v2193_v53 = vperm.slane %v2189_v12, 2 }
 0x2ae   :  { %v2180_v24 = vpack.c.bf16 %v2179_v22, %v2179_v22  ;;  %v3832_v22 = vld [vmem:[%s5783_s7 + $0x124] sm:$0xf] }
 0x2af   :  { %v3578_v46 = vor.u32 %v3832_v22, %v3575_v35 }
 0x2b0   :  { %3423 = vmatmul.msk.bf16.vlgmr.msra.gmra.mxu1 %vm338_vm8, %v2180_v24  ;;  %3424 = vmatmul.msk.bf16.vlgmr.msrb.gmra.mxu3 %vm338_vm8, %v2180_v24 }
 0x2b1   :  { %3425 = vmatmul.msk.bf16.vlgmr.msra.gmra.mxu0 %vm338_vm8, %v2180_v24  ;;  %3426 = vmatmul.msk.bf16.vlgmr.msrb.gmra.mxu2 %vm338_vm8, %v2180_v24  ;;  %v2172_v25 = vpop.f32.mrf.mxu0  ;;  %v3522_v24 = vor.u32 %v3818_v52, %v3519_v19  ;;  %v3864_v52 = vld [vmem:[%s5785_s9 + $0x20] sm:$0xff]  ;;  %v3863_v19 = vld [vmem:[%s5785_s9 + $0x18] sm:$0xff] }
 0x2b2   :  { %2744 = vmatpush.bf16.msra.mxu1 %v3490_v26  ;;  %2770 = vmatpush.bf16.msra.mxu0 %v3618_v31  ;;  %v3442_v26 = vor.u32 %v3798_v28, %v3439_v37  ;;  %v3567_v31 = vld [vmem:[%s5783_s7 + $0x118] sm:$0xf0]  ;;  %v3796_v25 = vld [vmem:[%s5783_s7 + $0x4] sm:$0xf]  ;;  %v3873_v28 = vld [vmem:[%s5785_s9 + $0x68] sm:$0xff] }
 0x2b3   :  { %2757 = vmatpush.bf16.msrb.mxu3 %v3554_v13  ;;  %2783 = vmatpush.bf16.msrb.mxu2 %v3682_v32  ;;  %v3570_v15 = vor.u32 %v3830_v14, %v3567_v31  ;;  %v3642_v13 = vor.u32 %v3848_v51, %v3639_v6  ;;  %v3431_v32 = vld [vmem:[%s5783_s7 + $0x8] sm:$0xf0]  ;;  %v3860_v37 = vld [vmem:[%s5785_s9] sm:$0xff]  ;;  %v3870_v31 = vld [vmem:[%s5785_s9 + $0x50] sm:$0xff] }
 0x2b4   :  { %v3434_v39 = vor.u32 %v3796_v25, %v3431_v32  ;;  %v3872_v14 = vld [vmem:[%s5785_s9 + $0x60] sm:$0xff]  ;;  %v3898_v32 = vmov 0  }
 0x2b5   :  { %v2366_v51 = vld [vmem:[%s5787_s8] sm:$0x3]  ;;  %3877 = vset.pattern.permute.xlu1 %v3898_v32  ;;  %3878 = vset.pattern.permute.xlu0 %v3898_v32 }
 0x2b6   :  { %2745 = vmatpush.bf16.msra.mxu1 %v3482_v27  ;;  %2771 = vmatpush.bf16.msra.mxu0 %v3610_v11  ;;  %v3828_v27 = vld [vmem:[%s5783_s7 + $0x104] sm:$0xf]  ;;  %v3559_v11 = vld [vmem:[%s5783_s7 + $0x108] sm:$0xf0]  ;;  %v2368_v6 = vperm.slane %v2366_v51, 0 }
 0x2b7   :  { %2758 = vmatpush.bf16.msrb.mxu3 %v3546_v50  ;;  %2784 = vmatpush.bf16.msrb.mxu2 %v3674_v3  ;;  %v3562_v20 = vor.u32 %v3828_v27, %v3559_v11  ;;  %v3812_v50 = vld [vmem:[%s5783_s7 + $0x84] sm:$0xf] }
 0x2b8   :  { %v3498_v3 = vor.u32 %v3812_v50, %v3495_v62  ;;  %v2980_v25 = vld [vmem:[%s5788_s12] sm:$0xff] }
 0x2b9   :  { %2982 = vperm.xlu1 %3877, %v2980_v25  }
 0x2ba   :  { %2746 = vmatpush.bf16.msra.mxu1 %v3474_v10  ;;  %2772 = vmatpush.bf16.msra.mxu0 %v3602_v38  ;;  %v3503_v10 = vld [vmem:[%s5783_s7 + $0x98] sm:$0xf0] }
 0x2bb   :  { %2759 = vmatpush.bf16.msrb.mxu3 %v3538_v54  ;;  %2785 = vmatpush.bf16.msrb.mxu2 %v3666_v61  ;;  %v3506_v38 = vor.u32 %v3814_v23, %v3503_v10 }
 0x2be   :  { %2747 = vmatpush.bf16.msra.mxu1 %v3466_v48  ;;  %2773 = vmatpush.bf16.msra.mxu0 %v3594_v17  ;;  %v2191_v48 = vperm.slane %v2189_v12, 0 }
 0x2bf   :  { %2760 = vmatpush.bf16.msrb.mxu3 %v3530_v43  ;;  %2786 = vmatpush.bf16.msrb.mxu2 %v3658_v58  ;;  %v3866_v43 = vld [vmem:[%s5785_s9 + $0x30] sm:$0xff] }
 0x2c2   :  { %2748 = vmatpush.bf16.msra.mxu1 %v3458_v0  ;;  %2774 = vmatpush.bf16.msra.mxu0 %v3586_v2 }
 0x2c3   :  { %2761 = vmatpush.bf16.msrb.mxu3 %v3522_v24  ;;  %2787 = vmatpush.bf16.msrb.mxu2 %v3650_v30  ;;  %v3862_v24 = vld [vmem:[%s5785_s9 + $0x10] sm:$0xff]  ;;  %v3861_v30 = vld [vmem:[%s5785_s9 + $0x8] sm:$0xff] }
 0x2c6   :  { %2749 = vmatpush.bf16.msra.mxu1 %v3450_v5  ;;  %2775 = vmatpush.bf16.msra.mxu0 %v3578_v46  ;;  %v3865_v46 = vld [vmem:[%s5785_s9 + $0x28] sm:$0xff] }
 0x2c7   :  { %2762 = vmatpush.bf16.msrb.mxu3 %v3514_v42  ;;  %2788 = vmatpush.bf16.msrb.mxu2 %v3642_v13  ;;  %v3868_v42 = vld [vmem:[%s5785_s9 + $0x40] sm:$0xff] }
 0x2ca   :  { %2750 = vmatpush.bf16.msra.mxu1 %v3442_v26  ;;  %2776 = vmatpush.bf16.msra.mxu0 %v3570_v15  ;;  %v3871_v26 = vld [vmem:[%s5785_s9 + $0x58] sm:$0xff] }
 0x2cb   :  { %2763 = vmatpush.bf16.msrb.mxu3 %v3506_v38  ;;  %2789 = vmatpush.bf16.msrb.mxu2 %v3634_v56 }
 0x2ce   :  { %2751 = vmatpush.bf16.msra.mxu1 %v3434_v39  ;;  %2777 = vmatpush.bf16.msra.mxu0 %v3562_v20 }
 0x2cf   :  { %2764 = vmatpush.bf16.msrb.mxu3 %v3498_v3  ;;  %2790 = vmatpush.bf16.msrb.mxu2 %v3626_v36  ;;  %v2369_v3 = vperm.slane %v2366_v51, 1 }
 0x32d   :  { %v2251_v17 = vpop.f32.mrf.mxu1 }
 0x32e   :  { %v2252_v63 = vadd.f32 %v2251_v17, %v2191_v48  ;;  %v2277_v18 = vpop.f32.mrf.mxu0 }
 0x32f   :  { %v2278_v41 = vadd.f32 %v2277_v18, %v2193_v53 }
 0x330   :  { %v2294_v54 = vmax.f32 %v2252_v63, 0.0 }
 0x331   :  { %v2296_v61 = vmax.f32 %v2278_v41, 0.0 }
 0x332   :  { %v2298_v0 = vpack.c.bf16 %v2294_v54, %v2294_v54 }
 0x333   :  { %v2300_v40 = vpack.c.bf16 %v2296_v61, %v2296_v61  ;;  %v2264_v49 = vpop.f32.mrf.mxu3 }
 0x334   :  { %v2265_v2 = vadd.f32 %v2264_v49, %v2192_v33  ;;  %v2290_v55 = vpop.f32.mrf.mxu2  ;;  %2700 = vmatmul.bf16.vlgmr.msrb.gmra.mxu1 %v2298_v0 }
 0x335   :  { %v2291_v34 = vadd.f32 %v2290_v55, %v2194_v1  ;;  %2726 = vmatmul.bf16.vlgmr.msrb.gmra.mxu0 %v2300_v40  ;;  %v2253_v7 = vpop.f32.mrf.mxu1  ;;  %2932 = vmatpush.bf16.msrb.mxu1 %v3867_v9 }
 0x336   :  { %v2295_v29 = vmax.f32 %v2265_v2, 0.0  ;;  %v2279_v58 = vpop.f32.mrf.mxu0  ;;  %v2964_v2 = vld [vmem:[%s5789_s11] sm:$0xff] }
 0x337   :  { %v2297_v8 = vmax.f32 %v2291_v34, 0.0  ;;  %vm2965_vm9 = vcmp.gt.f32.partialorder %v2964_v2, 0.5 }
 0x338   :  { %v2299_v21 = vpack.c.bf16 %v2295_v29, %v2295_v29 }
 0x339   :  { %v2301_v22 = vpack.c.bf16 %v2297_v8, %v2297_v8  ;;  %2933 = vmatpush.bf16.msrb.mxu1 %v3866_v43 }
 0x33a   :  { %2713 = vmatmul.bf16.vlgmr.msra.gmra.mxu3 %v2299_v21 }
 0x33b   :  { %2739 = vmatmul.bf16.vlgmr.msra.gmra.mxu2 %v2301_v22  ;;  %v2266_v5 = vpop.f32.mrf.mxu3  ;;  %2945 = vmatpush.bf16.msra.mxu3 %v3875_v45 }
 0x33c   :  { %v2292_v35 = vpop.f32.mrf.mxu2 }
 0x33d   :  { %2934 = vmatpush.bf16.msrb.mxu1 %v3865_v46 }
 0x33f   :  { %2946 = vmatpush.bf16.msra.mxu3 %v3874_v60 }
 0x341   :  { %2935 = vmatpush.bf16.msrb.mxu1 %v3864_v52 }
 0x343   :  { %2947 = vmatpush.bf16.msra.mxu3 %v3873_v28 }
 0x344   :  { %2752 = vmatmul.bf16.vlgmr.msra.gmra.mxu1 %v2298_v0  ;;  %v2958_v0 = vlaneseq }
 0x345   :  { %2778 = vmatmul.bf16.vlgmr.msra.gmra.mxu0 %v2300_v40  ;;  %2936 = vmatpush.bf16.msrb.mxu1 %v3863_v19  ;;  %v3881_v40 = vld [vmem:[%s5786_s10] ss:$0 sm:$0xff] }
 0x346   :  { %v2959_v49 = vand.u32 127, %v2958_v0 }
 0x347   :  { %2948 = vmatpush.bf16.msra.mxu3 %v3872_v14 }
 0x348   :  { %vm2960_vm10 = vcmp.eq.s32.totalorder %v2959_v49, 8  ;;  %vm2988_vm12 = vcmp.lt.s32.totalorder %v2959_v49, 8  ;;  %vm2994_vm13 = vcmp.eq.s32.totalorder %v2959_v49, 0  ;;  %vm2996_vm14 = vcmp.eq.s32.totalorder %v2959_v49, 1 }
 0x349   :  { %2937 = vmatpush.bf16.msrb.mxu1 %v3862_v24  ;;  %v2983_v24 = vpop.permute.xlu1 %2982  ;;  %vm2999_vm15 = vcmp.eq.s32.totalorder %v2959_v49, 2 }
 0x34a   :  { %2765 = vmatmul.bf16.vlgmr.msrb.gmra.mxu3 %v2299_v21  ;;  %vm2984_vm11 = vcmp.eq.s32.totalorder %v2959_v49, %v2983_v24 }
 0x34b   :  { %2791 = vmatmul.bf16.vlgmr.msrb.gmra.mxu2 %v2301_v22  ;;  %2949 = vmatpush.bf16.msra.mxu3 %v3871_v26 }
 0x34d   :  { %2938 = vmatpush.bf16.msrb.mxu1 %v3861_v30 }
 0x34f   :  { %2950 = vmatpush.bf16.msra.mxu3 %v3870_v31 }
 0x351   :  { %2939 = vmatpush.bf16.msrb.mxu1 %v3860_v37 }
 0x353   :  { %2951 = vmatpush.bf16.msra.mxu3 %v3869_v59 }
 0x357   :  { %2952 = vmatpush.bf16.msra.mxu3 %v3868_v42 }
 0x3b1   :  { %v2701_v16 = vpop.f32.mrf.mxu1 }
 0x3b2   :  { %v2727_v15 = vpop.f32.mrf.mxu0  ;;  %v2702_v11 = vadd.f32 %v2701_v16, %v2368_v6 }
 0x3b9   :  { %v2703_v13 = vpop.f32.mrf.mxu1 }
 0x3ba   :  { %v2729_v27 = vpop.f32.mrf.mxu0 }
 0x3bd   :  { %v2714_v39 = vpop.f32.mrf.mxu3 }
 0x3be   :  { %v2715_v20 = vadd.f32 %v2714_v39, %v2702_v11  ;;  %v2740_v23 = vpop.f32.mrf.mxu2 }
 0x3c0   :  { %v2728_v10 = vadd.f32 %v2727_v15, %v2715_v20 }
 0x3c1   :  { %v2753_v44 = vpop.f32.mrf.mxu1 }
 0x3c2   :  { %v2741_v38 = vadd.f32 %v2740_v23, %v2728_v10  ;;  %v2779_v47 = vpop.f32.mrf.mxu0  ;;  %v2754_v36 = vadd.f32 %v2753_v44, %v2369_v3 }
 0x3c4   :  { %v2796_v56 = vmax.f32 %v2741_v38, 0.0 }
 0x3c5   :  { %v2716_v50 = vpop.f32.mrf.mxu3 }
 0x3c6   :  { %v2798_v62 = vpack.c.bf16 %v2796_v56, %v2796_v56  ;;  %v2742_v57 = vpop.f32.mrf.mxu2 }
 0x3c8   :  { %2940 = vmatmul.bf16.vlgmr.msrb.gmra.mxu1 %v2798_v62 }
 0x3c9   :  { %v2755_v4 = vpop.f32.mrf.mxu1 }
 0x3ca   :  { %v2781_v12 = vpop.f32.mrf.mxu0 }
 0x3cd   :  { %v2766_v48 = vpop.f32.mrf.mxu3 }
 0x3ce   :  { %v2767_v53 = vadd.f32 %v2766_v48, %v2754_v36  ;;  %v2792_v17 = vpop.f32.mrf.mxu2 }
 0x3d0   :  { %v2780_v63 = vadd.f32 %v2779_v47, %v2767_v53 }
 0x3d2   :  { %v2793_v18 = vadd.f32 %v2792_v17, %v2780_v63 }
 0x3d4   :  { %v2797_v41 = vmax.f32 %v2793_v18, 0.0 }
 0x3d5   :  { %v2768_v54 = vpop.f32.mrf.mxu3 }
 0x3d6   :  { %v2799_v33 = vpack.c.bf16 %v2797_v41, %v2797_v41  ;;  %v2794_v61 = vpop.f32.mrf.mxu2 }
 0x3d8   :  { %2953 = vmatmul.bf16.vlgmr.msra.gmra.mxu3 %v2799_v33 }
 0x445   :  { %v2941_v1 = vpop.f32.mrf.mxu1 }
 0x446   :  { %v2942_v55 = vadd.f32 %v3881_v40, %v2941_v1 }
 0x44d   :  { %v2943_v9 = vpop.f32.mrf.mxu1 }
 0x45b   :  { %v2954_v34 = vpop.f32.mrf.mxu3 }
 0x45c   :  { %v2955_v7 = vadd.f32 %v2954_v34, %v2942_v55 }
 0x45e   :  { %v2966_v43 = vsel %vm2965_vm9, %v2955_v7, -1e+08  ;;  %v2961_v29 = vsel %vm2960_vm10, %v2955_v7, 0.0 }
 0x45f   :  { %2967 = vmax.xlane.f32.xlu0 %v2966_v43  ;;  %2962 = vadd.xlane.f32.xlu1 %v2961_v29 }
 0x463   :  { %v2956_v58 = vpop.f32.mrf.mxu3 }
 0x4d2   :  { %v2968_v8 = vpop.xlane.xlu0 %2967  ;;  %v2963_v31 = vpop.xlane.xlu1 %2962 }
 0x4d3   :  { %v2969_v21 = vsub.f32 %v2966_v43, %v2968_v8  ;;  %v2997_v15 = vsel %vm2996_vm14, %v2963_v31, 0.0 }
 0x4d5   :  { %v2970_v22 = vmul.f32 1.442695, %v2969_v21 }
 0x4d7   :  { %3882 = vpow2.f32 %v2970_v22 }
 0x4dd   :  { %v3883_v5 = vpop.eup %3882 }
 0x4de   :  { %2972 = vadd.xlane.f32.xlu0 %v3883_v5 }
 0x551   :  { %v2973_v35 = vpop.xlane.xlu0 %2972 }
 0x552   :  { %3884 = vrcp.f32 %v2973_v35 }
 0x558   :  { %v3885_v46 = vpop.eup %3884 }
 0x559   :  { %v2975_v52 = vmul.f32 %v3885_v46, %v3883_v5 }
 0x55b   :  { %v2976_v19 = vmax.f32 %v2975_v52, 1.1920929e-07 }
 0x55d   :  { %v2977_v45 = vmin.f32 %v2976_v19, 0.9999999 }
 0x55f   :  { %3886 = vlog2.f32 %v2977_v45 }
 0x565   :  { %v3887_v60 = vpop.eup %3886 }
 0x566   :  { %v2979_v30 = vmul.f32 0.6931472, %v3887_v60 }
 0x568   :  { %v2985_v28 = vsel %vm2984_vm11, %v2979_v30, 0.0  ;;  %v2989_v37 = vmul.f32 %v2979_v30, %v2975_v52 }
 0x569   :  { %2986 = vadd.xlane.f32.xlu2 %v2985_v28 }
 0x56a   :  { %v2990_v14 = vsel %vm2988_vm12, %v2989_v37, 0.0 }
 0x571   :  { %2991 = vadd.xlane.f32.xlu2 %v2990_v14 }
 0x5dc   :  { %v2987_v26 = vpop.xlane.xlu2 %2986 }
 0x5dd   :  { %v2995_v59 = vsel %vm2994_vm13, %v2987_v26, 0.0 }
 0x5de   :  { %v2998_v51 = vadd.f32 %v2997_v15, %v2995_v59 }
 0x5e4   :  { %v2992_v16 = vpop.xlane.xlu2 %2991 }
 0x5e5   :  { %v2993_v42 = vsub.f32 0.0, %v2992_v16 }
 0x5e7   :  { %v3000_v6 = vsel %vm2999_vm15, %v2993_v42, 0.0 }
 0x5e8   :  { %v3001_v25 = vadd.f32 %v3000_v6, %v2998_v51 }
 0x5ea   :  { %3002 = vst [vmem:[%s5790_s13] sm:$0xff] %v3001_v25 }

</bundles_post_ra>
